<compile_context>
chip_gen: v7x
topology: tpu7x:2x2x1
jax: 0.10.0
libtpu: 0.0.40
codegen_flags: <defaults>
</compile_context>

<pallas_src>
import jax
import jax.numpy as jnp
from jax.experimental import pallas as pl
from jax.experimental.pallas import tpu as pltpu

LEAKY_SLOPE = 0.2
BN_EPS = 1e-5


def _pick_tile(dim, pref, mult):
    """Largest tile <= pref that divides `dim` and is a multiple of `mult`;
    falls back to the full dim (single block, always a legal block shape)."""
    if dim <= pref:
        return dim
    t = (pref // mult) * mult
    while t >= mult:
        if dim % t == 0:
            return t
        t -= mult
    return dim


# ----------------------------- Pallas kernels ------------------------------

def _conv3x3s2_row_kernel(a0_ref, b0_ref, c0_ref, a1_ref, b1_ref, c1_ref,
                          w_ref, aux_ref, o_ref):
    """One output row of Conv2d(k3,s2,p1) + bias + LeakyReLU(0.2) + BatchNorm(eval).

    a*/b*/c* are (Wo+1, Cin) bf16 rows of the input parity planes:
      a = even-row plane at plane-row oh      (tap kh = 0)
      b = odd-row  plane at plane-row oh      (tap kh = 1)
      c = even-row plane at plane-row oh + 1  (tap kh = 2)
    suffix 0/1 = even/odd column-parity plane; the kw column shift (kw // 2) is a
    contiguous VMEM slice. All 9 taps accumulate in f32 registers (no scratch,
    no pl.when), then the fused bias + LeakyReLU + folded-BN epilogue stores bf16.
    """
    Wo = o_ref.shape[0]
    kh_refs = ((a0_ref, a1_ref), (b0_ref, b1_ref), (c0_ref, c1_ref))
    acc = None
    for kh in range(3):
        for kw in range(3):
            pc, cs = kw & 1, kw >> 1
            x = kh_refs[kh][pc][pl.ds(cs, Wo), :]            # (Wo, Cin) bf16
            t = jnp.dot(x, w_ref[kh * 3 + kw],               # (Cin, Cout) bf16
                        preferred_element_type=jnp.float32)
            acc = t if acc is None else acc + t
    aux = aux_ref[...]                                        # (4, Cout) f32
    z = acc + aux[0:1, :]                                     # + conv bias
    # leaky_relu(z)*scale + shift  ==  where(z>0, z*scale, z*(0.2*scale)) + shift
    y = jnp.where(z > 0, z * aux[1:2, :], z * aux[2:3, :]) + aux[3:4, :]
    o_ref[...] = y.astype(o_ref.dtype)


def _fc_head_kernel(x_ref, w1_ref, b1_ref, w2_ref, b2_ref, o_ref, acc_ref):
    """Linear(feat,512)+LeakyReLU(0.2)+[Dropout=identity]+Linear(512,1)+Sigmoid."""
    k = pl.program_id(1)

    @pl.when(k == 0)
    def _():
        acc_ref[...] = jnp.zeros_like(acc_ref)

    acc_ref[...] += jnp.dot(x_ref[...], w1_ref[...],
                            preferred_element_type=jnp.float32)

    @pl.when(k == pl.num_programs(1) - 1)
    def _():
        h = acc_ref[...] + b1_ref[...]
        h = jnp.where(h > 0, h, LEAKY_SLOPE * h)
        # TODO(synk): Dropout(0.5) is stochastic in train mode; eval-mode identity here.
        # fc2 (512 -> 1) as a VPU multiply + lane reduction (avoids an N=1 MXU dot).
        y = jnp.sum(h * w2_ref[...], axis=-1, keepdims=True) + b2_ref[...]
        o_ref[...] = jax.nn.sigmoid(y).astype(o_ref.dtype)


# ------------------------------ kernel wrappers -----------------------------

def conv_bn_block(x_nhwc, w_taps, aux):
    """Conv2d(k3,s2,p1) -> LeakyReLU(0.2) -> BatchNorm2d(eval), NHWC in/out, bf16 out."""
    N, H, W, Cin = x_nhwc.shape
    assert H % 2 == 0 and W % 2 == 0, "image_size must be divisible by 8"
    Cout = w_taps.shape[-1]
    Ho, Wo = H // 2, W // 2

    # One-time space-to-depth rearrangement (replaces the 9x im2col patch tensor):
    # plane[pr][pc][n, r, c, :] = x_pad[n, 2r+pr, 2c+pc, :], shape (N, Ho+1, Wo+1, Cin).
    xp = jnp.pad(x_nhwc, ((0, 0), (1, 1), (1, 1), (0, 0)))
    p00 = xp[:, 0::2, 0::2, :]
    p01 = xp[:, 0::2, 1::2, :]
    p10 = xp[:, 1::2, 0::2, :]
    p11 = xp[:, 1::2, 1::2, :]

    act_row = lambda im: pl.BlockSpec((None, None, Wo + 1, Cin), im)
    at_oh = lambda n, oh: (n, oh, 0, 0)
    at_oh1 = lambda n, oh: (n, oh + 1, 0, 0)

    return pl.pallas_call(
        _conv3x3s2_row_kernel,
        out_shape=jax.ShapeDtypeStruct((N, Ho, Wo, Cout), jnp.bfloat16),
        grid_spec=pltpu.PrefetchScalarGridSpec(
            num_scalar_prefetch=0,
            grid=(N, Ho),                                  # one output row per step
            in_specs=[
                act_row(at_oh),    # a0: even-row plane, even cols, row oh
                act_row(at_oh),    # b0: odd-row  plane, even cols, row oh
                act_row(at_oh1),   # c0: even-row plane, even cols, row oh+1
                act_row(at_oh),    # a1: even-row plane, odd  cols, row oh
                act_row(at_oh),    # b1: odd-row  plane, odd  cols, row oh
                act_row(at_oh1),   # c1: even-row plane, odd  cols, row oh+1
                pl.BlockSpec((9, Cin, Cout), lambda n, oh: (0, 0, 0)),
                pl.BlockSpec((4, Cout), lambda n, oh: (0, 0)),
            ],
            out_specs=pl.BlockSpec((None, None, Wo, Cout),
                                   lambda n, oh: (n, oh, 0, 0)),
        ),
        compiler_params=pltpu.CompilerParams(
            dimension_semantics=("parallel", "parallel"),
            vmem_limit_bytes=32 * 1024 * 1024),
    )(p00, p10, p00, p01, p11, p01, w_taps, aux)


def fc_head(x, w1, b1, w2_row, b2, *, tm_pref=512, tk_pref=1024):
    """sigmoid(leaky_relu(x @ w1 + b1) @ w2 + b2), one kernel, fc1 K-tiled (streaming)."""
    M, K = x.shape
    Kw, Hd = w1.shape
    assert K == Kw
    tm = _pick_tile(M, tm_pref, 8)      # batch axis: full dim or mult-of-8 divisor
    tk = _pick_tile(K, tk_pref, 128)    # feat = 256*(s//8)^2, always 128-divisible

    return pl.pallas_call(
        _fc_head_kernel,
        out_shape=jax.ShapeDtypeStruct((M, 1), jnp.float32),
        grid_spec=pltpu.PrefetchScalarGridSpec(
            num_scalar_prefetch=0,
            grid=(M // tm, K // tk),
            in_specs=[
                pl.BlockSpec((tm, tk), lambda i, k: (i, k)),
                pl.BlockSpec((tk, Hd), lambda i, k: (k, 0)),
                pl.BlockSpec((1, Hd), lambda i, k: (0, 0)),
                pl.BlockSpec((1, Hd), lambda i, k: (0, 0)),
                pl.BlockSpec((1, 1), lambda i, k: (0, 0)),
            ],
            out_specs=pl.BlockSpec((tm, 1), lambda i, k: (i, 0)),
            scratch_shapes=[pltpu.VMEM((tm, Hd), jnp.float32)],
        ),
        compiler_params=pltpu.CompilerParams(
            dimension_semantics=("parallel", "arbitrary"),
            vmem_limit_bytes=32 * 1024 * 1024),
    )(x, w1, b1, w2_row, b2)


# ------------------------------- forward pass -------------------------------

def discriminator_forward(x_nchw, p):
    x = jnp.transpose(x_nchw, (0, 2, 3, 1)).astype(jnp.bfloat16)    # NCHW -> NHWC
    x = conv_bn_block(x, p["w1"], p["aux1"])
    x = conv_bn_block(x, p["w2"], p["aux2"])
    x = conv_bn_block(x, p["w3"], p["aux3"])
    x = x.reshape(x.shape[0], -1)    # NHWC flatten; fc1_w was pre-permuted to match
    return fc_head(x, p["fc1_w"], p["fc1_b"], p["fc2_w"], p["fc2_b"])   # (N, 1)


# ------------------------ parameter init / preparation ----------------------

def init_params(key, image_size):
    """Raw PyTorch-layout parameters (plus default eval running stats)."""
    ks = jax.random.split(key, 16)

    def u(k, shape, s):
        return jax.random.uniform(k, shape, jnp.float32, -1.0, 1.0) * s

    feat = 256 * (image_size // 8) * (image_size // 8)
    p = {}
    p["w1"] = u(ks[0], (64, 3, 3, 3), 0.2);       p["b1"] = u(ks[1], (64,), 0.2)
    p["g1"] = 1.0 + u(ks[2], (64,), 0.1);         p["be1"] = u(ks[3], (64,), 0.1)
    p["rm1"] = jnp.zeros((64,), jnp.float32);     p["rv1"] = jnp.ones((64,), jnp.float32)
    p["w2"] = u(ks[4], (128, 64, 3, 3), 0.05);    p["b2"] = u(ks[5], (128,), 0.05)
    p["g2"] = 1.0 + u(ks[6], (128,), 0.1);        p["be2"] = u(ks[7], (128,), 0.1)
    p["rm2"] = jnp.zeros((128,), jnp.float32);    p["rv2"] = jnp.ones((128,), jnp.float32)
    p["w3"] = u(ks[8], (256, 128, 3, 3), 0.03);   p["b3"] = u(ks[9], (256,), 0.03)
    p["g3"] = 1.0 + u(ks[10], (256,), 0.1);       p["be3"] = u(ks[11], (256,), 0.1)
    p["rm3"] = jnp.zeros((256,), jnp.float32);    p["rv3"] = jnp.ones((256,), jnp.float32)
    p["fc1_w"] = u(ks[12], (512, feat), 0.03);    p["fc1_b"] = u(ks[13], (512,), 0.03)
    p["fc2_w"] = u(ks[14], (1, 512), 0.04);       p["fc2_b"] = u(ks[15], (1,), 0.04)
    return p


def prepare_params(raw):
    """One-time (outside jit) layout/dtype prep: no per-forward pads, casts or .T."""
    p = {}
    for l, cin in ((1, 3), (2, 64), (3, 128)):
        w = raw[f"w{l}"]                                        # (Cout, Cin, 3, 3)
        cout = w.shape[0]
        # (9, Cin, Cout), tap index = kh*3 + kw
        p[f"w{l}"] = jnp.transpose(w, (2, 3, 1, 0)).reshape(9, cin, cout) \
                        .astype(jnp.bfloat16)
        # folded eval BatchNorm + bias, packed as [bias, scale, 0.2*scale, shift]
        scale = raw[f"g{l}"] / jnp.sqrt(raw[f"rv{l}"] + BN_EPS)
        shift = raw[f"be{l}"] - raw[f"rm{l}"] * scale
        p[f"aux{l}"] = jnp.stack([raw[f"b{l}"], scale, LEAKY_SLOPE * scale, shift]) \
                          .astype(jnp.float32)                  # (4, Cout)
    # fc1: PyTorch Flatten is channel-major (NCHW); permute the input dim once so it
    # consumes our NHWC flatten directly.
    hid, feat = raw["fc1_w"].shape
    hw = int(round((feat // 256) ** 0.5))
    w1 = raw["fc1_w"].reshape(hid, 256, hw, hw)
    w1 = jnp.transpose(w1, (0, 2, 3, 1)).reshape(hid, feat)     # (512, H*W*C order)
    p["fc1_w"] = jnp.transpose(w1, (1, 0)).astype(jnp.bfloat16)  # (feat, 512)
    p["fc1_b"] = raw["fc1_b"].astype(jnp.float32).reshape(1, hid)
    p["fc2_w"] = raw["fc2_w"].astype(jnp.float32).reshape(1, hid)   # row for VPU reduce
    p["fc2_b"] = raw["fc2_b"].astype(jnp.float32).reshape(1, 1)
    return p


if __name__ == "__main__":
    key = jax.random.PRNGKey(0)
    kx, kp = jax.random.split(key)
    image_size = 16
    x = jax.random.normal(kx, (2, 3, image_size, image_size), jnp.float32)

    raw = init_params(kp, image_size)
    params = jax.tree_util.tree_map(jax.block_until_ready, prepare_params(raw))

    out = jax.jit(discriminator_forward)(x, params)
    out = jax.block_until_ready(out)

    assert out.shape == (2, 1)
    assert bool(jnp.all((out >= 0.0) & (out <= 1.0)))
    print("KERNEL_OK")
</pallas_src>

<mosaic_0001>
module attributes {stable_mosaic.version = 11 : i64} {
  func.func @_conv3x3s2_row_kernel(%arg0: i32, %arg1: i32, %arg2: memref<1x1x9x3xbf16, #tpu.memory_space<vmem>>, %arg3: memref<1x1x9x3xbf16, #tpu.memory_space<vmem>>, %arg4: memref<1x1x9x3xbf16, #tpu.memory_space<vmem>>, %arg5: memref<1x1x9x3xbf16, #tpu.memory_space<vmem>>, %arg6: memref<1x1x9x3xbf16, #tpu.memory_space<vmem>>, %arg7: memref<1x1x9x3xbf16, #tpu.memory_space<vmem>>, %arg8: memref<9x3x64xbf16, #tpu.memory_space<vmem>>, %arg9: memref<4x64xf32, #tpu.memory_space<vmem>>, %arg10: memref<1x1x8x64xbf16, #tpu.memory_space<vmem>>) attributes {dimension_semantics = [#tpu.dimension_semantics<parallel>, #tpu.dimension_semantics<parallel>], iteration_bounds = array<i64: 2, 8>, scalar_prefetch = 0 : i64, scratch_operands = 0 : i64, tpu.core_type = #tpu.core_type<tc>, window_params = [{transform_indices = @transform_0, window_bounds = array<i64: 1, 1, 9, 3>}, {transform_indices = @transform_1, window_bounds = array<i64: 1, 1, 9, 3>}, {transform_indices = @transform_2, window_bounds = array<i64: 1, 1, 9, 3>}, {transform_indices = @transform_3, window_bounds = array<i64: 1, 1, 9, 3>}, {transform_indices = @transform_4, window_bounds = array<i64: 1, 1, 9, 3>}, {transform_indices = @transform_5, window_bounds = array<i64: 1, 1, 9, 3>}, {pipeline_mode = #tpu.pipeline_mode<synchronous>, transform_indices = @transform_6, window_bounds = array<i64: 9, 3, 64>}, {pipeline_mode = #tpu.pipeline_mode<synchronous>, transform_indices = @transform_7, window_bounds = array<i64: 4, 64>}, {transform_indices = @transform_8, window_bounds = array<i64: 1, 1, 8, 64>}]} {
    %c0 = arith.constant 0 : index
    %c0_0 = arith.constant 0 : index
    %c0_1 = arith.constant 0 : index
    %c0_2 = arith.constant 0 : index
    %0 = vector.load %arg2[%c0, %c0_0, %c0_1, %c0_2] : memref<1x1x9x3xbf16, #tpu.memory_space<vmem>>, vector<1x1x8x3xbf16>
    %1 = vector.shape_cast %0 : vector<1x1x8x3xbf16> to vector<8x3xbf16>
    %c0_3 = arith.constant 0 : index
    %c0_4 = arith.constant 0 : index
    %c0_5 = arith.constant 0 : index
    %2 = vector.load %arg8[%c0_3, %c0_4, %c0_5] : memref<9x3x64xbf16, #tpu.memory_space<vmem>>, vector<1x3x64xbf16>
    %3 = vector.shape_cast %2 : vector<1x3x64xbf16> to vector<3x64xbf16>
    %cst = arith.constant dense<0.000000e+00> : vector<8x64xf32>
    %4 = tpu.matmul %1, %3, %cst {dimension_numbers = #tpu.dot_dimension_numbers<[1], [0], [0], [1], [0, 0, 1, 1], [], []>} : vector<8x3xbf16>, vector<3x64xbf16>, vector<8x64xf32> -> vector<8x64xf32>
    %c0_6 = arith.constant 0 : index
    %c0_7 = arith.constant 0 : index
    %c0_8 = arith.constant 0 : index
    %c0_9 = arith.constant 0 : index
    %5 = vector.load %arg5[%c0_6, %c0_7, %c0_8, %c0_9] : memref<1x1x9x3xbf16, #tpu.memory_space<vmem>>, vector<1x1x8x3xbf16>
    %6 = vector.shape_cast %5 : vector<1x1x8x3xbf16> to vector<8x3xbf16>
    %c1 = arith.constant 1 : index
    %c0_10 = arith.constant 0 : index
    %c0_11 = arith.constant 0 : index
    %7 = vector.load %arg8[%c1, %c0_10, %c0_11] : memref<9x3x64xbf16, #tpu.memory_space<vmem>>, vector<1x3x64xbf16>
    %8 = vector.shape_cast %7 : vector<1x3x64xbf16> to vector<3x64xbf16>
    %cst_12 = arith.constant dense<0.000000e+00> : vector<8x64xf32>
    %9 = tpu.matmul %6, %8, %cst_12 {dimension_numbers = #tpu.dot_dimension_numbers<[1], [0], [0], [1], [0, 0, 1, 1], [], []>} : vector<8x3xbf16>, vector<3x64xbf16>, vector<8x64xf32> -> vector<8x64xf32>
    %10 = arith.addf %4, %9 : vector<8x64xf32>
    %c0_13 = arith.constant 0 : index
    %c0_14 = arith.constant 0 : index
    %c1_15 = arith.constant 1 : index
    %c0_16 = arith.constant 0 : index
    %11 = vector.load %arg2[%c0_13, %c0_14, %c1_15, %c0_16] : memref<1x1x9x3xbf16, #tpu.memory_space<vmem>>, vector<1x1x8x3xbf16>
    %12 = vector.shape_cast %11 : vector<1x1x8x3xbf16> to vector<8x3xbf16>
    %c2 = arith.constant 2 : index
    %c0_17 = arith.constant 0 : index
    %c0_18 = arith.constant 0 : index
    %13 = vector.load %arg8[%c2, %c0_17, %c0_18] : memref<9x3x64xbf16, #tpu.memory_space<vmem>>, vector<1x3x64xbf16>
    %14 = vector.shape_cast %13 : vector<1x3x64xbf16> to vector<3x64xbf16>
    %cst_19 = arith.constant dense<0.000000e+00> : vector<8x64xf32>
    %15 = tpu.matmul %12, %14, %cst_19 {dimension_numbers = #tpu.dot_dimension_numbers<[1], [0], [0], [1], [0, 0, 1, 1], [], []>} : vector<8x3xbf16>, vector<3x64xbf16>, vector<8x64xf32> -> vector<8x64xf32>
    %16 = arith.addf %10, %15 : vector<8x64xf32>
    %c0_20 = arith.constant 0 : index
    %c0_21 = arith.constant 0 : index
    %c0_22 = arith.constant 0 : index
    %c0_23 = arith.constant 0 : index
    %17 = vector.load %arg3[%c0_20, %c0_21, %c0_22, %c0_23] : memref<1x1x9x3xbf16, #tpu.memory_space<vmem>>, vector<1x1x8x3xbf16>
    %18 = vector.shape_cast %17 : vector<1x1x8x3xbf16> to vector<8x3xbf16>
    %c3 = arith.constant 3 : index
    %c0_24 = arith.constant 0 : index
    %c0_25 = arith.constant 0 : index
    %19 = vector.load %arg8[%c3, %c0_24, %c0_25] : memref<9x3x64xbf16, #tpu.memory_space<vmem>>, vector<1x3x64xbf16>
    %20 = vector.shape_cast %19 : vector<1x3x64xbf16> to vector<3x64xbf16>
    %cst_26 = arith.constant dense<0.000000e+00> : vector<8x64xf32>
    %21 = tpu.matmul %18, %20, %cst_26 {dimension_numbers = #tpu.dot_dimension_numbers<[1], [0], [0], [1], [0, 0, 1, 1], [], []>} : vector<8x3xbf16>, vector<3x64xbf16>, vector<8x64xf32> -> vector<8x64xf32>
    %22 = arith.addf %16, %21 : vector<8x64xf32>
    %c0_27 = arith.constant 0 : index
    %c0_28 = arith.constant 0 : index
    %c0_29 = arith.constant 0 : index
    %c0_30 = arith.constant 0 : index
    %23 = vector.load %arg6[%c0_27, %c0_28, %c0_29, %c0_30] : memref<1x1x9x3xbf16, #tpu.memory_space<vmem>>, vector<1x1x8x3xbf16>
    %24 = vector.shape_cast %23 : vector<1x1x8x3xbf16> to vector<8x3xbf16>
    %c4 = arith.constant 4 : index
    %c0_31 = arith.constant 0 : index
    %c0_32 = arith.constant 0 : index
    %25 = vector.load %arg8[%c4, %c0_31, %c0_32] : memref<9x3x64xbf16, #tpu.memory_space<vmem>>, vector<1x3x64xbf16>
    %26 = vector.shape_cast %25 : vector<1x3x64xbf16> to vector<3x64xbf16>
    %cst_33 = arith.constant dense<0.000000e+00> : vector<8x64xf32>
    %27 = tpu.matmul %24, %26, %cst_33 {dimension_numbers = #tpu.dot_dimension_numbers<[1], [0], [0], [1], [0, 0, 1, 1], [], []>} : vector<8x3xbf16>, vector<3x64xbf16>, vector<8x64xf32> -> vector<8x64xf32>
    %28 = arith.addf %22, %27 : vector<8x64xf32>
    %c0_34 = arith.constant 0 : index
    %c0_35 = arith.constant 0 : index
    %c1_36 = arith.constant 1 : index
    %c0_37 = arith.constant 0 : index
    %29 = vector.load %arg3[%c0_34, %c0_35, %c1_36, %c0_37] : memref<1x1x9x3xbf16, #tpu.memory_space<vmem>>, vector<1x1x8x3xbf16>
    %30 = vector.shape_cast %29 : vector<1x1x8x3xbf16> to vector<8x3xbf16>
    %c5 = arith.constant 5 : index
    %c0_38 = arith.constant 0 : index
    %c0_39 = arith.constant 0 : index
    %31 = vector.load %arg8[%c5, %c0_38, %c0_39] : memref<9x3x64xbf16, #tpu.memory_space<vmem>>, vector<1x3x64xbf16>
    %32 = vector.shape_cast %31 : vector<1x3x64xbf16> to vector<3x64xbf16>
    %cst_40 = arith.constant dense<0.000000e+00> : vector<8x64xf32>
    %33 = tpu.matmul %30, %32, %cst_40 {dimension_numbers = #tpu.dot_dimension_numbers<[1], [0], [0], [1], [0, 0, 1, 1], [], []>} : vector<8x3xbf16>, vector<3x64xbf16>, vector<8x64xf32> -> vector<8x64xf32>
    %34 = arith.addf %28, %33 : vector<8x64xf32>
    %c0_41 = arith.constant 0 : index
    %c0_42 = arith.constant 0 : index
    %c0_43 = arith.constant 0 : index
    %c0_44 = arith.constant 0 : index
    %35 = vector.load %arg4[%c0_41, %c0_42, %c0_43, %c0_44] : memref<1x1x9x3xbf16, #tpu.memory_space<vmem>>, vector<1x1x8x3xbf16>
    %36 = vector.shape_cast %35 : vector<1x1x8x3xbf16> to vector<8x3xbf16>
    %c6 = arith.constant 6 : index
    %c0_45 = arith.constant 0 : index
    %c0_46 = arith.constant 0 : index
    %37 = vector.load %arg8[%c6, %c0_45, %c0_46] : memref<9x3x64xbf16, #tpu.memory_space<vmem>>, vector<1x3x64xbf16>
    %38 = vector.shape_cast %37 : vector<1x3x64xbf16> to vector<3x64xbf16>
    %cst_47 = arith.constant dense<0.000000e+00> : vector<8x64xf32>
    %39 = tpu.matmul %36, %38, %cst_47 {dimension_numbers = #tpu.dot_dimension_numbers<[1], [0], [0], [1], [0, 0, 1, 1], [], []>} : vector<8x3xbf16>, vector<3x64xbf16>, vector<8x64xf32> -> vector<8x64xf32>
    %40 = arith.addf %34, %39 : vector<8x64xf32>
    %c0_48 = arith.constant 0 : index
    %c0_49 = arith.constant 0 : index
    %c0_50 = arith.constant 0 : index
    %c0_51 = arith.constant 0 : index
    %41 = vector.load %arg7[%c0_48, %c0_49, %c0_50, %c0_51] : memref<1x1x9x3xbf16, #tpu.memory_space<vmem>>, vector<1x1x8x3xbf16>
    %42 = vector.shape_cast %41 : vector<1x1x8x3xbf16> to vector<8x3xbf16>
    %c7 = arith.constant 7 : index
    %c0_52 = arith.constant 0 : index
    %c0_53 = arith.constant 0 : index
    %43 = vector.load %arg8[%c7, %c0_52, %c0_53] : memref<9x3x64xbf16, #tpu.memory_space<vmem>>, vector<1x3x64xbf16>
    %44 = vector.shape_cast %43 : vector<1x3x64xbf16> to vector<3x64xbf16>
    %cst_54 = arith.constant dense<0.000000e+00> : vector<8x64xf32>
    %45 = tpu.matmul %42, %44, %cst_54 {dimension_numbers = #tpu.dot_dimension_numbers<[1], [0], [0], [1], [0, 0, 1, 1], [], []>} : vector<8x3xbf16>, vector<3x64xbf16>, vector<8x64xf32> -> vector<8x64xf32>
    %46 = arith.addf %40, %45 : vector<8x64xf32>
    %c0_55 = arith.constant 0 : index
    %c0_56 = arith.constant 0 : index
    %c1_57 = arith.constant 1 : index
    %c0_58 = arith.constant 0 : index
    %47 = vector.load %arg4[%c0_55, %c0_56, %c1_57, %c0_58] : memref<1x1x9x3xbf16, #tpu.memory_space<vmem>>, vector<1x1x8x3xbf16>
    %48 = vector.shape_cast %47 : vector<1x1x8x3xbf16> to vector<8x3xbf16>
    %c8 = arith.constant 8 : index
    %c0_59 = arith.constant 0 : index
    %c0_60 = arith.constant 0 : index
    %49 = vector.load %arg8[%c8, %c0_59, %c0_60] : memref<9x3x64xbf16, #tpu.memory_space<vmem>>, vector<1x3x64xbf16>
    %50 = vector.shape_cast %49 : vector<1x3x64xbf16> to vector<3x64xbf16>
    %cst_61 = arith.constant dense<0.000000e+00> : vector<8x64xf32>
    %51 = tpu.matmul %48, %50, %cst_61 {dimension_numbers = #tpu.dot_dimension_numbers<[1], [0], [0], [1], [0, 0, 1, 1], [], []>} : vector<8x3xbf16>, vector<3x64xbf16>, vector<8x64xf32> -> vector<8x64xf32>
    %52 = arith.addf %46, %51 : vector<8x64xf32>
    %c0_62 = arith.constant 0 : index
    %c0_63 = arith.constant 0 : index
    %53 = vector.load %arg9[%c0_62, %c0_63] : memref<4x64xf32, #tpu.memory_space<vmem>>, vector<4x64xf32>
    %54 = vector.extract_strided_slice %53 {offsets = [0, 0], sizes = [1, 64], strides = [1, 1]} : vector<4x64xf32> to vector<1x64xf32>
    %55 = vector.broadcast %54 : vector<1x64xf32> to vector<8x64xf32>
    %56 = arith.addf %52, %55 : vector<8x64xf32>
    %cst_64 = arith.constant 0.000000e+00 : f32
    %57 = vector.broadcast %cst_64 : f32 to vector<8x64xf32>
    %58 = arith.cmpf ogt, %56, %57 : vector<8x64xf32>
    %59 = vector.extract_strided_slice %53 {offsets = [1, 0], sizes = [1, 64], strides = [1, 1]} : vector<4x64xf32> to vector<1x64xf32>
    %60 = vector.broadcast %59 : vector<1x64xf32> to vector<8x64xf32>
    %61 = arith.mulf %56, %60 : vector<8x64xf32>
    %62 = vector.extract_strided_slice %53 {offsets = [2, 0], sizes = [1, 64], strides = [1, 1]} : vector<4x64xf32> to vector<1x64xf32>
    %63 = vector.broadcast %62 : vector<1x64xf32> to vector<8x64xf32>
    %64 = arith.mulf %56, %63 : vector<8x64xf32>
    %65 = arith.select %58, %61, %64 : vector<8x64xi1>, vector<8x64xf32>
    %66 = vector.extract_strided_slice %53 {offsets = [3, 0], sizes = [1, 64], strides = [1, 1]} : vector<4x64xf32> to vector<1x64xf32>
    %67 = vector.broadcast %66 : vector<1x64xf32> to vector<8x64xf32>
    %68 = arith.addf %65, %67 : vector<8x64xf32>
    %69 = arith.truncf %68 : vector<8x64xf32> to vector<8x64xbf16>
    %c0_65 = arith.constant 0 : index
    %c0_66 = arith.constant 0 : index
    %c0_67 = arith.constant 0 : index
    %c0_68 = arith.constant 0 : index
    %70 = vector.load %arg10[%c0_65, %c0_66, %c0_67, %c0_68] : memref<1x1x8x64xbf16, #tpu.memory_space<vmem>>, vector<1x1x8x64xbf16>
    %71 = vector.shape_cast %70 : vector<1x1x8x64xbf16> to vector<8x64xbf16>
    %72 = vector.shape_cast %69 : vector<8x64xbf16> to vector<1x1x8x64xbf16>
    tpu.vector_store %arg10[%c0_65, %c0_66, %c0_67, %c0_68], %72 {strides = array<i32>} : memref<1x1x8x64xbf16, #tpu.memory_space<vmem>>, vector<1x1x8x64xbf16>,
    return
  }
  func.func @transform_0(%arg0: i32, %arg1: i32) -> (i32, i32, i32, i32) {
    %c0_i32 = arith.constant 0 : i32
    %c0_i32_0 = arith.constant 0 : i32
    %c0_i32_1 = arith.constant 0 : i32
    return %arg0, %arg1, %c0_i32, %c0_i32_0 : i32, i32, i32, i32
  }
  func.func @transform_1(%arg0: i32, %arg1: i32) -> (i32, i32, i32, i32) {
    %c0_i32 = arith.constant 0 : i32
    %c0_i32_0 = arith.constant 0 : i32
    %c0_i32_1 = arith.constant 0 : i32
    return %arg0, %arg1, %c0_i32, %c0_i32_0 : i32, i32, i32, i32
  }
  func.func @transform_2(%arg0: i32, %arg1: i32) -> (i32, i32, i32, i32) {
    %c1_i32 = arith.constant 1 : i32
    %0 = arith.addi %arg1, %c1_i32 : i32
    %c0_i32 = arith.constant 0 : i32
    %c0_i32_0 = arith.constant 0 : i32
    %c0_i32_1 = arith.constant 0 : i32
    return %arg0, %0, %c0_i32, %c0_i32_0 : i32, i32, i32, i32
  }
  func.func @transform_3(%arg0: i32, %arg1: i32) -> (i32, i32, i32, i32) {
    %c0_i32 = arith.constant 0 : i32
    %c0_i32_0 = arith.constant 0 : i32
    %c0_i32_1 = arith.constant 0 : i32
    return %arg0, %arg1, %c0_i32, %c0_i32_0 : i32, i32, i32, i32
  }
  func.func @transform_4(%arg0: i32, %arg1: i32) -> (i32, i32, i32, i32) {
    %c0_i32 = arith.constant 0 : i32
    %c0_i32_0 = arith.constant 0 : i32
    %c0_i32_1 = arith.constant 0 : i32
    return %arg0, %arg1, %c0_i32, %c0_i32_0 : i32, i32, i32, i32
  }
  func.func @transform_5(%arg0: i32, %arg1: i32) -> (i32, i32, i32, i32) {
    %c1_i32 = arith.constant 1 : i32
    %0 = arith.addi %arg1, %c1_i32 : i32
    %c0_i32 = arith.constant 0 : i32
    %c0_i32_0 = arith.constant 0 : i32
    %c0_i32_1 = arith.constant 0 : i32
    return %arg0, %0, %c0_i32, %c0_i32_0 : i32, i32, i32, i32
  }
  func.func @transform_6(%arg0: i32, %arg1: i32) -> (i32, i32, i32) {
    %c0_i32 = arith.constant 0 : i32
    %c0_i32_0 = arith.constant 0 : i32
    %c0_i32_1 = arith.constant 0 : i32
    %c0_i32_2 = arith.constant 0 : i32
    return %c0_i32, %c0_i32_0, %c0_i32_1 : i32, i32, i32
  }
  func.func @transform_7(%arg0: i32, %arg1: i32) -> (i32, i32) {
    %c0_i32 = arith.constant 0 : i32
    %c0_i32_0 = arith.constant 0 : i32
    %c0_i32_1 = arith.constant 0 : i32
    return %c0_i32, %c0_i32_0 : i32, i32
  }
  func.func @transform_8(%arg0: i32, %arg1: i32) -> (i32, i32, i32, i32) {
    %c0_i32 = arith.constant 0 : i32
    %c0_i32_0 = arith.constant 0 : i32
    %c0_i32_1 = arith.constant 0 : i32
    return %arg0, %arg1, %c0_i32, %c0_i32_0 : i32, i32, i32, i32
  }
}

module attributes {stable_mosaic.version = 11 : i64} {
  func.func @_conv3x3s2_row_kernel(%arg0: i32, %arg1: i32, %arg2: memref<1x1x5x64xbf16, #tpu.memory_space<vmem>>, %arg3: memref<1x1x5x64xbf16, #tpu.memory_space<vmem>>, %arg4: memref<1x1x5x64xbf16, #tpu.memory_space<vmem>>, %arg5: memref<1x1x5x64xbf16, #tpu.memory_space<vmem>>, %arg6: memref<1x1x5x64xbf16, #tpu.memory_space<vmem>>, %arg7: memref<1x1x5x64xbf16, #tpu.memory_space<vmem>>, %arg8: memref<9x64x128xbf16, #tpu.memory_space<vmem>>, %arg9: memref<4x128xf32, #tpu.memory_space<vmem>>, %arg10: memref<1x1x4x128xbf16, #tpu.memory_space<vmem>>) attributes {dimension_semantics = [#tpu.dimension_semantics<parallel>, #tpu.dimension_semantics<parallel>], iteration_bounds = array<i64: 2, 4>, scalar_prefetch = 0 : i64, scratch_operands = 0 : i64, tpu.core_type = #tpu.core_type<tc>, window_params = [{transform_indices = @transform_0, window_bounds = array<i64: 1, 1, 5, 64>}, {transform_indices = @transform_1, window_bounds = array<i64: 1, 1, 5, 64>}, {transform_indices = @transform_2, window_bounds = array<i64: 1, 1, 5, 64>}, {transform_indices = @transform_3, window_bounds = array<i64: 1, 1, 5, 64>}, {transform_indices = @transform_4, window_bounds = array<i64: 1, 1, 5, 64>}, {transform_indices = @transform_5, window_bounds = array<i64: 1, 1, 5, 64>}, {pipeline_mode = #tpu.pipeline_mode<synchronous>, transform_indices = @transform_6, window_bounds = array<i64: 9, 64, 128>}, {pipeline_mode = #tpu.pipeline_mode<synchronous>, transform_indices = @transform_7, window_bounds = array<i64: 4, 128>}, {transform_indices = @transform_8, window_bounds = array<i64: 1, 1, 4, 128>}]} {
    %c0 = arith.constant 0 : index
    %c0_0 = arith.constant 0 : index
    %c0_1 = arith.constant 0 : index
    %c0_2 = arith.constant 0 : index
    %0 = vector.load %arg2[%c0, %c0_0, %c0_1, %c0_2] : memref<1x1x5x64xbf16, #tpu.memory_space<vmem>>, vector<1x1x4x64xbf16>
    %1 = vector.shape_cast %0 : vector<1x1x4x64xbf16> to vector<4x64xbf16>
    %c0_3 = arith.constant 0 : index
    %c0_4 = arith.constant 0 : index
    %c0_5 = arith.constant 0 : index
    %2 = vector.load %arg8[%c0_3, %c0_4, %c0_5] : memref<9x64x128xbf16, #tpu.memory_space<vmem>>, vector<1x64x128xbf16>
    %3 = vector.shape_cast %2 : vector<1x64x128xbf16> to vector<64x128xbf16>
    %cst = arith.constant dense<0.000000e+00> : vector<4x128xf32>
    %4 = tpu.matmul %1, %3, %cst {dimension_numbers = #tpu.dot_dimension_numbers<[1], [0], [0], [1], [0, 0, 1, 1], [], []>} : vector<4x64xbf16>, vector<64x128xbf16>, vector<4x128xf32> -> vector<4x128xf32>
    %c0_6 = arith.constant 0 : index
    %c0_7 = arith.constant 0 : index
    %c0_8 = arith.constant 0 : index
    %c0_9 = arith.constant 0 : index
    %5 = vector.load %arg5[%c0_6, %c0_7, %c0_8, %c0_9] : memref<1x1x5x64xbf16, #tpu.memory_space<vmem>>, vector<1x1x4x64xbf16>
    %6 = vector.shape_cast %5 : vector<1x1x4x64xbf16> to vector<4x64xbf16>
    %c1 = arith.constant 1 : index
    %c0_10 = arith.constant 0 : index
    %c0_11 = arith.constant 0 : index
    %7 = vector.load %arg8[%c1, %c0_10, %c0_11] : memref<9x64x128xbf16, #tpu.memory_space<vmem>>, vector<1x64x128xbf16>
    %8 = vector.shape_cast %7 : vector<1x64x128xbf16> to vector<64x128xbf16>
    %cst_12 = arith.constant dense<0.000000e+00> : vector<4x128xf32>
    %9 = tpu.matmul %6, %8, %cst_12 {dimension_numbers = #tpu.dot_dimension_numbers<[1], [0], [0], [1], [0, 0, 1, 1], [], []>} : vector<4x64xbf16>, vector<64x128xbf16>, vector<4x128xf32> -> vector<4x128xf32>
    %10 = arith.addf %4, %9 : vector<4x128xf32>
    %c0_13 = arith.constant 0 : index
    %c0_14 = arith.constant 0 : index
    %c1_15 = arith.constant 1 : index
    %c0_16 = arith.constant 0 : index
    %11 = vector.load %arg2[%c0_13, %c0_14, %c1_15, %c0_16] : memref<1x1x5x64xbf16, #tpu.memory_space<vmem>>, vector<1x1x4x64xbf16>
    %12 = vector.shape_cast %11 : vector<1x1x4x64xbf16> to vector<4x64xbf16>
    %c2 = arith.constant 2 : index
    %c0_17 = arith.constant 0 : index
    %c0_18 = arith.constant 0 : index
    %13 = vector.load %arg8[%c2, %c0_17, %c0_18] : memref<9x64x128xbf16, #tpu.memory_space<vmem>>, vector<1x64x128xbf16>
    %14 = vector.shape_cast %13 : vector<1x64x128xbf16> to vector<64x128xbf16>
    %cst_19 = arith.constant dense<0.000000e+00> : vector<4x128xf32>
    %15 = tpu.matmul %12, %14, %cst_19 {dimension_numbers = #tpu.dot_dimension_numbers<[1], [0], [0], [1], [0, 0, 1, 1], [], []>} : vector<4x64xbf16>, vector<64x128xbf16>, vector<4x128xf32> -> vector<4x128xf32>
    %16 = arith.addf %10, %15 : vector<4x128xf32>
    %c0_20 = arith.constant 0 : index
    %c0_21 = arith.constant 0 : index
    %c0_22 = arith.constant 0 : index
    %c0_23 = arith.constant 0 : index
    %17 = vector.load %arg3[%c0_20, %c0_21, %c0_22, %c0_23] : memref<1x1x5x64xbf16, #tpu.memory_space<vmem>>, vector<1x1x4x64xbf16>
    %18 = vector.shape_cast %17 : vector<1x1x4x64xbf16> to vector<4x64xbf16>
    %c3 = arith.constant 3 : index
    %c0_24 = arith.constant 0 : index
    %c0_25 = arith.constant 0 : index
    %19 = vector.load %arg8[%c3, %c0_24, %c0_25] : memref<9x64x128xbf16, #tpu.memory_space<vmem>>, vector<1x64x128xbf16>
    %20 = vector.shape_cast %19 : vector<1x64x128xbf16> to vector<64x128xbf16>
    %cst_26 = arith.constant dense<0.000000e+00> : vector<4x128xf32>
    %21 = tpu.matmul %18, %20, %cst_26 {dimension_numbers = #tpu.dot_dimension_numbers<[1], [0], [0], [1], [0, 0, 1, 1], [], []>} : vector<4x64xbf16>, vector<64x128xbf16>, vector<4x128xf32> -> vector<4x128xf32>
    %22 = arith.addf %16, %21 : vector<4x128xf32>
    %c0_27 = arith.constant 0 : index
    %c0_28 = arith.constant 0 : index
    %c0_29 = arith.constant 0 : index
    %c0_30 = arith.constant 0 : index
    %23 = vector.load %arg6[%c0_27, %c0_28, %c0_29, %c0_30] : memref<1x1x5x64xbf16, #tpu.memory_space<vmem>>, vector<1x1x4x64xbf16>
    %24 = vector.shape_cast %23 : vector<1x1x4x64xbf16> to vector<4x64xbf16>
    %c4 = arith.constant 4 : index
    %c0_31 = arith.constant 0 : index
    %c0_32 = arith.constant 0 : index
    %25 = vector.load %arg8[%c4, %c0_31, %c0_32] : memref<9x64x128xbf16, #tpu.memory_space<vmem>>, vector<1x64x128xbf16>
    %26 = vector.shape_cast %25 : vector<1x64x128xbf16> to vector<64x128xbf16>
    %cst_33 = arith.constant dense<0.000000e+00> : vector<4x128xf32>
    %27 = tpu.matmul %24, %26, %cst_33 {dimension_numbers = #tpu.dot_dimension_numbers<[1], [0], [0], [1], [0, 0, 1, 1], [], []>} : vector<4x64xbf16>, vector<64x128xbf16>, vector<4x128xf32> -> vector<4x128xf32>
    %28 = arith.addf %22, %27 : vector<4x128xf32>
    %c0_34 = arith.constant 0 : index
    %c0_35 = arith.constant 0 : index
    %c1_36 = arith.constant 1 : index
    %c0_37 = arith.constant 0 : index
    %29 = vector.load %arg3[%c0_34, %c0_35, %c1_36, %c0_37] : memref<1x1x5x64xbf16, #tpu.memory_space<vmem>>, vector<1x1x4x64xbf16>
    %30 = vector.shape_cast %29 : vector<1x1x4x64xbf16> to vector<4x64xbf16>
    %c5 = arith.constant 5 : index
    %c0_38 = arith.constant 0 : index
    %c0_39 = arith.constant 0 : index
    %31 = vector.load %arg8[%c5, %c0_38, %c0_39] : memref<9x64x128xbf16, #tpu.memory_space<vmem>>, vector<1x64x128xbf16>
    %32 = vector.shape_cast %31 : vector<1x64x128xbf16> to vector<64x128xbf16>
    %cst_40 = arith.constant dense<0.000000e+00> : vector<4x128xf32>
    %33 = tpu.matmul %30, %32, %cst_40 {dimension_numbers = #tpu.dot_dimension_numbers<[1], [0], [0], [1], [0, 0, 1, 1], [], []>} : vector<4x64xbf16>, vector<64x128xbf16>, vector<4x128xf32> -> vector<4x128xf32>
    %34 = arith.addf %28, %33 : vector<4x128xf32>
    %c0_41 = arith.constant 0 : index
    %c0_42 = arith.constant 0 : index
    %c0_43 = arith.constant 0 : index
    %c0_44 = arith.constant 0 : index
    %35 = vector.load %arg4[%c0_41, %c0_42, %c0_43, %c0_44] : memref<1x1x5x64xbf16, #tpu.memory_space<vmem>>, vector<1x1x4x64xbf16>
    %36 = vector.shape_cast %35 : vector<1x1x4x64xbf16> to vector<4x64xbf16>
    %c6 = arith.constant 6 : index
    %c0_45 = arith.constant 0 : index
    %c0_46 = arith.constant 0 : index
    %37 = vector.load %arg8[%c6, %c0_45, %c0_46] : memref<9x64x128xbf16, #tpu.memory_space<vmem>>, vector<1x64x128xbf16>
    %38 = vector.shape_cast %37 : vector<1x64x128xbf16> to vector<64x128xbf16>
    %cst_47 = arith.constant dense<0.000000e+00> : vector<4x128xf32>
    %39 = tpu.matmul %36, %38, %cst_47 {dimension_numbers = #tpu.dot_dimension_numbers<[1], [0], [0], [1], [0, 0, 1, 1], [], []>} : vector<4x64xbf16>, vector<64x128xbf16>, vector<4x128xf32> -> vector<4x128xf32>
    %40 = arith.addf %34, %39 : vector<4x128xf32>
    %c0_48 = arith.constant 0 : index
    %c0_49 = arith.constant 0 : index
    %c0_50 = arith.constant 0 : index
    %c0_51 = arith.constant 0 : index
    %41 = vector.load %arg7[%c0_48, %c0_49, %c0_50, %c0_51] : memref<1x1x5x64xbf16, #tpu.memory_space<vmem>>, vector<1x1x4x64xbf16>
    %42 = vector.shape_cast %41 : vector<1x1x4x64xbf16> to vector<4x64xbf16>
    %c7 = arith.constant 7 : index
    %c0_52 = arith.constant 0 : index
    %c0_53 = arith.constant 0 : index
    %43 = vector.load %arg8[%c7, %c0_52, %c0_53] : memref<9x64x128xbf16, #tpu.memory_space<vmem>>, vector<1x64x128xbf16>
    %44 = vector.shape_cast %43 : vector<1x64x128xbf16> to vector<64x128xbf16>
    %cst_54 = arith.constant dense<0.000000e+00> : vector<4x128xf32>
    %45 = tpu.matmul %42, %44, %cst_54 {dimension_numbers = #tpu.dot_dimension_numbers<[1], [0], [0], [1], [0, 0, 1, 1], [], []>} : vector<4x64xbf16>, vector<64x128xbf16>, vector<4x128xf32> -> vector<4x128xf32>
    %46 = arith.addf %40, %45 : vector<4x128xf32>
    %c0_55 = arith.constant 0 : index
    %c0_56 = arith.constant 0 : index
    %c1_57 = arith.constant 1 : index
    %c0_58 = arith.constant 0 : index
    %47 = vector.load %arg4[%c0_55, %c0_56, %c1_57, %c0_58] : memref<1x1x5x64xbf16, #tpu.memory_space<vmem>>, vector<1x1x4x64xbf16>
    %48 = vector.shape_cast %47 : vector<1x1x4x64xbf16> to vector<4x64xbf16>
    %c8 = arith.constant 8 : index
    %c0_59 = arith.constant 0 : index
    %c0_60 = arith.constant 0 : index
    %49 = vector.load %arg8[%c8, %c0_59, %c0_60] : memref<9x64x128xbf16, #tpu.memory_space<vmem>>, vector<1x64x128xbf16>
    %50 = vector.shape_cast %49 : vector<1x64x128xbf16> to vector<64x128xbf16>
    %cst_61 = arith.constant dense<0.000000e+00> : vector<4x128xf32>
    %51 = tpu.matmul %48, %50, %cst_61 {dimension_numbers = #tpu.dot_dimension_numbers<[1], [0], [0], [1], [0, 0, 1, 1], [], []>} : vector<4x64xbf16>, vector<64x128xbf16>, vector<4x128xf32> -> vector<4x128xf32>
    %52 = arith.addf %46, %51 : vector<4x128xf32>
    %c0_62 = arith.constant 0 : index
    %c0_63 = arith.constant 0 : index
    %53 = vector.load %arg9[%c0_62, %c0_63] : memref<4x128xf32, #tpu.memory_space<vmem>>, vector<4x128xf32>
    %54 = vector.extract_strided_slice %53 {offsets = [0, 0], sizes = [1, 128], strides = [1, 1]} : vector<4x128xf32> to vector<1x128xf32>
    %55 = vector.broadcast %54 : vector<1x128xf32> to vector<4x128xf32>
    %56 = arith.addf %52, %55 : vector<4x128xf32>
    %cst_64 = arith.constant 0.000000e+00 : f32
    %57 = vector.broadcast %cst_64 : f32 to vector<4x128xf32>
    %58 = arith.cmpf ogt, %56, %57 : vector<4x128xf32>
    %59 = vector.extract_strided_slice %53 {offsets = [1, 0], sizes = [1, 128], strides = [1, 1]} : vector<4x128xf32> to vector<1x128xf32>
    %60 = vector.broadcast %59 : vector<1x128xf32> to vector<4x128xf32>
    %61 = arith.mulf %56, %60 : vector<4x128xf32>
    %62 = vector.extract_strided_slice %53 {offsets = [2, 0], sizes = [1, 128], strides = [1, 1]} : vector<4x128xf32> to vector<1x128xf32>
    %63 = vector.broadcast %62 : vector<1x128xf32> to vector<4x128xf32>
    %64 = arith.mulf %56, %63 : vector<4x128xf32>
    %65 = arith.select %58, %61, %64 : vector<4x128xi1>, vector<4x128xf32>
    %66 = vector.extract_strided_slice %53 {offsets = [3, 0], sizes = [1, 128], strides = [1, 1]} : vector<4x128xf32> to vector<1x128xf32>
    %67 = vector.broadcast %66 : vector<1x128xf32> to vector<4x128xf32>
    %68 = arith.addf %65, %67 : vector<4x128xf32>
    %69 = arith.truncf %68 : vector<4x128xf32> to vector<4x128xbf16>
    %c0_65 = arith.constant 0 : index
    %c0_66 = arith.constant 0 : index
    %c0_67 = arith.constant 0 : index
    %c0_68 = arith.constant 0 : index
    %70 = vector.load %arg10[%c0_65, %c0_66, %c0_67, %c0_68] : memref<1x1x4x128xbf16, #tpu.memory_space<vmem>>, vector<1x1x4x128xbf16>
    %71 = vector.shape_cast %70 : vector<1x1x4x128xbf16> to vector<4x128xbf16>
    %72 = vector.shape_cast %69 : vector<4x128xbf16> to vector<1x1x4x128xbf16>
    tpu.vector_store %arg10[%c0_65, %c0_66, %c0_67, %c0_68], %72 {strides = array<i32>} : memref<1x1x4x128xbf16, #tpu.memory_space<vmem>>, vector<1x1x4x128xbf16>,
    return
  }
  func.func @transform_0(%arg0: i32, %arg1: i32) -> (i32, i32, i32, i32) {
    %c0_i32 = arith.constant 0 : i32
    %c0_i32_0 = arith.constant 0 : i32
    %c0_i32_1 = arith.constant 0 : i32
    return %arg0, %arg1, %c0_i32, %c0_i32_0 : i32, i32, i32, i32
  }
  func.func @transform_1(%arg0: i32, %arg1: i32) -> (i32, i32, i32, i32) {
    %c0_i32 = arith.constant 0 : i32
    %c0_i32_0 = arith.constant 0 : i32
    %c0_i32_1 = arith.constant 0 : i32
    return %arg0, %arg1, %c0_i32, %c0_i32_0 : i32, i32, i32, i32
  }
  func.func @transform_2(%arg0: i32, %arg1: i32) -> (i32, i32, i32, i32) {
    %c1_i32 = arith.constant 1 : i32
    %0 = arith.addi %arg1, %c1_i32 : i32
    %c0_i32 = arith.constant 0 : i32
    %c0_i32_0 = arith.constant 0 : i32
    %c0_i32_1 = arith.constant 0 : i32
    return %arg0, %0, %c0_i32, %c0_i32_0 : i32, i32, i32, i32
  }
  func.func @transform_3(%arg0: i32, %arg1: i32) -> (i32, i32, i32, i32) {
    %c0_i32 = arith.constant 0 : i32
    %c0_i32_0 = arith.constant 0 : i32
    %c0_i32_1 = arith.constant 0 : i32
    return %arg0, %arg1, %c0_i32, %c0_i32_0 : i32, i32, i32, i32
  }
  func.func @transform_4(%arg0: i32, %arg1: i32) -> (i32, i32, i32, i32) {
    %c0_i32 = arith.constant 0 : i32
    %c0_i32_0 = arith.constant 0 : i32
    %c0_i32_1 = arith.constant 0 : i32
    return %arg0, %arg1, %c0_i32, %c0_i32_0 : i32, i32, i32, i32
  }
  func.func @transform_5(%arg0: i32, %arg1: i32) -> (i32, i32, i32, i32) {
    %c1_i32 = arith.constant 1 : i32
    %0 = arith.addi %arg1, %c1_i32 : i32
    %c0_i32 = arith.constant 0 : i32
    %c0_i32_0 = arith.constant 0 : i32
    %c0_i32_1 = arith.constant 0 : i32
    return %arg0, %0, %c0_i32, %c0_i32_0 : i32, i32, i32, i32
  }
  func.func @transform_6(%arg0: i32, %arg1: i32) -> (i32, i32, i32) {
    %c0_i32 = arith.constant 0 : i32
    %c0_i32_0 = arith.constant 0 : i32
    %c0_i32_1 = arith.constant 0 : i32
    %c0_i32_2 = arith.constant 0 : i32
    return %c0_i32, %c0_i32_0, %c0_i32_1 : i32, i32, i32
  }
  func.func @transform_7(%arg0: i32, %arg1: i32) -> (i32, i32) {
    %c0_i32 = arith.constant 0 : i32
    %c0_i32_0 = arith.constant 0 : i32
    %c0_i32_1 = arith.constant 0 : i32
    return %c0_i32, %c0_i32_0 : i32, i32
  }
  func.func @transform_8(%arg0: i32, %arg1: i32) -> (i32, i32, i32, i32) {
    %c0_i32 = arith.constant 0 : i32
    %c0_i32_0 = arith.constant 0 : i32
    %c0_i32_1 = arith.constant 0 : i32
    return %arg0, %arg1, %c0_i32, %c0_i32_0 : i32, i32, i32, i32
  }
}

module attributes {stable_mosaic.version = 11 : i64} {
  func.func @_conv3x3s2_row_kernel(%arg0: i32, %arg1: i32, %arg2: memref<1x1x3x128xbf16, #tpu.memory_space<vmem>>, %arg3: memref<1x1x3x128xbf16, #tpu.memory_space<vmem>>, %arg4: memref<1x1x3x128xbf16, #tpu.memory_space<vmem>>, %arg5: memref<1x1x3x128xbf16, #tpu.memory_space<vmem>>, %arg6: memref<1x1x3x128xbf16, #tpu.memory_space<vmem>>, %arg7: memref<1x1x3x128xbf16, #tpu.memory_space<vmem>>, %arg8: memref<9x128x256xbf16, #tpu.memory_space<vmem>>, %arg9: memref<4x256xf32, #tpu.memory_space<vmem>>, %arg10: memref<1x1x2x256xbf16, #tpu.memory_space<vmem>>) attributes {dimension_semantics = [#tpu.dimension_semantics<parallel>, #tpu.dimension_semantics<parallel>], iteration_bounds = array<i64: 2, 2>, scalar_prefetch = 0 : i64, scratch_operands = 0 : i64, tpu.core_type = #tpu.core_type<tc>, window_params = [{transform_indices = @transform_0, window_bounds = array<i64: 1, 1, 3, 128>}, {transform_indices = @transform_1, window_bounds = array<i64: 1, 1, 3, 128>}, {transform_indices = @transform_2, window_bounds = array<i64: 1, 1, 3, 128>}, {transform_indices = @transform_3, window_bounds = array<i64: 1, 1, 3, 128>}, {transform_indices = @transform_4, window_bounds = array<i64: 1, 1, 3, 128>}, {transform_indices = @transform_5, window_bounds = array<i64: 1, 1, 3, 128>}, {pipeline_mode = #tpu.pipeline_mode<synchronous>, transform_indices = @transform_6, window_bounds = array<i64: 9, 128, 256>}, {pipeline_mode = #tpu.pipeline_mode<synchronous>, transform_indices = @transform_7, window_bounds = array<i64: 4, 256>}, {transform_indices = @transform_8, window_bounds = array<i64: 1, 1, 2, 256>}]} {
    %c0 = arith.constant 0 : index
    %c0_0 = arith.constant 0 : index
    %c0_1 = arith.constant 0 : index
    %c0_2 = arith.constant 0 : index
    %0 = vector.load %arg2[%c0, %c0_0, %c0_1, %c0_2] : memref<1x1x3x128xbf16, #tpu.memory_space<vmem>>, vector<1x1x2x128xbf16>
    %1 = vector.shape_cast %0 : vector<1x1x2x128xbf16> to vector<2x128xbf16>
    %c0_3 = arith.constant 0 : index
    %c0_4 = arith.constant 0 : index
    %c0_5 = arith.constant 0 : index
    %2 = vector.load %arg8[%c0_3, %c0_4, %c0_5] : memref<9x128x256xbf16, #tpu.memory_space<vmem>>, vector<1x128x256xbf16>
    %3 = vector.shape_cast %2 : vector<1x128x256xbf16> to vector<128x256xbf16>
    %cst = arith.constant dense<0.000000e+00> : vector<2x256xf32>
    %4 = tpu.matmul %1, %3, %cst {dimension_numbers = #tpu.dot_dimension_numbers<[1], [0], [0], [1], [0, 0, 1, 1], [], []>} : vector<2x128xbf16>, vector<128x256xbf16>, vector<2x256xf32> -> vector<2x256xf32>
    %c0_6 = arith.constant 0 : index
    %c0_7 = arith.constant 0 : index
    %c0_8 = arith.constant 0 : index
    %c0_9 = arith.constant 0 : index
    %5 = vector.load %arg5[%c0_6, %c0_7, %c0_8, %c0_9] : memref<1x1x3x128xbf16, #tpu.memory_space<vmem>>, vector<1x1x2x128xbf16>
    %6 = vector.shape_cast %5 : vector<1x1x2x128xbf16> to vector<2x128xbf16>
    %c1 = arith.constant 1 : index
    %c0_10 = arith.constant 0 : index
    %c0_11 = arith.constant 0 : index
    %7 = vector.load %arg8[%c1, %c0_10, %c0_11] : memref<9x128x256xbf16, #tpu.memory_space<vmem>>, vector<1x128x256xbf16>
    %8 = vector.shape_cast %7 : vector<1x128x256xbf16> to vector<128x256xbf16>
    %cst_12 = arith.constant dense<0.000000e+00> : vector<2x256xf32>
    %9 = tpu.matmul %6, %8, %cst_12 {dimension_numbers = #tpu.dot_dimension_numbers<[1], [0], [0], [1], [0, 0, 1, 1], [], []>} : vector<2x128xbf16>, vector<128x256xbf16>, vector<2x256xf32> -> vector<2x256xf32>
    %10 = arith.addf %4, %9 : vector<2x256xf32>
    %c0_13 = arith.constant 0 : index
    %c0_14 = arith.constant 0 : index
    %c1_15 = arith.constant 1 : index
    %c0_16 = arith.constant 0 : index
    %11 = vector.load %arg2[%c0_13, %c0_14, %c1_15, %c0_16] : memref<1x1x3x128xbf16, #tpu.memory_space<vmem>>, vector<1x1x2x128xbf16>
    %12 = vector.shape_cast %11 : vector<1x1x2x128xbf16> to vector<2x128xbf16>
    %c2 = arith.constant 2 : index
    %c0_17 = arith.constant 0 : index
    %c0_18 = arith.constant 0 : index
    %13 = vector.load %arg8[%c2, %c0_17, %c0_18] : memref<9x128x256xbf16, #tpu.memory_space<vmem>>, vector<1x128x256xbf16>
    %14 = vector.shape_cast %13 : vector<1x128x256xbf16> to vector<128x256xbf16>
    %cst_19 = arith.constant dense<0.000000e+00> : vector<2x256xf32>
    %15 = tpu.matmul %12, %14, %cst_19 {dimension_numbers = #tpu.dot_dimension_numbers<[1], [0], [0], [1], [0, 0, 1, 1], [], []>} : vector<2x128xbf16>, vector<128x256xbf16>, vector<2x256xf32> -> vector<2x256xf32>
    %16 = arith.addf %10, %15 : vector<2x256xf32>
    %c0_20 = arith.constant 0 : index
    %c0_21 = arith.constant 0 : index
    %c0_22 = arith.constant 0 : index
    %c0_23 = arith.constant 0 : index
    %17 = vector.load %arg3[%c0_20, %c0_21, %c0_22, %c0_23] : memref<1x1x3x128xbf16, #tpu.memory_space<vmem>>, vector<1x1x2x128xbf16>
    %18 = vector.shape_cast %17 : vector<1x1x2x128xbf16> to vector<2x128xbf16>
    %c3 = arith.constant 3 : index
    %c0_24 = arith.constant 0 : index
    %c0_25 = arith.constant 0 : index
    %19 = vector.load %arg8[%c3, %c0_24, %c0_25] : memref<9x128x256xbf16, #tpu.memory_space<vmem>>, vector<1x128x256xbf16>
    %20 = vector.shape_cast %19 : vector<1x128x256xbf16> to vector<128x256xbf16>
    %cst_26 = arith.constant dense<0.000000e+00> : vector<2x256xf32>
    %21 = tpu.matmul %18, %20, %cst_26 {dimension_numbers = #tpu.dot_dimension_numbers<[1], [0], [0], [1], [0, 0, 1, 1], [], []>} : vector<2x128xbf16>, vector<128x256xbf16>, vector<2x256xf32> -> vector<2x256xf32>
    %22 = arith.addf %16, %21 : vector<2x256xf32>
    %c0_27 = arith.constant 0 : index
    %c0_28 = arith.constant 0 : index
    %c0_29 = arith.constant 0 : index
    %c0_30 = arith.constant 0 : index
    %23 = vector.load %arg6[%c0_27, %c0_28, %c0_29, %c0_30] : memref<1x1x3x128xbf16, #tpu.memory_space<vmem>>, vector<1x1x2x128xbf16>
    %24 = vector.shape_cast %23 : vector<1x1x2x128xbf16> to vector<2x128xbf16>
    %c4 = arith.constant 4 : index
    %c0_31 = arith.constant 0 : index
    %c0_32 = arith.constant 0 : index
    %25 = vector.load %arg8[%c4, %c0_31, %c0_32] : memref<9x128x256xbf16, #tpu.memory_space<vmem>>, vector<1x128x256xbf16>
    %26 = vector.shape_cast %25 : vector<1x128x256xbf16> to vector<128x256xbf16>
    %cst_33 = arith.constant dense<0.000000e+00> : vector<2x256xf32>
    %27 = tpu.matmul %24, %26, %cst_33 {dimension_numbers = #tpu.dot_dimension_numbers<[1], [0], [0], [1], [0, 0, 1, 1], [], []>} : vector<2x128xbf16>, vector<128x256xbf16>, vector<2x256xf32> -> vector<2x256xf32>
    %28 = arith.addf %22, %27 : vector<2x256xf32>
    %c0_34 = arith.constant 0 : index
    %c0_35 = arith.constant 0 : index
    %c1_36 = arith.constant 1 : index
    %c0_37 = arith.constant 0 : index
    %29 = vector.load %arg3[%c0_34, %c0_35, %c1_36, %c0_37] : memref<1x1x3x128xbf16, #tpu.memory_space<vmem>>, vector<1x1x2x128xbf16>
    %30 = vector.shape_cast %29 : vector<1x1x2x128xbf16> to vector<2x128xbf16>
    %c5 = arith.constant 5 : index
    %c0_38 = arith.constant 0 : index
    %c0_39 = arith.constant 0 : index
    %31 = vector.load %arg8[%c5, %c0_38, %c0_39] : memref<9x128x256xbf16, #tpu.memory_space<vmem>>, vector<1x128x256xbf16>
    %32 = vector.shape_cast %31 : vector<1x128x256xbf16> to vector<128x256xbf16>
    %cst_40 = arith.constant dense<0.000000e+00> : vector<2x256xf32>
    %33 = tpu.matmul %30, %32, %cst_40 {dimension_numbers = #tpu.dot_dimension_numbers<[1], [0], [0], [1], [0, 0, 1, 1], [], []>} : vector<2x128xbf16>, vector<128x256xbf16>, vector<2x256xf32> -> vector<2x256xf32>
    %34 = arith.addf %28, %33 : vector<2x256xf32>
    %c0_41 = arith.constant 0 : index
    %c0_42 = arith.constant 0 : index
    %c0_43 = arith.constant 0 : index
    %c0_44 = arith.constant 0 : index
    %35 = vector.load %arg4[%c0_41, %c0_42, %c0_43, %c0_44] : memref<1x1x3x128xbf16, #tpu.memory_space<vmem>>, vector<1x1x2x128xbf16>
    %36 = vector.shape_cast %35 : vector<1x1x2x128xbf16> to vector<2x128xbf16>
    %c6 = arith.constant 6 : index
    %c0_45 = arith.constant 0 : index
    %c0_46 = arith.constant 0 : index
    %37 = vector.load %arg8[%c6, %c0_45, %c0_46] : memref<9x128x256xbf16, #tpu.memory_space<vmem>>, vector<1x128x256xbf16>
    %38 = vector.shape_cast %37 : vector<1x128x256xbf16> to vector<128x256xbf16>
    %cst_47 = arith.constant dense<0.000000e+00> : vector<2x256xf32>
    %39 = tpu.matmul %36, %38, %cst_47 {dimension_numbers = #tpu.dot_dimension_numbers<[1], [0], [0], [1], [0, 0, 1, 1], [], []>} : vector<2x128xbf16>, vector<128x256xbf16>, vector<2x256xf32> -> vector<2x256xf32>
    %40 = arith.addf %34, %39 : vector<2x256xf32>
    %c0_48 = arith.constant 0 : index
    %c0_49 = arith.constant 0 : index
    %c0_50 = arith.constant 0 : index
    %c0_51 = arith.constant 0 : index
    %41 = vector.load %arg7[%c0_48, %c0_49, %c0_50, %c0_51] : memref<1x1x3x128xbf16, #tpu.memory_space<vmem>>, vector<1x1x2x128xbf16>
    %42 = vector.shape_cast %41 : vector<1x1x2x128xbf16> to vector<2x128xbf16>
    %c7 = arith.constant 7 : index
    %c0_52 = arith.constant 0 : index
    %c0_53 = arith.constant 0 : index
    %43 = vector.load %arg8[%c7, %c0_52, %c0_53] : memref<9x128x256xbf16, #tpu.memory_space<vmem>>, vector<1x128x256xbf16>
    %44 = vector.shape_cast %43 : vector<1x128x256xbf16> to vector<128x256xbf16>
    %cst_54 = arith.constant dense<0.000000e+00> : vector<2x256xf32>
    %45 = tpu.matmul %42, %44, %cst_54 {dimension_numbers = #tpu.dot_dimension_numbers<[1], [0], [0], [1], [0, 0, 1, 1], [], []>} : vector<2x128xbf16>, vector<128x256xbf16>, vector<2x256xf32> -> vector<2x256xf32>
    %46 = arith.addf %40, %45 : vector<2x256xf32>
    %c0_55 = arith.constant 0 : index
    %c0_56 = arith.constant 0 : index
    %c1_57 = arith.constant 1 : index
    %c0_58 = arith.constant 0 : index
    %47 = vector.load %arg4[%c0_55, %c0_56, %c1_57, %c0_58] : memref<1x1x3x128xbf16, #tpu.memory_space<vmem>>, vector<1x1x2x128xbf16>
    %48 = vector.shape_cast %47 : vector<1x1x2x128xbf16> to vector<2x128xbf16>
    %c8 = arith.constant 8 : index
    %c0_59 = arith.constant 0 : index
    %c0_60 = arith.constant 0 : index
    %49 = vector.load %arg8[%c8, %c0_59, %c0_60] : memref<9x128x256xbf16, #tpu.memory_space<vmem>>, vector<1x128x256xbf16>
    %50 = vector.shape_cast %49 : vector<1x128x256xbf16> to vector<128x256xbf16>
    %cst_61 = arith.constant dense<0.000000e+00> : vector<2x256xf32>
    %51 = tpu.matmul %48, %50, %cst_61 {dimension_numbers = #tpu.dot_dimension_numbers<[1], [0], [0], [1], [0, 0, 1, 1], [], []>} : vector<2x128xbf16>, vector<128x256xbf16>, vector<2x256xf32> -> vector<2x256xf32>
    %52 = arith.addf %46, %51 : vector<2x256xf32>
    %c0_62 = arith.constant 0 : index
    %c0_63 = arith.constant 0 : index
    %53 = vector.load %arg9[%c0_62, %c0_63] : memref<4x256xf32, #tpu.memory_space<vmem>>, vector<4x256xf32>
    %54 = vector.extract_strided_slice %53 {offsets = [0, 0], sizes = [1, 256], strides = [1, 1]} : vector<4x256xf32> to vector<1x256xf32>
    %55 = vector.broadcast %54 : vector<1x256xf32> to vector<2x256xf32>
    %56 = arith.addf %52, %55 : vector<2x256xf32>
    %cst_64 = arith.constant 0.000000e+00 : f32
    %57 = vector.broadcast %cst_64 : f32 to vector<2x256xf32>
    %58 = arith.cmpf ogt, %56, %57 : vector<2x256xf32>
    %59 = vector.extract_strided_slice %53 {offsets = [1, 0], sizes = [1, 256], strides = [1, 1]} : vector<4x256xf32> to vector<1x256xf32>
    %60 = vector.broadcast %59 : vector<1x256xf32> to vector<2x256xf32>
    %61 = arith.mulf %56, %60 : vector<2x256xf32>
    %62 = vector.extract_strided_slice %53 {offsets = [2, 0], sizes = [1, 256], strides = [1, 1]} : vector<4x256xf32> to vector<1x256xf32>
    %63 = vector.broadcast %62 : vector<1x256xf32> to vector<2x256xf32>
    %64 = arith.mulf %56, %63 : vector<2x256xf32>
    %65 = arith.select %58, %61, %64 : vector<2x256xi1>, vector<2x256xf32>
    %66 = vector.extract_strided_slice %53 {offsets = [3, 0], sizes = [1, 256], strides = [1, 1]} : vector<4x256xf32> to vector<1x256xf32>
    %67 = vector.broadcast %66 : vector<1x256xf32> to vector<2x256xf32>
    %68 = arith.addf %65, %67 : vector<2x256xf32>
    %69 = arith.truncf %68 : vector<2x256xf32> to vector<2x256xbf16>
    %c0_65 = arith.constant 0 : index
    %c0_66 = arith.constant 0 : index
    %c0_67 = arith.constant 0 : index
    %c0_68 = arith.constant 0 : index
    %70 = vector.load %arg10[%c0_65, %c0_66, %c0_67, %c0_68] : memref<1x1x2x256xbf16, #tpu.memory_space<vmem>>, vector<1x1x2x256xbf16>
    %71 = vector.shape_cast %70 : vector<1x1x2x256xbf16> to vector<2x256xbf16>
    %72 = vector.shape_cast %69 : vector<2x256xbf16> to vector<1x1x2x256xbf16>
    tpu.vector_store %arg10[%c0_65, %c0_66, %c0_67, %c0_68], %72 {strides = array<i32>} : memref<1x1x2x256xbf16, #tpu.memory_space<vmem>>, vector<1x1x2x256xbf16>,
    return
  }
  func.func @transform_0(%arg0: i32, %arg1: i32) -> (i32, i32, i32, i32) {
    %c0_i32 = arith.constant 0 : i32
    %c0_i32_0 = arith.constant 0 : i32
    %c0_i32_1 = arith.constant 0 : i32
    return %arg0, %arg1, %c0_i32, %c0_i32_0 : i32, i32, i32, i32
  }
  func.func @transform_1(%arg0: i32, %arg1: i32) -> (i32, i32, i32, i32) {
    %c0_i32 = arith.constant 0 : i32
    %c0_i32_0 = arith.constant 0 : i32
    %c0_i32_1 = arith.constant 0 : i32
    return %arg0, %arg1, %c0_i32, %c0_i32_0 : i32, i32, i32, i32
  }
  func.func @transform_2(%arg0: i32, %arg1: i32) -> (i32, i32, i32, i32) {
    %c1_i32 = arith.constant 1 : i32
    %0 = arith.addi %arg1, %c1_i32 : i32
    %c0_i32 = arith.constant 0 : i32
    %c0_i32_0 = arith.constant 0 : i32
    %c0_i32_1 = arith.constant 0 : i32
    return %arg0, %0, %c0_i32, %c0_i32_0 : i32, i32, i32, i32
  }
  func.func @transform_3(%arg0: i32, %arg1: i32) -> (i32, i32, i32, i32) {
    %c0_i32 = arith.constant 0 : i32
    %c0_i32_0 = arith.constant 0 : i32
    %c0_i32_1 = arith.constant 0 : i32
    return %arg0, %arg1, %c0_i32, %c0_i32_0 : i32, i32, i32, i32
  }
  func.func @transform_4(%arg0: i32, %arg1: i32) -> (i32, i32, i32, i32) {
    %c0_i32 = arith.constant 0 : i32
    %c0_i32_0 = arith.constant 0 : i32
    %c0_i32_1 = arith.constant 0 : i32
    return %arg0, %arg1, %c0_i32, %c0_i32_0 : i32, i32, i32, i32
  }
  func.func @transform_5(%arg0: i32, %arg1: i32) -> (i32, i32, i32, i32) {
    %c1_i32 = arith.constant 1 : i32
    %0 = arith.addi %arg1, %c1_i32 : i32
    %c0_i32 = arith.constant 0 : i32
    %c0_i32_0 = arith.constant 0 : i32
    %c0_i32_1 = arith.constant 0 : i32
    return %arg0, %0, %c0_i32, %c0_i32_0 : i32, i32, i32, i32
  }
  func.func @transform_6(%arg0: i32, %arg1: i32) -> (i32, i32, i32) {
    %c0_i32 = arith.constant 0 : i32
    %c0_i32_0 = arith.constant 0 : i32
    %c0_i32_1 = arith.constant 0 : i32
    %c0_i32_2 = arith.constant 0 : i32
    return %c0_i32, %c0_i32_0, %c0_i32_1 : i32, i32, i32
  }
  func.func @transform_7(%arg0: i32, %arg1: i32) -> (i32, i32) {
    %c0_i32 = arith.constant 0 : i32
    %c0_i32_0 = arith.constant 0 : i32
    %c0_i32_1 = arith.constant 0 : i32
    return %c0_i32, %c0_i32_0 : i32, i32
  }
  func.func @transform_8(%arg0: i32, %arg1: i32) -> (i32, i32, i32, i32) {
    %c0_i32 = arith.constant 0 : i32
    %c0_i32_0 = arith.constant 0 : i32
    %c0_i32_1 = arith.constant 0 : i32
    return %arg0, %arg1, %c0_i32, %c0_i32_0 : i32, i32, i32, i32
  }
}

module attributes {stable_mosaic.version = 11 : i64} {
  func.func @_fc_head_kernel(%arg0: i32, %arg1: i32, %arg2: memref<2x1024xbf16, #tpu.memory_space<vmem>>, %arg3: memref<1024x512xbf16, #tpu.memory_space<vmem>>, %arg4: memref<1x512xf32, #tpu.memory_space<vmem>>, %arg5: memref<1x512xf32, #tpu.memory_space<vmem>>, %arg6: memref<1x1xf32, #tpu.memory_space<vmem>>, %arg7: memref<2x1xf32, #tpu.memory_space<vmem>>, %arg8: memref<2x512xf32, #tpu.memory_space<vmem>>) attributes {dimension_semantics = [#tpu.dimension_semantics<parallel>, #tpu.dimension_semantics<arbitrary>], iteration_bounds = array<i64: 1, 1>, scalar_prefetch = 0 : i64, scratch_operands = 1 : i64, tpu.core_type = #tpu.core_type<tc>, window_params = [{transform_indices = @transform_0, window_bounds = array<i64: 2, 1024>}, {transform_indices = @transform_1, window_bounds = array<i64: 1024, 512>}, {pipeline_mode = #tpu.pipeline_mode<synchronous>, transform_indices = @transform_2, window_bounds = array<i64: 1, 512>}, {pipeline_mode = #tpu.pipeline_mode<synchronous>, transform_indices = @transform_3, window_bounds = array<i64: 1, 512>}, {pipeline_mode = #tpu.pipeline_mode<synchronous>, transform_indices = @transform_4, window_bounds = array<i64: 1, 1>}, {transform_indices = @transform_5, window_bounds = array<i64: 2, 1>}]} {
    %c0_i32 = arith.constant 0 : i32
    %0 = arith.cmpi eq, %arg1, %c0_i32 : i32
    %1 = arith.extui %0 : i1 to i32
    %c0_i32_0 = arith.constant 0 : i32
    %2 = arith.cmpi ne, %1, %c0_i32_0 : i32
    scf.if %2 {
      %cst_10 = arith.constant 0.000000e+00 : f32
      %12 = vector.broadcast %cst_10 : f32 to vector<2x512xf32>
      %c0_11 = arith.constant 0 : index
      %c0_12 = arith.constant 0 : index
      %13 = vector.load %arg8[%c0_11, %c0_12] : memref<2x512xf32, #tpu.memory_space<vmem>>, vector<2x512xf32>
      tpu.vector_store %arg8[%c0_11, %c0_12], %12 {strides = array<i32>} : memref<2x512xf32, #tpu.memory_space<vmem>>, vector<2x512xf32>,
    } else {
    }
    %c0 = arith.constant 0 : index
    %c0_1 = arith.constant 0 : index
    %3 = vector.load %arg8[%c0, %c0_1] : memref<2x512xf32, #tpu.memory_space<vmem>>, vector<2x512xf32>
    %c0_2 = arith.constant 0 : index
    %c0_3 = arith.constant 0 : index
    %4 = vector.load %arg2[%c0_2, %c0_3] : memref<2x1024xbf16, #tpu.memory_space<vmem>>, vector<2x1024xbf16>
    %c0_4 = arith.constant 0 : index
    %c0_5 = arith.constant 0 : index
    %5 = vector.load %arg3[%c0_4, %c0_5] : memref<1024x512xbf16, #tpu.memory_space<vmem>>, vector<1024x512xbf16>
    %cst = arith.constant dense<0.000000e+00> : vector<2x512xf32>
    %6 = tpu.matmul %4, %5, %cst {dimension_numbers = #tpu.dot_dimension_numbers<[1], [0], [0], [1], [0, 0, 1, 1], [], []>} : vector<2x1024xbf16>, vector<1024x512xbf16>, vector<2x512xf32> -> vector<2x512xf32>
    %7 = arith.addf %3, %6 : vector<2x512xf32>
    %c0_6 = arith.constant 0 : index
    %c0_7 = arith.constant 0 : index
    %8 = vector.load %arg8[%c0_6, %c0_7] : memref<2x512xf32, #tpu.memory_space<vmem>>, vector<2x512xf32>
    tpu.vector_store %arg8[%c0_6, %c0_7], %7 {strides = array<i32>} : memref<2x512xf32, #tpu.memory_space<vmem>>, vector<2x512xf32>,
    %c0_i32_8 = arith.constant 0 : i32
    %9 = arith.cmpi eq, %arg1, %c0_i32_8 : i32
    %10 = arith.extui %9 : i1 to i32
    %c0_i32_9 = arith.constant 0 : i32
    %11 = arith.cmpi ne, %10, %c0_i32_9 : i32
    scf.if %11 {
      %c0_10 = arith.constant 0 : index
      %c0_11 = arith.constant 0 : index
      %12 = vector.load %arg8[%c0_10, %c0_11] : memref<2x512xf32, #tpu.memory_space<vmem>>, vector<2x512xf32>
      %c0_12 = arith.constant 0 : index
      %c0_13 = arith.constant 0 : index
      %13 = vector.load %arg4[%c0_12, %c0_13] : memref<1x512xf32, #tpu.memory_space<vmem>>, vector<1x512xf32>
      %14 = vector.broadcast %13 : vector<1x512xf32> to vector<2x512xf32>
      %15 = arith.addf %12, %14 : vector<2x512xf32>
      %cst_14 = arith.constant 0.000000e+00 : f32
      %16 = vector.broadcast %cst_14 : f32 to vector<2x512xf32>
      %17 = arith.cmpf ogt, %15, %16 : vector<2x512xf32>
      %cst_15 = arith.constant 2.000000e-01 : f32
      %18 = vector.broadcast %cst_15 : f32 to vector<2x512xf32>
      %19 = arith.mulf %18, %15 : vector<2x512xf32>
      %20 = arith.select %17, %15, %19 : vector<2x512xi1>, vector<2x512xf32>
      %c0_16 = arith.constant 0 : index
      %c0_17 = arith.constant 0 : index
      %21 = vector.load %arg5[%c0_16, %c0_17] : memref<1x512xf32, #tpu.memory_space<vmem>>, vector<1x512xf32>
      %22 = vector.broadcast %21 : vector<1x512xf32> to vector<2x512xf32>
      %23 = arith.mulf %20, %22 : vector<2x512xf32>
      %cst_18 = arith.constant dense<0.000000e+00> : vector<2xf32>
      %24 = vector.multi_reduction <add>, %23, %cst_18 [1] : vector<2x512xf32> to vector<2xf32>
      %25 = vector.shape_cast %24 : vector<2xf32> to vector<2x1xf32>
      %c0_19 = arith.constant 0 : index
      %c0_20 = arith.constant 0 : index
      %26 = vector.load %arg6[%c0_19, %c0_20] : memref<1x1xf32, #tpu.memory_space<vmem>>, vector<1x1xf32>
      %27 = vector.broadcast %26 : vector<1x1xf32> to vector<2x1xf32>
      %28 = arith.addf %25, %27 : vector<2x1xf32>
      %29 = arith.negf %28 : vector<2x1xf32>
      %30 = math.exp %29 : vector<2x1xf32>
      %cst_21 = arith.constant 1.000000e+00 : f32
      %31 = vector.broadcast %cst_21 : f32 to vector<2x1xf32>
      %32 = arith.addf %31, %30 : vector<2x1xf32>
      %33 = arith.divf %31, %32 : vector<2x1xf32>
      %c0_22 = arith.constant 0 : index
      %c0_23 = arith.constant 0 : index
      %34 = vector.load %arg7[%c0_22, %c0_23] : memref<2x1xf32, #tpu.memory_space<vmem>>, vector<2x1xf32>
      tpu.vector_store %arg7[%c0_22, %c0_23], %33 {strides = array<i32>} : memref<2x1xf32, #tpu.memory_space<vmem>>, vector<2x1xf32>,
    } else {
    }
    return
  }
  func.func @transform_0(%arg0: i32, %arg1: i32) -> (i32, i32) {
    %c0_i32 = arith.constant 0 : i32
    return %arg0, %arg1 : i32, i32
  }
  func.func @transform_1(%arg0: i32, %arg1: i32) -> (i32, i32) {
    %c0_i32 = arith.constant 0 : i32
    %c0_i32_0 = arith.constant 0 : i32
    return %arg1, %c0_i32 : i32, i32
  }
  func.func @transform_2(%arg0: i32, %arg1: i32) -> (i32, i32) {
    %c0_i32 = arith.constant 0 : i32
    %c0_i32_0 = arith.constant 0 : i32
    %c0_i32_1 = arith.constant 0 : i32
    return %c0_i32, %c0_i32_0 : i32, i32
  }
  func.func @transform_3(%arg0: i32, %arg1: i32) -> (i32, i32) {
    %c0_i32 = arith.constant 0 : i32
    %c0_i32_0 = arith.constant 0 : i32
    %c0_i32_1 = arith.constant 0 : i32
    return %c0_i32, %c0_i32_0 : i32, i32
  }
  func.func @transform_4(%arg0: i32, %arg1: i32) -> (i32, i32) {
    %c0_i32 = arith.constant 0 : i32
    %c0_i32_0 = arith.constant 0 : i32
    %c0_i32_1 = arith.constant 0 : i32
    return %c0_i32, %c0_i32_0 : i32, i32
  }
  func.func @transform_5(%arg0: i32, %arg1: i32) -> (i32, i32) {
    %c0_i32 = arith.constant 0 : i32
    %c0_i32_0 = arith.constant 0 : i32
    return %arg0, %c0_i32 : i32, i32
  }
}

</mosaic_0001>

<bundles_post_ra>
// kernel: discriminator_forward.4
= control target key start
LH: loop header
LB: loop body
LE: loop exit
PB: predicated region body
PF: predicated region fallthrough
CT: control target
= control target key end

     0   :  { %s1484_s27 = smov 0   ;;  %s1486_s28 = smov 0   ;;  %s1661_s0 = inlined_call_operand.vmem [shape: bf16[2,9,9,3], index: 0, kind: input, shape index: {}, may-alias: {0,2}]   ;;  %s1662_s1 = inlined_call_operand.vmem [shape: bf16[2,9,9,3], index: 1, kind: input, shape index: {}]   ;;  %s1663_s2 = inlined_call_operand.vmem [shape: bf16[2,9,9,3], index: 2, kind: input, shape index: {}, may-alias: {0,2}]   ;;  %s1664_s3 = inlined_call_operand.vmem [shape: bf16[2,9,9,3], index: 3, kind: input, shape index: {}, may-alias: {3,5}]   ;;  %s1665_s4 = inlined_call_operand.vmem [shape: bf16[2,9,9,3], index: 4, kind: input, shape index: {}]   ;;  %s1666_s5 = inlined_call_operand.vmem [shape: bf16[2,9,9,3], index: 5, kind: input, shape index: {}, may-alias: {3,5}]   ;;  %s1667_s6 = inlined_call_operand.vmem [shape: bf16[9,3,64], index: 6, kind: input, shape index: {}]   ;;  %s1668_s7 = inlined_call_operand.vmem [shape: f32[4,64], index: 7, kind: input, shape index: {}]   ;;  %s1669_s8 = inlined_call_operand.vmem [shape: bf16[2,8,8,64], index: 8, kind: output, shape index: {}]  }
   0x1   :  { %s1488_s29 = smov 0   ;;  %s1490_s30 = smov 0  }
   0x2   :  { %s1492_s9 = smov 0  }
   0x3 LB: > { %s27_s10 = sadd.s32 1, %s1426_s29  ;;  %s30_s11 = sadd.s32 1, %s1430_s30  ;;  %s1434_s9 = sphi %s1492_s9, %s18_s9   ;;  %s1430_s30 = sphi %s1490_s30, %s1674_s30   ;;  %s1426_s29 = sphi %s1488_s29, %s1673_s29   ;;  %s1422_s28 = sphi %s1486_s28, %s1672_s28   ;;  %s1418_s27 = sphi %s1484_s27, %s1671_s27  }
   0x4   : > { %p28_p0 = scmp.ge.s32.totalorder %s27_s10, 8  ;;  %p1240_p1 = scmp.ge.s32.totalorder %s1434_s9, 1 }
   0x5   : > { %p370_p2 = scmp.lt.s32.totalorder %s1434_s9, 17 }
   0x6   : > { %s1676_s10 = smov (%p28_p0, %s27_s10), 0  ;;  %s1678_s11 = smov (!%p28_p0, %s30_s11), %s1430_s30 }
   0x7   : > { %p371_p3 = pnand %p1240_p1, %p370_p2  ;;  %p32_p4 = scmp.ge.s32.totalorder %s1678_s11, 2 }
   0x8   : > { %v1255_v0 = vld [vmem:[%s1667_s6 + $0x2] sm:$0x3] (!%p371_p3)  ;;  %vm534_vm0 = vcmask (!%p371_p3), 1040384   ;;  %vm535_vm1 = vcmask (!%p371_p3), 1041408   ;;  %v1436_v1 = vmov (!%p371_p3), 0.0   ;;  %v1437_v2 = vmov (!%p371_p3), 65535  }
   0x9   : > { %s1680_s11 = smov (%p32_p4, %s1678_s11), 0  ;;  %374 = sbr.rel (%p371_p3) target bundleno = 280 (0x118), region = 52 }
   0xa   : > { %1295 = vmatprep.subr.bf16.mxu0 (!%p371_p3), %v1436_v1  ;;  %v536_v3 = vsel (!%p371_p3), %vm534_vm0, 4294967295, %v1437_v2  ;;  %1301 = vmatprep.subr.bf16.mxu1 (!%p371_p3), %v1436_v1  ;;  %v526_v4 = vld [vmem:[%s1667_s6] sm:$0x3] (!%p371_p3)  ;;  %p458_p5 = scmp.lt.s32.totalorder (!%p371_p3), %s1422_s28, 1  ;;  %p460_p6 = scmp.lt.s32.totalorder (!%p371_p3), %s1418_s27, 8  ;;  %vm1438_vm2 = vmmov (!%p371_p3), 0  }
   0xb   : > { %v1528_v5 = vsel (!%p371_p3), %vm535_vm1, %v536_v3, 0  ;;  %1297 = vmatprep.mubr.msk.bf16.mxu0 (!%p371_p3), %vm1438_vm2, %v1436_v1  ;;  %1303 = vmatprep.mubr.msk.bf16.mxu1 (!%p371_p3), %vm1438_vm2, %v1436_v1  ;;  %v1258_v8 = vld [vmem:[%s1667_s6 + $0x4] sm:$0x3] (!%p371_p3)  ;;  %v1261_v9 = vld [vmem:[%s1667_s6 + $0x6] sm:$0x3] (!%p371_p3)  ;;  %s476_s24 = sadd.s32 (!%p371_p3), 1, %s1418_s27 }
   0xc   : > { %v539_v6 = vand.u32 (!%p371_p3), %v1255_v0, %v1528_v5  ;;  %v585_v7 = vand.u32 (!%p371_p3), %v1528_v5, %v526_v4  ;;  %vm530_vm3 = vcmask (!%p371_p3), 23552   ;;  %v647_v10 = vand.u32 (!%p371_p3), %v1258_v8, %v1528_v5  ;;  %p1564_p7 = scmp.lt.s32.totalorder (!%p371_p3), %s476_s24, 8  ;;  %v1263_v15 = vld [vmem:[%s1667_s6 + $0x8] sm:$0x3] (!%p371_p3)  ;;  %v1265_v19 = vld [vmem:[%s1667_s6 + $0xa] sm:$0x3] (!%p371_p3) }
   0xd   : > { %v697_v11 = vand.u32 (!%p371_p3), %v1261_v9, %v1528_v5  ;;  %v747_v22 = vand.u32 (!%p371_p3), %v1263_v15, %v1528_v5  ;;  %v810_v24 = vand.u32 (!%p371_p3), %v1265_v19, %v1528_v5  ;;  %v1268_v28 = vld [vmem:[%s1667_s6 + $0xc] sm:$0x3] (!%p371_p3)  ;;  %v1270_v29 = vld [vmem:[%s1667_s6 + $0xe] sm:$0x3] (!%p371_p3)  ;;  %v1272_v35 = vld [vmem:[%s1667_s6 + $0x10] sm:$0x3] (!%p371_p3)  ;;  %v1017_v8 = vlaneseq (!%p371_p3) }
   0xe   : > { %1296 = vmatpush3.bf16.msra.mxu0 (!%p371_p3), %v539_v6  ;;  %1302 = vmatpush3.bf16.msra.mxu1 (!%p371_p3), %v585_v7  ;;  %v860_v32 = vand.u32 (!%p371_p3), %v1268_v28, %v1528_v5  ;;  %v910_v33 = vand.u32 (!%p371_p3), %v1270_v29, %v1528_v5  ;;  %v973_v38 = vand.u32 (!%p371_p3), %v1272_v35, %v1528_v5  ;;  %p518_p8 = scmp.lt.s32.totalorder (!%p371_p3), %s1418_s27, 7  ;;  %vm1040_vm5 = vcmask (!%p371_p3), 519168  }
   0xf   : > { %1307 = vmatprep.subr.bf16.mxu0 (!%p371_p3), %v1436_v1  ;;  %1313 = vmatprep.subr.bf16.mxu1 (!%p371_p3), %v1436_v1  ;;  %v1018_v9 = vshrl.u32 (!%p371_p3), %v1017_v8, 7 }
  0x10   : > { %s1682_s28 = smov (!%p458_p5, %s1422_s28), 1  ;;  %s1684_s24 = smov (!%p1564_p7, %s476_s24), 8 }
  0x11   : > { %s461_s16 = scalar_select %p460_p6, %s1418_s27, 8 }
  0x12   : > { %s1349_s17 = smul.u32 18, %s1682_s28  ;;  %s1686_s27 = smov (!%p518_p8, %s1418_s27), 7 }
  0x13   : > { %s1241_s22 = sshll.u32 %s461_s16, 1  ;;  %s1253_s19 = sshll.u32 %s1682_s28, 3 }
  0x14   : > { %s464_s23 = sadd.s32 %s1349_s17, %s1241_s22  ;;  %s521_s20 = sadd.s32 %s1253_s19, %s1686_s27 }
  0x15   : > { %s1552_s25 = sshll.u32 %s464_s23, 2 }
  0x16   : > { %s495_s13 = scalar_lea.vmem %s1664_s3, %s1552_s25  ;;  %s466_s16 = scalar_lea.vmem %s1661_s0, %s1552_s25 }
  0x17   : > { %v527_v12 = vld [vmem:[%s495_s13] sm:$0xf]  ;;  %s475_s21 = scalar_lea.vmem %s1662_s1, %s1552_s25  ;;  %s1245_s13 = sshll.u32 %s1684_s24, 1 }
  0x18   : > { %v525_v13 = vld [vmem:[%s466_s16] sm:$0xf]  ;;  %1298 = vmatmul.mubr.msk.bf16.vlgmr.msra.gmra.mrb[0].mxu0 %vm530_vm3, %v527_v12  ;;  %s1592_s14 = sadd.s32 %s1349_s17, %s1245_s13  ;;  %s504_s22 = scalar_lea.vmem %s1665_s4, %s1552_s25 }
  0x19   : > { %1304 = vmatmul.mubr.msk.bf16.vlgmr.msra.gmra.mrb[0].mxu1 %vm530_vm3, %v525_v13  ;;  %v1393_v14 = vld [vmem:[%s466_s16] sm:$0x1f]   ;;  %1308 = vmatpush3.bf16.msra.mxu0 %v647_v10  ;;  %s1246_s15 = sshll.u32 %s1592_s14, 2 }
  0x1a   : > { %1314 = vmatpush3.bf16.msra.mxu1 %v697_v11  ;;  %v637_v16 = vshrl.u32 %v1393_v14, 16  ;;  %v639_v17 = vshll.u32 %v1393_v14, 16  ;;  %1309 = vmatprep.mubr.msk.bf16.mxu0 %vm1438_vm2, %v1436_v1  ;;  %v1394_v18 = vld [vmem:[%s475_s21] sm:$0x1f]   ;;  %s485_s24 = scalar_lea.vmem %s1663_s2, %s1246_s15  ;;  %s514_s16 = scalar_lea.vmem %s1666_s5, %s1246_s15 }
  0x1b   : > { %1319 = vmatprep.subr.bf16.mxu0 %v1436_v1  ;;  %1315 = vmatprep.mubr.msk.bf16.mxu1 %vm1438_vm2, %v1436_v1  ;;  %v802_v21 = vshll.u32 %v1394_v18, 16  ;;  %v690_v23 = vld [vmem:[%s475_s21] sm:$0xf]  ;;  %v800_v26 = vshrl.u32 %v1394_v18, 16 }
  0x1c   : > { %1325 = vmatprep.subr.bf16.mxu1 %v1436_v1  ;;  %v641_v20 = vrot.slane %v639_v17, 1  ;;  %v740_v31 = vld [vmem:[%s504_s22] sm:$0xf] }
  0x1d   : > { %v804_v27 = vrot.slane %v802_v21, 1  ;;  %v1395_v34 = vld [vmem:[%s485_s24] sm:$0x1f]  }
  0x1e   : > { %v642_v25 = vor.u32 %v641_v20, %v637_v16  ;;  %v965_v36 = vshll.u32 %v1395_v34, 16  ;;  %v853_v37 = vld [vmem:[%s485_s24] sm:$0xf]  ;;  %v963_v40 = vshrl.u32 %v1395_v34, 16  ;;  %v1019_v20 = vsub.s32 0, %v1018_v9  ;;  %s1254_s24 = sshll.u32 %s521_s20, 2 }
  0x1f   : > { %v805_v30 = vor.u32 %v804_v27, %v800_v26  ;;  %v903_v39 = vld [vmem:[%s514_s16] sm:$0xf]  ;;  %v1036_v26 = vsub.s32 3, %v1018_v9  ;;  %s523_s28 = scalar_lea.vmem %s1669_s8, %s1254_s24 }
  0x20   : > { %1310 = vmatmul.mubr.msk.bf16.vlgmr.msra.gmra.mrb[4].mxu0 %vm530_vm3, %v642_v25  ;;  %v967_v41 = vrot.slane %v965_v36, 1  ;;  %v1016_v21 = vld [vmem:[%s1668_s7] sm:$0xf] }
  0x21   : > { %1316 = vmatmul.mubr.msk.bf16.vlgmr.msra.gmra.mrb[4].mxu1 %vm530_vm3, %v690_v23  ;;  %1320 = vmatpush3.bf16.msra.mxu0 %v747_v22  ;;  %v1025_v22 = vsub.s32 1, %v1018_v9  ;;  %v1030_v23 = vsub.s32 2, %v1018_v9  ;;  %v1037_v34 = vrot.slane %v1016_v21, %v1036_v26 }
  0x22   : > { %1326 = vmatpush3.bf16.msra.mxu1 %v810_v24  ;;  %1321 = vmatprep.mubr.msk.bf16.mxu0 %vm1438_vm2, %v1436_v1  ;;  %v968_v42 = vor.u32 %v967_v41, %v963_v40  ;;  %v1020_v24 = vrot.slane %v1016_v21, %v1019_v20 }
  0x23   : > { %1331 = vmatprep.subr.bf16.mxu0 %v1436_v1  ;;  %1327 = vmatprep.mubr.msk.bf16.mxu1 %vm1438_vm2, %v1436_v1  ;;  %v1026_v28 = vrot.slane %v1016_v21, %v1025_v22  ;;  %v1031_v29 = vrot.slane %v1016_v21, %v1030_v23 }
  0x24   : > { %1337 = vmatprep.subr.bf16.mxu1 %v1436_v1 }
  0x28   : > { %1322 = vmatmul.mubr.msk.bf16.vlgmr.msra.gmra.mrb[8].mxu0 %vm530_vm3, %v740_v31 }
  0x29   : > { %1328 = vmatmul.mubr.msk.bf16.vlgmr.msra.gmra.mrb[8].mxu1 %vm530_vm3, %v805_v30  ;;  %1332 = vmatpush3.bf16.msra.mxu0 %v860_v32 }
  0x2a   : > { %1338 = vmatpush3.bf16.msra.mxu1 %v910_v33  ;;  %1333 = vmatprep.mubr.msk.bf16.mxu0 %vm1438_vm2, %v1436_v1 }
  0x2b   : > { %1343 = vmatprep.subr.bf16.mxu0 %v1436_v1  ;;  %1339 = vmatprep.mubr.msk.bf16.mxu1 %vm1438_vm2, %v1436_v1 }
  0x30   : > { %1334 = vmatmul.mubr.msk.bf16.vlgmr.msra.gmra.mrb[12].mxu0 %vm530_vm3, %v853_v37 }
  0x31   : > { %1340 = vmatmul.mubr.msk.bf16.vlgmr.msra.gmra.mrb[12].mxu1 %vm530_vm3, %v903_v39  ;;  %1344 = vmatpush3.bf16.msra.mxu0 %v973_v38 }
  0x32   : > { %1345 = vmatprep.mubr.msk.bf16.mxu0 %vm1438_vm2, %v1436_v1 }
  0x38   : > { %1346 = vmatmul.mubr.msk.bf16.vlgmr.msra.gmra.mrb[16].mxu0 %vm530_vm3, %v968_v42 }
  0xeb   : > { %v575_v43 = vpop.f32.mrb[0].mxu0 }
  0xec   : > { %v621_v44 = vpop.f32.mrb[0].mxu1  ;;  %v1299_v46 = vpop.f32.mrb[1].mxu0 }
  0xed   : > { %v622_v45 = vadd.f32 %v621_v44, %v575_v43  ;;  %v1305_v47 = vpop.f32.mrb[1].mxu1  ;;  %v578_v48 = vpop.f32.mrb[2].mxu0 }
  0xee   : > { %v624_v49 = vpop.f32.mrb[2].mxu1  ;;  %v1300_v50 = vpop.f32.mrb[3].mxu0 }
  0xef   : > { %v1306_v51 = vpop.f32.mrb[3].mxu1 }
  0xf3   : > { %v683_v52 = vpop.f32.mrb[4].mxu0 }
  0xf4   : > { %v733_v53 = vpop.f32.mrb[4].mxu1  ;;  %v689_v54 = vadd.f32 %v683_v52, %v622_v45  ;;  %v1311_v55 = vpop.f32.mrb[5].mxu0 }
  0xf5   : > { %v1317_v56 = vpop.f32.mrb[5].mxu1  ;;  %v686_v57 = vpop.f32.mrb[6].mxu0 }
  0xf6   : > { %v736_v58 = vpop.f32.mrb[6].mxu1  ;;  %v739_v59 = vadd.f32 %v733_v53, %v689_v54  ;;  %v1312_v60 = vpop.f32.mrb[7].mxu0 }
  0xf7   : > { %v1318_v61 = vpop.f32.mrb[7].mxu1 }
  0xfb   : > { %v783_v62 = vpop.f32.mrb[8].mxu0 }
  0xfc   : > { %v846_v63 = vpop.f32.mrb[8].mxu1  ;;  %v789_v0 = vadd.f32 %v783_v62, %v739_v59  ;;  %v1323_v1 = vpop.f32.mrb[9].mxu0 }
  0xfd   : > { %v1329_v2 = vpop.f32.mrb[9].mxu1  ;;  %v786_v3 = vpop.f32.mrb[10].mxu0 }
  0xfe   : > { %v849_v4 = vpop.f32.mrb[10].mxu1  ;;  %v852_v5 = vadd.f32 %v846_v63, %v789_v0  ;;  %v1324_v6 = vpop.f32.mrb[11].mxu0 }
  0xff   : > { %v1330_v7 = vpop.f32.mrb[11].mxu1 }
 0x103   : > { %v896_v10 = vpop.f32.mrb[12].mxu0 }
 0x104   : > { %v946_v11 = vpop.f32.mrb[12].mxu1  ;;  %v902_v12 = vadd.f32 %v896_v10, %v852_v5  ;;  %v1335_v13 = vpop.f32.mrb[13].mxu0 }
 0x105   : > { %v1341_v14 = vpop.f32.mrb[13].mxu1  ;;  %v899_v15 = vpop.f32.mrb[14].mxu0 }
 0x106   : > { %v949_v16 = vpop.f32.mrb[14].mxu1  ;;  %v952_v17 = vadd.f32 %v946_v11, %v902_v12  ;;  %v1336_v18 = vpop.f32.mrb[15].mxu0 }
 0x107   : > { %v1342_v19 = vpop.f32.mrb[15].mxu1 }
 0x10b   : > { %v1009_v25 = vpop.f32.mrb[16].mxu0 }
 0x10c   : > { %v1015_v27 = vadd.f32 %v1009_v25, %v952_v17  ;;  %v1347_v30 = vpop.f32.mrb[17].mxu0 }
 0x10d   : > { %v1012_v31 = vpop.f32.mrb[18].mxu0 }
 0x10e   : > { %v1021_v32 = vadd.f32 %v1020_v24, %v1015_v27  ;;  %v1348_v33 = vpop.f32.mrb[19].mxu0 }
 0x110   : > { %vm1022_vm4 = vcmp.gt.f32.partialorder %v1021_v32, 0.0  ;;  %v1027_v35 = vmul.f32 %v1026_v28, %v1021_v32  ;;  %v1032_v36 = vmul.f32 %v1031_v29, %v1021_v32 }
 0x112   : > { %v1033_v37 = vsel %vm1022_vm4, %v1027_v35, %v1032_v36 }
 0x113   : > { %v1038_v38 = vadd.f32 %v1037_v34, %v1033_v37 }
 0x115   : > { %v1039_v39 = vpack.c.bf16 %v1038_v38, %v1038_v38 }
 0x117   : > { %1041 = vst.msk [vmem:[%s523_s28] sm:$0xf] %vm1040_vm5, %v1039_v39 }
 0x118 PF: > { %s18_s9 = sadd.s32 1, %s1434_s9   ;;  %s1671_s27 = smov %s1426_s29 }
 0x119   : > { %p15_p9 = scmp.ge.s32.totalorder %s18_s9, 18   ;;  %s1672_s28 = smov %s1430_s30 }
 0x11a   : > { %s1673_s29 = smov %s1676_s10  ;;  %s1674_s30 = smov %s1680_s11 }
 0x11b   :  { %17 = sbr.rel (!%p15_p9) target bundleno = 3 (0x3), region = 105 }

// kernel: discriminator_forward.5
= control target key start
LH: loop header
LB: loop body
LE: loop exit
PB: predicated region body
PF: predicated region fallthrough
CT: control target
= control target key end

     0   :  { %s1887_s27 = smov 0   ;;  %s1889_s28 = smov 0   ;;  %s2167_s0 = inlined_call_operand.vmem [shape: bf16[2,5,5,64], index: 0, kind: input, shape index: {}, may-alias: {0,2}]   ;;  %s2168_s1 = inlined_call_operand.vmem [shape: bf16[2,5,5,64], index: 1, kind: input, shape index: {}]   ;;  %s2169_s2 = inlined_call_operand.vmem [shape: bf16[2,5,5,64], index: 2, kind: input, shape index: {}, may-alias: {0,2}]   ;;  %s2170_s3 = inlined_call_operand.vmem [shape: bf16[2,5,5,64], index: 3, kind: input, shape index: {}, may-alias: {3,5}]   ;;  %s2171_s4 = inlined_call_operand.vmem [shape: bf16[2,5,5,64], index: 4, kind: input, shape index: {}]   ;;  %s2172_s5 = inlined_call_operand.vmem [shape: bf16[2,5,5,64], index: 5, kind: input, shape index: {}, may-alias: {3,5}]   ;;  %s2173_s6 = inlined_call_operand.vmem [shape: bf16[9,64,128], index: 6, kind: input, shape index: {}]   ;;  %s2174_s7 = inlined_call_operand.vmem [shape: f32[4,128], index: 7, kind: input, shape index: {}]   ;;  %s2175_s8 = inlined_call_operand.vmem [shape: bf16[2,4,4,128], index: 8, kind: output, shape index: {}]  }
   0x1   :  { %s1891_s29 = smov 0   ;;  %s1893_s30 = smov 0  }
   0x2   :  { %s1895_s9 = smov 0  }
   0x3 LB: > { %s27_s10 = sadd.s32 1, %s1830_s29  ;;  %s30_s11 = sadd.s32 1, %s1834_s30  ;;  %s1838_s9 = sphi %s1895_s9, %s18_s9   ;;  %s1834_s30 = sphi %s1893_s30, %s2179_s30   ;;  %s1830_s29 = sphi %s1891_s29, %s2178_s29   ;;  %s1826_s28 = sphi %s1889_s28, %s2177_s28   ;;  %s1822_s27 = sphi %s1887_s27, %s2176_s27  }
   0x4   : > { %p28_p0 = scmp.ge.s32.totalorder %s27_s10, 4  ;;  %p1442_p1 = scmp.ge.s32.totalorder %s1838_s9, 1 }
   0x5   : > { %p364_p2 = scmp.lt.s32.totalorder %s1838_s9, 9 }
   0x6   : > { %s2181_s10 = smov (%p28_p0, %s27_s10), 0  ;;  %s2183_s11 = smov (!%p28_p0, %s30_s11), %s1834_s30 }
   0x7   : > { %p365_p3 = pnand %p1442_p1, %p364_p2  ;;  %p32_p4 = scmp.ge.s32.totalorder %s2183_s11, 2 }
   0x8   : > { %v1761_v0 = vld [vmem:[%s2173_s6 + $0x20] sm:$0xff] (!%p365_p3)   ;;  %v1840_v1 = vmov (!%p365_p3), 0.0   ;;  %v1763_v3 = vld [vmem:[%s2173_s6 + $0x28] sm:$0xff] (!%p365_p3)   ;;  %vm1841_vm0 = vmmov (!%p365_p3), 0   ;;  %p446_p5 = scmp.lt.s32.totalorder (!%p365_p3), %s1826_s28, 1  ;;  %p448_p6 = scmp.lt.s32.totalorder (!%p365_p3), %s1822_s27, 4 }
   0x9   : > { %s2185_s11 = smov (%p32_p4, %s2183_s11), 0  ;;  %368 = sbr.rel (%p365_p3) target bundleno = 314 (0x13a), region = 52 }
   0xa   : > { %1610 = vmatprep.subr.bf16.mxu0 (!%p365_p3), %v1840_v1  ;;  %1622 = vmatprep.subr.bf16.mxu1 (!%p365_p3), %v1840_v1  ;;  %v1762_v2 = vld [vmem:[%s2173_s6] sm:$0xff] (!%p365_p3)   ;;  %v1764_v4 = vld [vmem:[%s2173_s6 + $0x8] sm:$0xff] (!%p365_p3)   ;;  %v1765_v5 = vld [vmem:[%s2173_s6 + $0x30] sm:$0xff] (!%p365_p3)   ;;  %vm550_vm1 = vcmask (!%p365_p3), 523264   ;;  %s462_s18 = sadd.s32 (!%p365_p3), 1, %s1822_s27  ;;  %p500_p8 = scmp.lt.s32.totalorder (!%p365_p3), %s1822_s27, 3 }
   0xb   : > { %1611 = vmatpush3.bf16.msra.mxu0 (!%p365_p3), %v1761_v0  ;;  %1618 = vmatprep.mubr.msk.bf16.mxu0 (!%p365_p3), %vm1841_vm0, %v1840_v1  ;;  %v1766_v6 = vld [vmem:[%s2173_s6 + $0x10] sm:$0xff] (!%p365_p3)   ;;  %v1767_v7 = vld [vmem:[%s2173_s6 + $0x38] sm:$0xff] (!%p365_p3)   ;;  %v1770_v9 = vld [vmem:[%s2173_s6 + $0x40] sm:$0xff] (!%p365_p3)   ;;  %p465_p7 = scmp.lt.s32.totalorder (!%p365_p3), %s462_s18, 4 }
   0xc   : > { %1623 = vmatpush3.bf16.msra.mxu1 (!%p365_p3), %v1762_v2  ;;  %1612 = vmatprep.subr.bf16.mxu0 (!%p365_p3), %v1840_v1  ;;  %v1768_v8 = vld [vmem:[%s2173_s6 + $0x18] sm:$0xff] (!%p365_p3)   ;;  %v1771_v10 = vld [vmem:[%s2173_s6 + $0x60] sm:$0xff] (!%p365_p3)   ;;  %v1772_v14 = vld [vmem:[%s2173_s6 + $0x48] sm:$0xff] (!%p365_p3)  }
   0xd   : > { %1624 = vmatprep.subr.bf16.mxu1 (!%p365_p3), %v1840_v1  ;;  %1630 = vmatprep.mubr.msk.bf16.mxu1 (!%p365_p3), %vm1841_vm0, %v1840_v1  ;;  %v1773_v15 = vld [vmem:[%s2173_s6 + $0x68] sm:$0xff] (!%p365_p3)   ;;  %v1774_v17 = vld [vmem:[%s2173_s6 + $0x50] sm:$0xff] (!%p365_p3)   ;;  %v1776_v21 = vld [vmem:[%s2173_s6 + $0x58] sm:$0xff] (!%p365_p3)  }
   0xe   : > { %v1775_v18 = vld [vmem:[%s2173_s6 + $0x70] sm:$0xff] (!%p365_p3)   ;;  %v1777_v22 = vld [vmem:[%s2173_s6 + $0x78] sm:$0xff] (!%p365_p3)   ;;  %v1778_v24 = vld [vmem:[%s2173_s6 + $0x80] sm:$0xff] (!%p365_p3)  }
   0xf   : > { %1613 = vmatpush3.bf16.msra.mxu0 (!%p365_p3), %v1763_v3  ;;  %v1780_v26 = vld [vmem:[%s2173_s6 + $0xa0] sm:$0xff] (!%p365_p3)   ;;  %v1781_v28 = vld [vmem:[%s2173_s6 + $0x88] sm:$0xff] (!%p365_p3)   ;;  %v1783_v31 = vld [vmem:[%s2173_s6 + $0x90] sm:$0xff] (!%p365_p3)  }
  0x10   : > { %s2187_s28 = smov (!%p446_p5, %s1826_s28), 1  ;;  %1625 = vmatpush3.bf16.msra.mxu1 %v1764_v4  ;;  %1614 = vmatprep.subr.bf16.mxu0 %v1840_v1  ;;  %s2189_s18 = smov (!%p465_p7, %s462_s18), 4  ;;  %v1782_v29 = vld [vmem:[%s2173_s6 + $0xa8] sm:$0xff]   ;;  %v1784_v32 = vld [vmem:[%s2173_s6 + $0xb0] sm:$0xff]   ;;  %v1785_v35 = vld [vmem:[%s2173_s6 + $0x98] sm:$0xff]  }
  0x11   : > { %s449_s20 = scalar_select %p448_p6, %s1822_s27, 4  ;;  %1626 = vmatprep.subr.bf16.mxu1 %v1840_v1  ;;  %v1786_v36 = vld [vmem:[%s2173_s6 + $0xb8] sm:$0xff]   ;;  %v1787_v38 = vld [vmem:[%s2173_s6 + $0xc0] sm:$0xff]   ;;  %v1789_v41 = vld [vmem:[%s2173_s6 + $0xc8] sm:$0xff]  }
  0x12   : > { %s1718_s23 = smul.u32 5, %s2187_s28  ;;  %v1788_v40 = vld [vmem:[%s2173_s6 + $0xe0] sm:$0xff]   ;;  %v1790_v42 = vld [vmem:[%s2173_s6 + $0xe8] sm:$0xff]   ;;  %v1791_v43 = vld [vmem:[%s2173_s6 + $0xd0] sm:$0xff]   ;;  %s2191_s27 = smov (!%p500_p8, %s1822_s27), 3 }
  0x13   : > { %1615 = vmatpush3.bf16.msra.mxu0 %v1765_v5  ;;  %v1792_v44 = vld [vmem:[%s2173_s6 + $0xf0] sm:$0xff]   ;;  %v1793_v45 = vld [vmem:[%s2173_s6 + $0xd8] sm:$0xff]   ;;  %v1796_v48 = vld [vmem:[%s2173_s6 + $0x100] sm:$0xff]   ;;  %s1449_s21 = sshll.u32 %s2187_s28, 2 }
  0x14   : > { %s451_s26 = sadd.s32 %s1718_s23, %s449_s20  ;;  %1627 = vmatpush3.bf16.msra.mxu1 %v1766_v6  ;;  %1616 = vmatprep.subr.bf16.mxu0 %v1840_v1  ;;  %s2023_s20 = sadd.s32 %s1718_s23, %s2189_s18  ;;  %v1794_v46 = vld [vmem:[%s2173_s6 + $0xf8] sm:$0xff]   ;;  %v1797_v51 = vld [vmem:[%s2173_s6 + $0x108] sm:$0xff]   ;;  %v1798_v53 = vld [vmem:[%s2173_s6 + $0x110] sm:$0xff]  }
  0x15   : > { %s1958_s12 = sshll.u32 %s451_s26, 2  ;;  %1628 = vmatprep.subr.bf16.mxu1 %v1840_v1  ;;  %s1445_s25 = sshll.u32 %s2023_s20, 2  ;;  %v1799_v56 = vld [vmem:[%s2173_s6 + $0x118] sm:$0xff]  }
  0x16   : > { %s453_s17 = scalar_lea.vmem %s2167_s0, %s1958_s12  ;;  %s479_s22 = scalar_lea.vmem %s2170_s3, %s1958_s12 }
  0x17   : > { %1617 = vmatpush3.bf16.msra.mxu0 %v1767_v7  ;;  %v516_v11 = vld [vmem:[%s479_s22] sm:$0x3]  ;;  %s1989_s16 = scalar_lea.vmem %s2168_s1, %s1958_s12  ;;  %s2046_s14 = scalar_lea.vmem %s2169_s2, %s1445_s25 }
  0x18   : > { %v507_v12 = vld [vmem:[%s453_s17] sm:$0x3]  ;;  %1629 = vmatpush3.bf16.msra.mxu1 %v1768_v8  ;;  %1634 = vmatprep.subr.bf16.mxu0 %v1840_v1  ;;  %s487_s19 = scalar_lea.vmem %s2171_s4, %s1958_s12  ;;  %s496_s23 = scalar_lea.vmem %s2172_s5, %s1445_s25 }
  0x19   : > { %v1769_v13 = vld [vmem:[%s453_s17] ss:$0 sps:$4 sm:$0x77]   ;;  %1646 = vmatprep.subr.bf16.mxu1 %v1840_v1  ;;  %s503_s22 = sadd.s32 %s1449_s21, %s2191_s27 }
  0x1a   : > { %1619 = vmatmul.mubr.msk.bf16.vlgmr.msra.gmra.mrb[0].mxu0 %vm550_vm1, %v516_v11  ;;  %v677_v16 = vshll.u32 %v1769_v13, 16  ;;  %v675_v19 = vshrl.u32 %v1769_v13, 16  ;;  %v749_v25 = vld [vmem:[%s1989_s16] sm:$0x3]  ;;  %s1450_s12 = sshll.u32 %s503_s22, 1 }
  0x1b   : > { %1631 = vmatmul.mubr.msk.bf16.vlgmr.msra.gmra.mrb[0].mxu1 %vm550_vm1, %v507_v12  ;;  %1635 = vmatpush3.bf16.msra.mxu0 %v1770_v9  ;;  %v1779_v27 = vld [vmem:[%s1989_s16] ss:$0 sps:$4 sm:$0x77]   ;;  %s505_s28 = scalar_lea.vmem %s2175_s8, %s1450_s12 }
  0x1c   : > { %1647 = vmatpush3.bf16.msra.mxu1 %v1771_v10  ;;  %1636 = vmatprep.subr.bf16.mxu0 %v1840_v1  ;;  %v679_v20 = vrot.slane %v677_v16, 1  ;;  %v921_v30 = vshll.u32 %v1779_v27, 16  ;;  %v919_v33 = vshrl.u32 %v1779_v27, 16  ;;  %v827_v37 = vld [vmem:[%s487_s19] sm:$0x3] }
  0x1d   : > { %1648 = vmatprep.subr.bf16.mxu1 %v1840_v1  ;;  %1642 = vmatprep.mubr.msk.bf16.mxu0 %vm1841_vm0, %v1840_v1  ;;  %v993_v47 = vld [vmem:[%s2046_s14] sm:$0x3] }
  0x1e   : > { %1654 = vmatprep.mubr.msk.bf16.mxu1 %vm1841_vm0, %v1840_v1  ;;  %v680_v23 = vor.u32 %v679_v20, %v675_v19  ;;  %v923_v34 = vrot.slane %v921_v30, 1  ;;  %v1071_v49 = vld [vmem:[%s496_s23] sm:$0x3] }
  0x1f   : > { %1637 = vmatpush3.bf16.msra.mxu0 %v1772_v14  ;;  %v1795_v50 = vld [vmem:[%s2046_s14] ss:$0 sps:$4 sm:$0x77]  }
  0x20   : > { %1649 = vmatpush3.bf16.msra.mxu1 %v1773_v15  ;;  %1638 = vmatprep.subr.bf16.mxu0 %v1840_v1  ;;  %v924_v39 = vor.u32 %v923_v34, %v919_v33  ;;  %v1165_v52 = vshll.u32 %v1795_v50, 16  ;;  %v1163_v54 = vshrl.u32 %v1795_v50, 16 }
  0x21   : > { %1650 = vmatprep.subr.bf16.mxu1 %v1840_v1 }
  0x22   : > { %v1167_v55 = vrot.slane %v1165_v52, 1 }
  0x23   : > { %1639 = vmatpush3.bf16.msra.mxu0 %v1774_v17 }
  0x24   : > { %1651 = vmatpush3.bf16.msra.mxu1 %v1775_v18  ;;  %1640 = vmatprep.subr.bf16.mxu0 %v1840_v1  ;;  %v1168_v57 = vor.u32 %v1167_v55, %v1163_v54 }
  0x25   : > { %1652 = vmatprep.subr.bf16.mxu1 %v1840_v1 }
  0x27   : > { %1641 = vmatpush3.bf16.msra.mxu0 %v1776_v21 }
  0x28   : > { %1653 = vmatpush3.bf16.msra.mxu1 %v1777_v22  ;;  %1658 = vmatprep.subr.bf16.mxu0 %v1840_v1 }
  0x29   : > { %1670 = vmatprep.subr.bf16.mxu1 %v1840_v1 }
  0x2a   : > { %1643 = vmatmul.mubr.msk.bf16.vlgmr.msra.gmra.mrb[4].mxu0 %vm550_vm1, %v680_v23 }
  0x2b   : > { %1659 = vmatpush3.bf16.msra.mxu0 %v1778_v24  ;;  %1655 = vmatmul.mubr.msk.bf16.vlgmr.msra.gmra.mrb[4].mxu1 %vm550_vm1, %v749_v25 }
  0x2c   : > { %1671 = vmatpush3.bf16.msra.mxu1 %v1780_v26  ;;  %1660 = vmatprep.subr.bf16.mxu0 %v1840_v1 }
  0x2d   : > { %1672 = vmatprep.subr.bf16.mxu1 %v1840_v1  ;;  %1666 = vmatprep.mubr.msk.bf16.mxu0 %vm1841_vm0, %v1840_v1 }
  0x2e   : > { %1678 = vmatprep.mubr.msk.bf16.mxu1 %vm1841_vm0, %v1840_v1 }
  0x2f   : > { %1661 = vmatpush3.bf16.msra.mxu0 %v1781_v28 }
  0x30   : > { %1673 = vmatpush3.bf16.msra.mxu1 %v1782_v29  ;;  %1662 = vmatprep.subr.bf16.mxu0 %v1840_v1 }
  0x31   : > { %1674 = vmatprep.subr.bf16.mxu1 %v1840_v1 }
  0x33   : > { %1663 = vmatpush3.bf16.msra.mxu0 %v1783_v31 }
  0x34   : > { %1675 = vmatpush3.bf16.msra.mxu1 %v1784_v32  ;;  %1664 = vmatprep.subr.bf16.mxu0 %v1840_v1  ;;  %v1238_v32 = vlaneseq }
  0x35   : > { %1676 = vmatprep.subr.bf16.mxu1 %v1840_v1 }
  0x36   : > { %v1239_v34 = vshrl.u32 %v1238_v32, 7 }
  0x37   : > { %1665 = vmatpush3.bf16.msra.mxu0 %v1785_v35 }
  0x38   : > { %1677 = vmatpush3.bf16.msra.mxu1 %v1786_v36  ;;  %1682 = vmatprep.subr.bf16.mxu0 %v1840_v1  ;;  %v1240_v35 = vsub.s32 0, %v1239_v34  ;;  %v1237_v36 = vld [vmem:[%s2174_s7] sm:$0xf] }
  0x39   : > { %1694 = vmatprep.subr.bf16.mxu1 %v1840_v1 }
  0x3a   : > { %1667 = vmatmul.mubr.msk.bf16.vlgmr.msra.gmra.mrb[8].mxu0 %vm550_vm1, %v827_v37  ;;  %v1246_v37 = vsub.s32 1, %v1239_v34 }
  0x3b   : > { %1683 = vmatpush3.bf16.msra.mxu0 %v1787_v38  ;;  %1679 = vmatmul.mubr.msk.bf16.vlgmr.msra.gmra.mrb[8].mxu1 %vm550_vm1, %v924_v39  ;;  %v1251_v38 = vsub.s32 2, %v1239_v34  ;;  %v1241_v39 = vrot.slane %v1237_v36, %v1240_v35 }
  0x3c   : > { %1695 = vmatpush3.bf16.msra.mxu1 %v1788_v40  ;;  %1684 = vmatprep.subr.bf16.mxu0 %v1840_v1 }
  0x3d   : > { %1696 = vmatprep.subr.bf16.mxu1 %v1840_v1  ;;  %1690 = vmatprep.mubr.msk.bf16.mxu0 %vm1841_vm0, %v1840_v1 }
  0x3e   : > { %1702 = vmatprep.mubr.msk.bf16.mxu1 %vm1841_vm0, %v1840_v1 }
  0x3f   : > { %1685 = vmatpush3.bf16.msra.mxu0 %v1789_v41  ;;  %v1257_v41 = vsub.s32 3, %v1239_v34 }
  0x40   : > { %1697 = vmatpush3.bf16.msra.mxu1 %v1790_v42  ;;  %1686 = vmatprep.subr.bf16.mxu0 %v1840_v1 }
  0x41   : > { %1698 = vmatprep.subr.bf16.mxu1 %v1840_v1 }
  0x43   : > { %1687 = vmatpush3.bf16.msra.mxu0 %v1791_v43  ;;  %v1247_v43 = vrot.slane %v1237_v36, %v1246_v37 }
  0x44   : > { %1699 = vmatpush3.bf16.msra.mxu1 %v1792_v44  ;;  %1688 = vmatprep.subr.bf16.mxu0 %v1840_v1  ;;  %v1252_v44 = vrot.slane %v1237_v36, %v1251_v38 }
  0x45   : > { %1700 = vmatprep.subr.bf16.mxu1 %v1840_v1 }
  0x47   : > { %1689 = vmatpush3.bf16.msra.mxu0 %v1793_v45 }
  0x48   : > { %1701 = vmatpush3.bf16.msra.mxu1 %v1794_v46  ;;  %1706 = vmatprep.subr.bf16.mxu0 %v1840_v1 }
  0x4a   : > { %1691 = vmatmul.mubr.msk.bf16.vlgmr.msra.gmra.mrb[12].mxu0 %vm550_vm1, %v993_v47 }
  0x4b   : > { %1707 = vmatpush3.bf16.msra.mxu0 %v1796_v48  ;;  %1703 = vmatmul.mubr.msk.bf16.vlgmr.msra.gmra.mrb[12].mxu1 %vm550_vm1, %v1071_v49  ;;  %v1258_v49 = vrot.slane %v1237_v36, %v1257_v41 }
  0x4c   : > { %1708 = vmatprep.subr.bf16.mxu0 %v1840_v1  ;;  %1714 = vmatprep.mubr.msk.bf16.mxu0 %vm1841_vm0, %v1840_v1 }
  0x4f   : > { %1709 = vmatpush3.bf16.msra.mxu0 %v1797_v51 }
  0x50   : > { %1710 = vmatprep.subr.bf16.mxu0 %v1840_v1 }
  0x53   : > { %1711 = vmatpush3.bf16.msra.mxu0 %v1798_v53 }
  0x54   : > { %1712 = vmatprep.subr.bf16.mxu0 %v1840_v1 }
  0x57   : > { %1713 = vmatpush3.bf16.msra.mxu0 %v1799_v56 }
  0x5a   : > { %1715 = vmatmul.mubr.msk.bf16.vlgmr.msra.gmra.mrb[16].mxu0 %vm550_vm1, %v1168_v57 }
  0xed   : > { %v588_v58 = vpop.f32.mrb[0].mxu0 }
  0xee   : > { %v1620_v59 = vpop.f32.mrb[1].mxu0  ;;  %v655_v60 = vpop.f32.mrb[0].mxu1 }
  0xef   : > { %v656_v61 = vadd.f32 %v655_v60, %v588_v58  ;;  %v591_v62 = vpop.f32.mrb[2].mxu0  ;;  %v1632_v63 = vpop.f32.mrb[1].mxu1 }
  0xf0   : > { %v1621_v0 = vpop.f32.mrb[3].mxu0  ;;  %v658_v2 = vpop.f32.mrb[2].mxu1 }
  0xf1   : > { %v1633_v3 = vpop.f32.mrb[3].mxu1 }
  0xfd   : > { %v742_v4 = vpop.f32.mrb[4].mxu0 }
  0xfe   : > { %v748_v5 = vadd.f32 %v742_v4, %v656_v61  ;;  %v1644_v6 = vpop.f32.mrb[5].mxu0  ;;  %v820_v7 = vpop.f32.mrb[4].mxu1 }
  0xff   : > { %v745_v8 = vpop.f32.mrb[6].mxu0  ;;  %v1656_v9 = vpop.f32.mrb[5].mxu1 }
 0x100   : > { %v826_v1 = vadd.f32 %v820_v7, %v748_v5  ;;  %v1645_v10 = vpop.f32.mrb[7].mxu0  ;;  %v823_v11 = vpop.f32.mrb[6].mxu1 }
 0x101   : > { %v1657_v12 = vpop.f32.mrb[7].mxu1 }
 0x10d   : > { %v898_v13 = vpop.f32.mrb[8].mxu0 }
 0x10e   : > { %v904_v14 = vadd.f32 %v898_v13, %v826_v1  ;;  %v1668_v15 = vpop.f32.mrb[9].mxu0  ;;  %v986_v16 = vpop.f32.mrb[8].mxu1 }
 0x10f   : > { %v901_v17 = vpop.f32.mrb[10].mxu0  ;;  %v1680_v18 = vpop.f32.mrb[9].mxu1 }
 0x110   : > { %v992_v19 = vadd.f32 %v986_v16, %v904_v14  ;;  %v1669_v20 = vpop.f32.mrb[11].mxu0  ;;  %v989_v21 = vpop.f32.mrb[10].mxu1 }
 0x111   : > { %v1681_v22 = vpop.f32.mrb[11].mxu1 }
 0x11d   : > { %v1064_v23 = vpop.f32.mrb[12].mxu0 }
 0x11e   : > { %v1070_v24 = vadd.f32 %v1064_v23, %v992_v19  ;;  %v1692_v25 = vpop.f32.mrb[13].mxu0  ;;  %v1142_v26 = vpop.f32.mrb[12].mxu1 }
 0x11f   : > { %v1067_v27 = vpop.f32.mrb[14].mxu0  ;;  %v1704_v28 = vpop.f32.mrb[13].mxu1 }
 0x120   : > { %v1148_v29 = vadd.f32 %v1142_v26, %v1070_v24  ;;  %v1693_v30 = vpop.f32.mrb[15].mxu0  ;;  %v1145_v31 = vpop.f32.mrb[14].mxu1 }
 0x121   : > { %v1705_v33 = vpop.f32.mrb[15].mxu1 }
 0x12d   : > { %v1230_v40 = vpop.f32.mrb[16].mxu0 }
 0x12e   : > { %v1236_v42 = vadd.f32 %v1230_v40, %v1148_v29  ;;  %v1716_v45 = vpop.f32.mrb[17].mxu0 }
 0x12f   : > { %v1233_v46 = vpop.f32.mrb[18].mxu0 }
 0x130   : > { %v1242_v47 = vadd.f32 %v1241_v39, %v1236_v42  ;;  %v1717_v48 = vpop.f32.mrb[19].mxu0 }
 0x132   : > { %vm1243_vm2 = vcmp.gt.f32.partialorder %v1242_v47, 0.0  ;;  %v1248_v50 = vmul.f32 %v1247_v43, %v1242_v47  ;;  %v1253_v51 = vmul.f32 %v1252_v44, %v1242_v47 }
 0x134   : > { %v1254_v52 = vsel %vm1243_vm2, %v1248_v50, %v1253_v51 }
 0x135   : > { %v1259_v53 = vadd.f32 %v1258_v49, %v1254_v52 }
 0x137   : > { %v1260_v54 = vpack.c.bf16 %v1259_v53, %v1259_v53 }
 0x139   : > { %1261 = vst [vmem:[%s505_s28] sm:$0x3] %v1260_v54 }
 0x13a PF: > { %s18_s9 = sadd.s32 1, %s1838_s9   ;;  %s2176_s27 = smov %s1830_s29 }
 0x13b   : > { %p15_p9 = scmp.ge.s32.totalorder %s18_s9, 10   ;;  %s2177_s28 = smov %s1834_s30 }
 0x13c   : > { %s2178_s29 = smov %s2181_s10  ;;  %s2179_s30 = smov %s2185_s11 }
 0x13d   :  { %17 = sbr.rel (!%p15_p9) target bundleno = 3 (0x3), region = 105 }

// kernel: discriminator_forward.6
= control target key start
LH: loop header
LB: loop body
LE: loop exit
PB: predicated region body
PF: predicated region fallthrough
CT: control target
= control target key end

     0   :  { %s2740_s27 = smov 0   ;;  %s2742_s28 = smov 0   ;;  %s3285_s0 = inlined_call_operand.vmem [shape: bf16[2,3,3,128], index: 0, kind: input, shape index: {}, may-alias: {0,2}]   ;;  %s3286_s1 = inlined_call_operand.vmem [shape: bf16[2,3,3,128], index: 1, kind: input, shape index: {}]   ;;  %s3287_s2 = inlined_call_operand.vmem [shape: bf16[2,3,3,128], index: 2, kind: input, shape index: {}, may-alias: {0,2}]   ;;  %s3288_s3 = inlined_call_operand.vmem [shape: bf16[2,3,3,128], index: 3, kind: input, shape index: {}, may-alias: {3,5}]   ;;  %s3289_s4 = inlined_call_operand.vmem [shape: bf16[2,3,3,128], index: 4, kind: input, shape index: {}]   ;;  %s3290_s5 = inlined_call_operand.vmem [shape: bf16[2,3,3,128], index: 5, kind: input, shape index: {}, may-alias: {3,5}]   ;;  %s3291_s6 = inlined_call_operand.vmem [shape: bf16[9,128,256], index: 6, kind: input, shape index: {}]   ;;  %s3292_s7 = inlined_call_operand.vmem [shape: f32[4,256], index: 7, kind: input, shape index: {}]   ;;  %s3293_s8 = inlined_call_operand.vmem [shape: bf16[2,2,2,256], index: 8, kind: output, shape index: {}]  }
   0x1   :  { %s2744_s29 = smov 0   ;;  %s2746_s30 = smov 0  }
   0x2   :  { %s2748_s9 = smov 0  }
   0x3 LB: > { %s27_s10 = sadd.s32 1, %s2683_s29  ;;  %s30_s11 = sadd.s32 1, %s2687_s30  ;;  %s2691_s9 = sphi %s2748_s9, %s18_s9   ;;  %s2687_s30 = sphi %s2746_s30, %s3297_s30   ;;  %s2683_s29 = sphi %s2744_s29, %s3296_s29   ;;  %s2679_s28 = sphi %s2742_s28, %s3295_s28   ;;  %s2675_s27 = sphi %s2740_s27, %s3294_s27  }
   0x4   : > { %p28_p0 = scmp.ge.s32.totalorder %s27_s10, 2  ;;  %p2106_p1 = scmp.ge.s32.totalorder %s2691_s9, 1 }
   0x5   : > { %p364_p2 = scmp.lt.s32.totalorder %s2691_s9, 5 }
   0x6   : > { %s3299_s10 = smov (%p28_p0, %s27_s10), 0  ;;  %s3301_s11 = smov (!%p28_p0, %s30_s11), %s2687_s30 }
   0x7   : > { %p365_p3 = pnand %p2106_p1, %p364_p2  ;;  %p32_p4 = scmp.ge.s32.totalorder %s3301_s11, 2 }
   0x8   : > { %v2437_v0 = vld [vmem:[%s3291_s6 + $0x84] ss:$8 sps:$4 sm:$0xff] (!%p365_p3)   ;;  %v2693_v2 = vmov (!%p365_p3), 0   ;;  %v2441_v3 = vld [vmem:[%s3291_s6 + $0x80] ss:$8 sps:$4 sm:$0xff] (!%p365_p3)   ;;  %p446_p5 = scmp.lt.s32.totalorder (!%p365_p3), %s2679_s28, 1 }
   0x9   : > { %s3303_s11 = smov (%p32_p4, %s3301_s11), 0  ;;  %368 = sbr.rel (%p365_p3) target bundleno = 398 (0x18e), region = 52 }
   0xa   : > { %v2439_v1 = vld [vmem:[%s3291_s6 + $0x4] ss:$8 sps:$4 sm:$0xff] (!%p365_p3)   ;;  %654 = vmatprep.mubr.bf16.mxu0 (!%p365_p3), %v2693_v2  ;;  %775 = vmatprep.mubr.bf16.mxu1 (!%p365_p3), %v2693_v2  ;;  %v2442_v4 = vld [vmem:[%s3291_s6] ss:$8 sps:$4 sm:$0xff] (!%p365_p3)   ;;  %v2443_v5 = vld [vmem:[%s3291_s6 + $0x94] ss:$8 sps:$4 sm:$0xff] (!%p365_p3)  }
   0xb   : > { %622 = vmatprep.subr.bf16.mxu0 (!%p365_p3), %v2437_v0  ;;  %743 = vmatprep.subr.bf16.mxu1 (!%p365_p3), %v2439_v1  ;;  %v2445_v6 = vld [vmem:[%s3291_s6 + $0x14] ss:$8 sps:$4 sm:$0xff] (!%p365_p3)   ;;  %v2447_v7 = vld [vmem:[%s3291_s6 + $0x90] ss:$8 sps:$4 sm:$0xff] (!%p365_p3)   ;;  %v2449_v9 = vld [vmem:[%s3291_s6 + $0xa4] ss:$8 sps:$4 sm:$0xff] (!%p365_p3)  }
   0xc   : > { %623 = vmatpush1.bf16.msra.mxu0 (!%p365_p3), %v2441_v3  ;;  %744 = vmatpush1.bf16.msra.mxu1 (!%p365_p3), %v2442_v4  ;;  %v2448_v8 = vld [vmem:[%s3291_s6 + $0x10] ss:$8 sps:$4 sm:$0xff] (!%p365_p3)   ;;  %v2451_v10 = vld [vmem:[%s3291_s6 + $0x24] ss:$8 sps:$4 sm:$0xff] (!%p365_p3)   ;;  %v2453_v11 = vld [vmem:[%s3291_s6 + $0xa0] ss:$8 sps:$4 sm:$0xff] (!%p365_p3)  }
   0xd   : > { %624 = vmatprep.subr.bf16.mxu0 (!%p365_p3), %v2443_v5  ;;  %745 = vmatprep.subr.bf16.mxu1 (!%p365_p3), %v2445_v6  ;;  %v2454_v12 = vld [vmem:[%s3291_s6 + $0x20] ss:$8 sps:$4 sm:$0xff] (!%p365_p3)   ;;  %v2455_v13 = vld [vmem:[%s3291_s6 + $0xb4] ss:$8 sps:$4 sm:$0xff] (!%p365_p3)   ;;  %v2459_v15 = vld [vmem:[%s3291_s6 + $0xb0] ss:$8 sps:$4 sm:$0xff] (!%p365_p3)  }
   0xe   : > { %v2457_v14 = vld [vmem:[%s3291_s6 + $0x34] ss:$8 sps:$4 sm:$0xff] (!%p365_p3)   ;;  %v2460_v16 = vld [vmem:[%s3291_s6 + $0x30] ss:$8 sps:$4 sm:$0xff] (!%p365_p3)   ;;  %v2461_v17 = vld [vmem:[%s3291_s6 + $0xc4] ss:$8 sps:$4 sm:$0xff] (!%p365_p3)  }
   0xf   : > { %p448_p6 = scmp.lt.s32.totalorder (!%p365_p3), %s2675_s27, 2  ;;  %v2463_v18 = vld [vmem:[%s3291_s6 + $0x44] ss:$8 sps:$4 sm:$0xff] (!%p365_p3)   ;;  %v2465_v19 = vld [vmem:[%s3291_s6 + $0xc0] ss:$8 sps:$4 sm:$0xff] (!%p365_p3)   ;;  %s462_s16 = sadd.s32 (!%p365_p3), 1, %s2675_s27 }
  0x10   : > { %625 = vmatpush1.bf16.msra.mxu0 %v2447_v7  ;;  %746 = vmatpush1.bf16.msra.mxu1 %v2448_v8  ;;  %s3305_s28 = smov (!%p446_p5, %s2679_s28), 1  ;;  %v2466_v20 = vld [vmem:[%s3291_s6 + $0x40] ss:$8 sps:$4 sm:$0xff]   ;;  %v2467_v21 = vld [vmem:[%s3291_s6 + $0xd4] ss:$8 sps:$4 sm:$0xff]   ;;  %p465_p7 = scmp.lt.s32.totalorder %s462_s16, 2 }
  0x11   : > { %626 = vmatprep.subr.bf16.mxu0 %v2449_v9  ;;  %747 = vmatprep.subr.bf16.mxu1 %v2451_v10  ;;  %s449_s24 = scalar_select %p448_p6, %s2675_s27, 2  ;;  %v2469_v22 = vld [vmem:[%s3291_s6 + $0x54] ss:$8 sps:$4 sm:$0xff]   ;;  %v2471_v23 = vld [vmem:[%s3291_s6 + $0xd0] ss:$8 sps:$4 sm:$0xff]  }
  0x12   : > { %s2394_s12 = smul.u32 3, %s3305_s28  ;;  %v2472_v24 = vld [vmem:[%s3291_s6 + $0x50] ss:$8 sps:$4 sm:$0xff]   ;;  %v2473_v25 = vld [vmem:[%s3291_s6 + $0xe4] ss:$8 sps:$4 sm:$0xff]   ;;  %s3307_s16 = smov (!%p465_p7, %s462_s16), 2 }
  0x13   : > { %v2475_v26 = vld [vmem:[%s3291_s6 + $0x64] ss:$8 sps:$4 sm:$0xff]   ;;  %v2477_v27 = vld [vmem:[%s3291_s6 + $0xe0] ss:$8 sps:$4 sm:$0xff]   ;;  %v2479_v29 = vld [vmem:[%s3291_s6 + $0xf4] ss:$8 sps:$4 sm:$0xff]  }
  0x14   : > { %627 = vmatpush1.bf16.msra.mxu0 %v2453_v11  ;;  %748 = vmatpush1.bf16.msra.mxu1 %v2454_v12  ;;  %s451_s21 = sadd.s32 %s2394_s12, %s449_s24  ;;  %v2478_v28 = vld [vmem:[%s3291_s6 + $0x60] ss:$8 sps:$4 sm:$0xff]   ;;  %v2481_v30 = vld [vmem:[%s3291_s6 + $0x74] ss:$8 sps:$4 sm:$0xff]   ;;  %v2483_v31 = vld [vmem:[%s3291_s6 + $0xf0] ss:$8 sps:$4 sm:$0xff]  }
  0x15   : > { %628 = vmatprep.subr.bf16.mxu0 %v2455_v13  ;;  %749 = vmatprep.subr.bf16.mxu1 %v2457_v14  ;;  %s2872_s15 = sshll.u32 %s451_s21, 1  ;;  %v2484_v32 = vld [vmem:[%s3291_s6 + $0x70] ss:$8 sps:$4 sm:$0xff]   ;;  %v2487_v33 = vld [vmem:[%s3291_s6 + $0x104] ss:$8 sps:$4 sm:$0xff]   ;;  %p500_p8 = scmp.lt.s32.totalorder %s2675_s27, 1 }
  0x16   : > { %s479_s21 = scalar_lea.vmem %s3288_s3, %s2872_s15  ;;  %s2891_s13 = scalar_lea.vmem %s3285_s0, %s2872_s15  ;;  %v2490_v34 = vld [vmem:[%s3291_s6 + $0x184] ss:$8 sps:$4 sm:$0xff]   ;;  %v2485_v37 = vld [vmem:[%s3291_s6 + $0x100] ss:$8 sps:$4 sm:$0xff]   ;;  %v2493_v39 = vld [vmem:[%s3291_s6 + $0x114] ss:$8 sps:$4 sm:$0xff]  }
  0x17   : > { %v524_v35 = vld [vmem:[%s479_s21] sm:$0x1]  ;;  %v2496_v40 = vld [vmem:[%s3291_s6 + $0x194] ss:$8 sps:$4 sm:$0xff]   ;;  %v2491_v41 = vld [vmem:[%s3291_s6 + $0x110] ss:$8 sps:$4 sm:$0xff]   ;;  %s3000_s20 = scalar_lea.vmem %s3286_s1, %s2872_s15  ;;  %s487_s25 = scalar_lea.vmem %s3289_s4, %s2872_s15 }
  0x18   : > { %629 = vmatpush1.bf16.msra.mxu0 %v2459_v15  ;;  %750 = vmatpush1.bf16.msra.mxu1 %v2460_v16  ;;  %v507_v36 = vld [vmem:[%s2891_s13] sm:$0x1]  ;;  %v2494_v42 = vld [vmem:[%s3291_s6 + $0x190] ss:$8 sps:$4 sm:$0xff]   ;;  %v2499_v43 = vld [vmem:[%s3291_s6 + $0x124] ss:$8 sps:$4 sm:$0xff]  }
  0x19   : > { %630 = vmatprep.subr.bf16.mxu0 %v2461_v17  ;;  %751 = vmatprep.subr.bf16.mxu1 %v2463_v18  ;;  %v2488_v38 = vld [vmem:[%s3291_s6 + $0x180] ss:$8 sps:$4 sm:$0xff]   ;;  %v2502_v44 = vld [vmem:[%s3291_s6 + $0x1a4] ss:$8 sps:$4 sm:$0xff]   ;;  %v2505_v47 = vld [vmem:[%s3291_s6 + $0x134] ss:$8 sps:$4 sm:$0xff]  }
  0x1a   : > { %v2497_v45 = vld [vmem:[%s3291_s6 + $0x120] ss:$8 sps:$4 sm:$0xff]   ;;  %v2508_v48 = vld [vmem:[%s3291_s6 + $0x1b4] ss:$8 sps:$4 sm:$0xff]   ;;  %v2503_v49 = vld [vmem:[%s3291_s6 + $0x130] ss:$8 sps:$4 sm:$0xff]  }
  0x1b   : > { %v2500_v46 = vld [vmem:[%s3291_s6 + $0x1a0] ss:$8 sps:$4 sm:$0xff]   ;;  %v2506_v50 = vld [vmem:[%s3291_s6 + $0x1b0] ss:$8 sps:$4 sm:$0xff]   ;;  %v2511_v51 = vld [vmem:[%s3291_s6 + $0x144] ss:$8 sps:$4 sm:$0xff]  }
  0x1c   : > { %631 = vmatpush1.bf16.msra.mxu0 %v2465_v19  ;;  %752 = vmatpush1.bf16.msra.mxu1 %v2466_v20  ;;  %v2514_v52 = vld [vmem:[%s3291_s6 + $0x1c4] ss:$8 sps:$4 sm:$0xff]   ;;  %v2509_v53 = vld [vmem:[%s3291_s6 + $0x140] ss:$8 sps:$4 sm:$0xff]   ;;  %v2517_v55 = vld [vmem:[%s3291_s6 + $0x154] ss:$8 sps:$4 sm:$0xff]  }
  0x1d   : > { %632 = vmatprep.subr.bf16.mxu0 %v2467_v21  ;;  %753 = vmatprep.subr.bf16.mxu1 %v2469_v22  ;;  %v2512_v54 = vld [vmem:[%s3291_s6 + $0x1c0] ss:$8 sps:$4 sm:$0xff]   ;;  %v2520_v56 = vld [vmem:[%s3291_s6 + $0x1d4] ss:$8 sps:$4 sm:$0xff]   ;;  %v2515_v58 = vld [vmem:[%s3291_s6 + $0x150] ss:$8 sps:$4 sm:$0xff]  }
  0x1e   : > { %v2179_v57 = vld.sshfl [vmem:[%s2891_s13] sm:$0x3 pattern:$0x76325410]  ;;  %v2518_v59 = vld [vmem:[%s3291_s6 + $0x1d0] ss:$8 sps:$4 sm:$0xff]  }
  0x1f   : > { %v2523_v60 = vld [vmem:[%s3291_s6 + $0x164] ss:$8 sps:$4 sm:$0xff]   ;;  %v813_v62 = vshll.u32 %v2179_v57, 16  ;;  %v2521_v63 = vld [vmem:[%s3291_s6 + $0x160] ss:$8 sps:$4 sm:$0xff]   ;;  %v811_v4 = vshrl.u32 %v2179_v57, 16 }
  0x20   : > { %633 = vmatpush1.bf16.msra.mxu0 %v2471_v23  ;;  %754 = vmatpush1.bf16.msra.mxu1 %v2472_v24  ;;  %v2526_v61 = vld [vmem:[%s3291_s6 + $0x1e4] ss:$8 sps:$4 sm:$0xff]   ;;  %v2524_v0 = vld [vmem:[%s3291_s6 + $0x1e0] ss:$8 sps:$4 sm:$0xff]   ;;  %v2529_v1 = vld [vmem:[%s3291_s6 + $0x174] ss:$8 sps:$4 sm:$0xff]  }
  0x21   : > { %634 = vmatprep.subr.bf16.mxu0 %v2473_v25  ;;  %755 = vmatprep.subr.bf16.mxu1 %v2475_v26  ;;  %v2532_v3 = vld [vmem:[%s3291_s6 + $0x1f4] ss:$8 sps:$4 sm:$0xff]   ;;  %v815_v5 = vrot.slane %v813_v62, 1  ;;  %v2527_v6 = vld [vmem:[%s3291_s6 + $0x170] ss:$8 sps:$4 sm:$0xff]   ;;  %s3309_s27 = smov (!%p500_p8, %s2675_s27), 1 }
  0x22   : > { %v2530_v7 = vld [vmem:[%s3291_s6 + $0x1f0] ss:$8 sps:$4 sm:$0xff]   ;;  %v2535_v8 = vld [vmem:[%s3291_s6 + $0x204] ss:$8 sps:$4 sm:$0xff]   ;;  %v2533_v11 = vld [vmem:[%s3291_s6 + $0x200] ss:$8 sps:$4 sm:$0xff]  }
  0x23   : > { %v2538_v9 = vld [vmem:[%s3291_s6 + $0x284] ss:$8 sps:$4 sm:$0xff]   ;;  %v816_v10 = vor.u32 %v815_v5, %v811_v4  ;;  %v941_v12 = vld [vmem:[%s3000_s20] sm:$0x1]  ;;  %v2541_v14 = vld [vmem:[%s3291_s6 + $0x214] ss:$8 sps:$4 sm:$0xff]  }
  0x24   : > { %635 = vmatpush1.bf16.msra.mxu0 %v2477_v27  ;;  %756 = vmatpush1.bf16.msra.mxu1 %v2478_v28  ;;  %v2536_v13 = vld [vmem:[%s3291_s6 + $0x280] ss:$8 sps:$4 sm:$0xff]   ;;  %v2544_v15 = vld [vmem:[%s3291_s6 + $0x294] ss:$8 sps:$4 sm:$0xff]   ;;  %v2539_v16 = vld [vmem:[%s3291_s6 + $0x210] ss:$8 sps:$4 sm:$0xff]  }
  0x25   : > { %636 = vmatprep.subr.bf16.mxu0 %v2479_v29  ;;  %757 = vmatprep.subr.bf16.mxu1 %v2481_v30  ;;  %v2542_v17 = vld [vmem:[%s3291_s6 + $0x290] ss:$8 sps:$4 sm:$0xff]   ;;  %v2547_v18 = vld [vmem:[%s3291_s6 + $0x224] ss:$8 sps:$4 sm:$0xff]   ;;  %v2545_v20 = vld [vmem:[%s3291_s6 + $0x220] ss:$8 sps:$4 sm:$0xff]  }
  0x26   : > { %v2550_v19 = vld [vmem:[%s3291_s6 + $0x2a4] ss:$8 sps:$4 sm:$0xff]   ;;  %v2548_v21 = vld [vmem:[%s3291_s6 + $0x2a0] ss:$8 sps:$4 sm:$0xff]   ;;  %v2553_v22 = vld [vmem:[%s3291_s6 + $0x234] ss:$8 sps:$4 sm:$0xff]  }
  0x27   : > { %v2556_v23 = vld [vmem:[%s3291_s6 + $0x2b4] ss:$8 sps:$4 sm:$0xff]   ;;  %v2551_v24 = vld [vmem:[%s3291_s6 + $0x230] ss:$8 sps:$4 sm:$0xff]   ;;  %v2559_v26 = vld [vmem:[%s3291_s6 + $0x244] ss:$8 sps:$4 sm:$0xff]  }
  0x28   : > { %637 = vmatpush1.bf16.msra.mxu0 %v2483_v31  ;;  %758 = vmatpush1.bf16.msra.mxu1 %v2484_v32  ;;  %v2554_v25 = vld [vmem:[%s3291_s6 + $0x2b0] ss:$8 sps:$4 sm:$0xff]   ;;  %v2562_v27 = vld [vmem:[%s3291_s6 + $0x2c4] ss:$8 sps:$4 sm:$0xff]   ;;  %v2557_v28 = vld [vmem:[%s3291_s6 + $0x240] ss:$8 sps:$4 sm:$0xff]  }
  0x29   : > { %898 = vmatprep.subr.bf16.mxu0 %v2487_v33  ;;  %1039 = vmatprep.subr.bf16.mxu1 %v2490_v34  ;;  %v2560_v29 = vld [vmem:[%s3291_s6 + $0x2c0] ss:$8 sps:$4 sm:$0xff]   ;;  %v2565_v30 = vld [vmem:[%s3291_s6 + $0x254] ss:$8 sps:$4 sm:$0xff]   ;;  %v2563_v33 = vld [vmem:[%s3291_s6 + $0x250] ss:$8 sps:$4 sm:$0xff]  }
  0x2a   : > { %v2568_v31 = vld [vmem:[%s3291_s6 + $0x2d4] ss:$8 sps:$4 sm:$0xff]   ;;  %v2276_v32 = vld.sshfl [vmem:[%s3000_s20] sm:$0x3 pattern:$0x76325410]  ;;  %s468_s20 = sadd.s32 %s2394_s12, %s3307_s16 }
  0x2b   : > { %655 = vmatmul.mubr.bf16.vlgmr.msra.gmra.mrb[0].mxu0 %v524_v35  ;;  %776 = vmatmul.mubr.bf16.vlgmr.msra.gmra.mrb[0].mxu1 %v507_v36  ;;  %v2566_v34 = vld [vmem:[%s3291_s6 + $0x2d0] ss:$8 sps:$4 sm:$0xff]   ;;  %v2571_v35 = vld [vmem:[%s3291_s6 + $0x264] ss:$8 sps:$4 sm:$0xff]   ;;  %v2608_v4 = vld [vmem:[%s3291_s6 + $0x3c0] ss:$8 sps:$4 sm:$0xff]  }
  0x2c   : > { %899 = vmatpush1.bf16.msra.mxu0 %v2485_v37  ;;  %1040 = vmatpush1.bf16.msra.mxu1 %v2488_v38  ;;  %v2574_v36 = vld [vmem:[%s3291_s6 + $0x2e4] ss:$8 sps:$4 sm:$0xff]   ;;  %v1252_v37 = vshll.u32 %v2276_v32, 16  ;;  %v2569_v38 = vld [vmem:[%s3291_s6 + $0x260] ss:$8 sps:$4 sm:$0xff]   ;;  %s2109_s12 = sshll.u32 %s468_s20, 1 }
  0x2d   : > { %900 = vmatprep.subr.bf16.mxu0 %v2493_v39  ;;  %1041 = vmatprep.subr.bf16.mxu1 %v2496_v40  ;;  %v2572_v39 = vld [vmem:[%s3291_s6 + $0x2e0] ss:$8 sps:$4 sm:$0xff]   ;;  %v2577_v40 = vld [vmem:[%s3291_s6 + $0x274] ss:$8 sps:$4 sm:$0xff]   ;;  %v2598_v57 = vld [vmem:[%s3291_s6 + $0x3a4] ss:$8 sps:$4 sm:$0xff]   ;;  %s470_s26 = scalar_lea.vmem %s3287_s2, %s2109_s12  ;;  %s496_s17 = scalar_lea.vmem %s3290_s5, %s2109_s12 }
  0x2e   : > { %930 = vmatprep.mubr.bf16.mxu0 %v2693_v2  ;;  %1071 = vmatprep.mubr.bf16.mxu1 %v2693_v2  ;;  %v2599_v62 = vld [vmem:[%s3291_s6 + $0x330] ss:$8 sps:$4 sm:$0xff]   ;;  %v2613_v5 = vld [vmem:[%s3291_s6 + $0x354] ss:$8 sps:$4 sm:$0xff]   ;;  %s2113_s18 = sshll.u32 %s3309_s27, 1  ;;  %s2114_s19 = sshll.u32 %s3305_s28, 2 }
  0x2f   : > { %s504_s22 = sadd.s32 %s2114_s19, %s2113_s18 }
  0x30   : > { %901 = vmatpush1.bf16.msra.mxu0 %v2491_v41  ;;  %1042 = vmatpush1.bf16.msra.mxu1 %v2494_v42  ;;  %v2580_v41 = vld [vmem:[%s3291_s6 + $0x2f4] ss:$8 sps:$4 sm:$0xff]   ;;  %v1250_v42 = vshrl.u32 %v2276_v32, 16 }
  0x31   : > { %902 = vmatprep.subr.bf16.mxu0 %v2499_v43  ;;  %1043 = vmatprep.subr.bf16.mxu1 %v2502_v44  ;;  %v1254_v43 = vrot.slane %v1252_v37, 1  ;;  %v2575_v44 = vld [vmem:[%s3291_s6 + $0x270] ss:$8 sps:$4 sm:$0xff]  }
  0x32   : > { %v2650_v37 = vld [vmem:[%s3291_s6 + $0x470] ss:$8 sps:$4 sm:$0xff]  }
  0x34   : > { %903 = vmatpush1.bf16.msra.mxu0 %v2497_v45  ;;  %1044 = vmatpush1.bf16.msra.mxu1 %v2500_v46  ;;  %v2578_v45 = vld [vmem:[%s3291_s6 + $0x2f0] ss:$8 sps:$4 sm:$0xff]   ;;  %v2583_v46 = vld [vmem:[%s3291_s6 + $0x304] ss:$8 sps:$4 sm:$0xff]  }
  0x35   : > { %904 = vmatprep.subr.bf16.mxu0 %v2505_v47  ;;  %1045 = vmatprep.subr.bf16.mxu1 %v2508_v48  ;;  %v2586_v47 = vld [vmem:[%s3291_s6 + $0x384] ss:$8 sps:$4 sm:$0xff]   ;;  %v1082_v48 = vld [vmem:[%s487_s25] sm:$0x1]  ;;  %s505_s25 = scalar_lea.vmem %s3293_s8, %s504_s22 }
  0x38   : > { %905 = vmatpush1.bf16.msra.mxu0 %v2503_v49  ;;  %1046 = vmatpush1.bf16.msra.mxu1 %v2506_v50  ;;  %v2581_v49 = vld [vmem:[%s3291_s6 + $0x300] ss:$8 sps:$4 sm:$0xff]   ;;  %v1255_v50 = vor.u32 %v1254_v43, %v1250_v42 }
  0x39   : > { %906 = vmatprep.subr.bf16.mxu0 %v2511_v51  ;;  %1047 = vmatprep.subr.bf16.mxu1 %v2514_v52  ;;  %v2584_v51 = vld [vmem:[%s3291_s6 + $0x380] ss:$8 sps:$4 sm:$0xff]   ;;  %v2589_v52 = vld [vmem:[%s3291_s6 + $0x314] ss:$8 sps:$4 sm:$0xff]  }
  0x3c   : > { %907 = vmatpush1.bf16.msra.mxu0 %v2509_v53  ;;  %1048 = vmatpush1.bf16.msra.mxu1 %v2512_v54  ;;  %v2592_v53 = vld [vmem:[%s3291_s6 + $0x394] ss:$8 sps:$4 sm:$0xff]   ;;  %v2587_v54 = vld [vmem:[%s3291_s6 + $0x310] ss:$8 sps:$4 sm:$0xff]  }
  0x3d   : > { %908 = vmatprep.subr.bf16.mxu0 %v2517_v55  ;;  %1049 = vmatprep.subr.bf16.mxu1 %v2520_v56  ;;  %v2590_v55 = vld [vmem:[%s3291_s6 + $0x390] ss:$8 sps:$4 sm:$0xff]   ;;  %v2595_v56 = vld [vmem:[%s3291_s6 + $0x324] ss:$8 sps:$4 sm:$0xff]  }
  0x40   : > { %909 = vmatpush1.bf16.msra.mxu0 %v2515_v58  ;;  %1050 = vmatpush1.bf16.msra.mxu1 %v2518_v59  ;;  %v2593_v58 = vld [vmem:[%s3291_s6 + $0x320] ss:$8 sps:$4 sm:$0xff]  }
  0x41   : > { %910 = vmatprep.subr.bf16.mxu0 %v2523_v60  ;;  %1051 = vmatprep.subr.bf16.mxu1 %v2526_v61  ;;  %v2596_v59 = vld [vmem:[%s3291_s6 + $0x3a0] ss:$8 sps:$4 sm:$0xff]   ;;  %v2601_v60 = vld [vmem:[%s3291_s6 + $0x334] ss:$8 sps:$4 sm:$0xff]  }
  0x42   : > { %v2604_v61 = vld [vmem:[%s3291_s6 + $0x3b4] ss:$8 sps:$4 sm:$0xff]  }
  0x44   : > { %911 = vmatpush1.bf16.msra.mxu0 %v2521_v63  ;;  %1052 = vmatpush1.bf16.msra.mxu1 %v2524_v0  ;;  %v2602_v63 = vld [vmem:[%s3291_s6 + $0x3b0] ss:$8 sps:$4 sm:$0xff]   ;;  %v2607_v0 = vld [vmem:[%s3291_s6 + $0x344] ss:$8 sps:$4 sm:$0xff]  }
  0x45   : > { %912 = vmatprep.subr.bf16.mxu0 %v2529_v1  ;;  %1053 = vmatprep.subr.bf16.mxu1 %v2532_v3  ;;  %v2610_v1 = vld [vmem:[%s3291_s6 + $0x3c4] ss:$8 sps:$4 sm:$0xff]   ;;  %v2605_v3 = vld [vmem:[%s3291_s6 + $0x340] ss:$8 sps:$4 sm:$0xff]  }
  0x48   : > { %913 = vmatpush1.bf16.msra.mxu0 %v2527_v6  ;;  %1054 = vmatpush1.bf16.msra.mxu1 %v2530_v7  ;;  %v2616_v6 = vld [vmem:[%s3291_s6 + $0x3d4] ss:$8 sps:$4 sm:$0xff]   ;;  %v2611_v7 = vld [vmem:[%s3291_s6 + $0x350] ss:$8 sps:$4 sm:$0xff]  }
  0x49   : > { %1180 = vmatprep.subr.bf16.mxu0 %v2535_v8  ;;  %1337 = vmatprep.subr.bf16.mxu1 %v2538_v9  ;;  %v2614_v8 = vld [vmem:[%s3291_s6 + $0x3d0] ss:$8 sps:$4 sm:$0xff]   ;;  %v2619_v9 = vld [vmem:[%s3291_s6 + $0x364] ss:$8 sps:$4 sm:$0xff]  }
  0x4b   : > { %931 = vmatmul.mubr.bf16.vlgmr.msra.gmra.mrb[4].mxu0 %v816_v10  ;;  %1072 = vmatmul.mubr.bf16.vlgmr.msra.gmra.mrb[4].mxu1 %v941_v12  ;;  %v2622_v10 = vld [vmem:[%s3291_s6 + $0x3e4] ss:$8 sps:$4 sm:$0xff]   ;;  %v2620_v12 = vld [vmem:[%s3291_s6 + $0x3e0] ss:$8 sps:$4 sm:$0xff]  }
  0x4c   : > { %1181 = vmatpush1.bf16.msra.mxu0 %v2533_v11  ;;  %1338 = vmatpush1.bf16.msra.mxu1 %v2536_v13  ;;  %v2617_v11 = vld [vmem:[%s3291_s6 + $0x360] ss:$8 sps:$4 sm:$0xff]   ;;  %v2625_v13 = vld [vmem:[%s3291_s6 + $0x374] ss:$8 sps:$4 sm:$0xff]  }
  0x4d   : > { %1182 = vmatprep.subr.bf16.mxu0 %v2541_v14  ;;  %1339 = vmatprep.subr.bf16.mxu1 %v2544_v15  ;;  %v2628_v14 = vld [vmem:[%s3291_s6 + $0x3f4] ss:$8 sps:$4 sm:$0xff]   ;;  %v2623_v15 = vld [vmem:[%s3291_s6 + $0x370] ss:$8 sps:$4 sm:$0xff]  }
  0x4e   : > { %1212 = vmatprep.mubr.bf16.mxu0 %v2693_v2  ;;  %1369 = vmatprep.mubr.bf16.mxu1 %v2693_v2 }
  0x50   : > { %1183 = vmatpush1.bf16.msra.mxu0 %v2539_v16  ;;  %1340 = vmatpush1.bf16.msra.mxu1 %v2542_v17  ;;  %v2626_v16 = vld [vmem:[%s3291_s6 + $0x3f0] ss:$8 sps:$4 sm:$0xff]   ;;  %v2631_v17 = vld [vmem:[%s3291_s6 + $0x404] ss:$8 sps:$4 sm:$0xff]  }
  0x51   : > { %1184 = vmatprep.subr.bf16.mxu0 %v2547_v18  ;;  %1341 = vmatprep.subr.bf16.mxu1 %v2550_v19  ;;  %v1380_v18 = vld [vmem:[%s470_s26] sm:$0x1] }
  0x52   : > { %v2629_v19 = vld [vmem:[%s3291_s6 + $0x400] ss:$8 sps:$4 sm:$0xff]  }
  0x54   : > { %1185 = vmatpush1.bf16.msra.mxu0 %v2545_v20  ;;  %1342 = vmatpush1.bf16.msra.mxu1 %v2548_v21  ;;  %v1521_v20 = vld [vmem:[%s496_s17] sm:$0x1]  ;;  %v2634_v21 = vld [vmem:[%s3291_s6 + $0x414] ss:$8 sps:$4 sm:$0xff]  }
  0x55   : > { %1186 = vmatprep.subr.bf16.mxu0 %v2553_v22  ;;  %1343 = vmatprep.subr.bf16.mxu1 %v2556_v23  ;;  %v2632_v22 = vld [vmem:[%s3291_s6 + $0x410] ss:$8 sps:$4 sm:$0xff]   ;;  %v2637_v23 = vld [vmem:[%s3291_s6 + $0x424] ss:$8 sps:$4 sm:$0xff]  }
  0x58   : > { %1187 = vmatpush1.bf16.msra.mxu0 %v2551_v24  ;;  %1344 = vmatpush1.bf16.msra.mxu1 %v2554_v25  ;;  %v2635_v24 = vld [vmem:[%s3291_s6 + $0x420] ss:$8 sps:$4 sm:$0xff]   ;;  %v2640_v25 = vld [vmem:[%s3291_s6 + $0x434] ss:$8 sps:$4 sm:$0xff]  }
  0x59   : > { %1188 = vmatprep.subr.bf16.mxu0 %v2559_v26  ;;  %1345 = vmatprep.subr.bf16.mxu1 %v2562_v27  ;;  %v2643_v26 = vld [vmem:[%s3291_s6 + $0x444] ss:$8 sps:$4 sm:$0xff]   ;;  %v2641_v27 = vld [vmem:[%s3291_s6 + $0x440] ss:$8 sps:$4 sm:$0xff]  }
  0x5c   : > { %1189 = vmatpush1.bf16.msra.mxu0 %v2557_v28  ;;  %1346 = vmatpush1.bf16.msra.mxu1 %v2560_v29  ;;  %v2646_v28 = vld [vmem:[%s3291_s6 + $0x454] ss:$8 sps:$4 sm:$0xff]   ;;  %v2373_v29 = vld.sshfl [vmem:[%s470_s26] sm:$0x3 pattern:$0x76325410] }
  0x5d   : > { %1190 = vmatprep.subr.bf16.mxu0 %v2565_v30  ;;  %1347 = vmatprep.subr.bf16.mxu1 %v2568_v31  ;;  %v2644_v30 = vld [vmem:[%s3291_s6 + $0x450] ss:$8 sps:$4 sm:$0xff]   ;;  %v2649_v31 = vld [vmem:[%s3291_s6 + $0x464] ss:$8 sps:$4 sm:$0xff]   ;;  %v1691_v32 = vshll.u32 %v2373_v29, 16 }
  0x60   : > { %1191 = vmatpush1.bf16.msra.mxu0 %v2563_v33  ;;  %1348 = vmatpush1.bf16.msra.mxu1 %v2566_v34  ;;  %v2647_v33 = vld [vmem:[%s3291_s6 + $0x460] ss:$8 sps:$4 sm:$0xff]   ;;  %v2652_v34 = vld [vmem:[%s3291_s6 + $0x474] ss:$8 sps:$4 sm:$0xff]  }
  0x61   : > { %1192 = vmatprep.subr.bf16.mxu0 %v2571_v35  ;;  %1349 = vmatprep.subr.bf16.mxu1 %v2574_v36  ;;  %v1689_v35 = vshrl.u32 %v2373_v29, 16  ;;  %v1693_v36 = vrot.slane %v1691_v32, 1 }
  0x64   : > { %1193 = vmatpush1.bf16.msra.mxu0 %v2569_v38  ;;  %1350 = vmatpush1.bf16.msra.mxu1 %v2572_v39  ;;  %v1694_v38 = vor.u32 %v1693_v36, %v1689_v35 }
  0x65   : > { %1194 = vmatprep.subr.bf16.mxu0 %v2577_v40  ;;  %1351 = vmatprep.subr.bf16.mxu1 %v2580_v41 }
  0x68   : > { %1195 = vmatpush1.bf16.msra.mxu0 %v2575_v44  ;;  %1352 = vmatpush1.bf16.msra.mxu1 %v2578_v45 }
  0x69   : > { %1478 = vmatprep.subr.bf16.mxu0 %v2583_v46  ;;  %1619 = vmatprep.subr.bf16.mxu1 %v2586_v47 }
  0x6b   : > { %1213 = vmatmul.mubr.bf16.vlgmr.msra.gmra.mrb[8].mxu0 %v1082_v48  ;;  %1370 = vmatmul.mubr.bf16.vlgmr.msra.gmra.mrb[8].mxu1 %v1255_v50 }
  0x6c   : > { %1479 = vmatpush1.bf16.msra.mxu0 %v2581_v49  ;;  %1620 = vmatpush1.bf16.msra.mxu1 %v2584_v51 }
  0x6d   : > { %1480 = vmatprep.subr.bf16.mxu0 %v2589_v52  ;;  %1621 = vmatprep.subr.bf16.mxu1 %v2592_v53 }
  0x6e   : > { %1510 = vmatprep.mubr.bf16.mxu0 %v2693_v2  ;;  %1651 = vmatprep.mubr.bf16.mxu1 %v2693_v2 }
  0x70   : > { %1481 = vmatpush1.bf16.msra.mxu0 %v2587_v54  ;;  %1622 = vmatpush1.bf16.msra.mxu1 %v2590_v55 }
  0x71   : > { %1482 = vmatprep.subr.bf16.mxu0 %v2595_v56  ;;  %1623 = vmatprep.subr.bf16.mxu1 %v2598_v57 }
  0x74   : > { %1483 = vmatpush1.bf16.msra.mxu0 %v2593_v58  ;;  %1624 = vmatpush1.bf16.msra.mxu1 %v2596_v59 }
  0x75   : > { %1484 = vmatprep.subr.bf16.mxu0 %v2601_v60  ;;  %1625 = vmatprep.subr.bf16.mxu1 %v2604_v61 }
  0x78   : > { %1485 = vmatpush1.bf16.msra.mxu0 %v2599_v62  ;;  %1626 = vmatpush1.bf16.msra.mxu1 %v2602_v63 }
  0x79   : > { %1486 = vmatprep.subr.bf16.mxu0 %v2607_v0  ;;  %1627 = vmatprep.subr.bf16.mxu1 %v2610_v1 }
  0x7c   : > { %1487 = vmatpush1.bf16.msra.mxu0 %v2605_v3  ;;  %1628 = vmatpush1.bf16.msra.mxu1 %v2608_v4 }
  0x7d   : > { %1488 = vmatprep.subr.bf16.mxu0 %v2613_v5  ;;  %1629 = vmatprep.subr.bf16.mxu1 %v2616_v6 }
  0x80   : > { %1489 = vmatpush1.bf16.msra.mxu0 %v2611_v7  ;;  %1630 = vmatpush1.bf16.msra.mxu1 %v2614_v8 }
  0x81   : > { %1490 = vmatprep.subr.bf16.mxu0 %v2619_v9  ;;  %1631 = vmatprep.subr.bf16.mxu1 %v2622_v10 }
  0x84   : > { %1491 = vmatpush1.bf16.msra.mxu0 %v2617_v11  ;;  %1632 = vmatpush1.bf16.msra.mxu1 %v2620_v12 }
  0x85   : > { %1492 = vmatprep.subr.bf16.mxu0 %v2625_v13  ;;  %1633 = vmatprep.subr.bf16.mxu1 %v2628_v14 }
  0x88   : > { %1493 = vmatpush1.bf16.msra.mxu0 %v2623_v15  ;;  %1634 = vmatpush1.bf16.msra.mxu1 %v2626_v16 }
  0x89   : > { %1776 = vmatprep.subr.bf16.mxu0 %v2631_v17 }
  0x8b   : > { %1511 = vmatmul.mubr.bf16.vlgmr.msra.gmra.mrb[12].mxu0 %v1380_v18  ;;  %1652 = vmatmul.mubr.bf16.vlgmr.msra.gmra.mrb[12].mxu1 %v1521_v20 }
  0x8c   : > { %1777 = vmatpush1.bf16.msra.mxu0 %v2629_v19  ;;  %1808 = vmatprep.mubr.bf16.mxu0 %v2693_v2  ;;  %v2638_v2 = vld [vmem:[%s3291_s6 + $0x430] ss:$8 sps:$4 sm:$0xff]  }
  0x8d   : > { %1778 = vmatprep.subr.bf16.mxu0 %v2634_v21 }
  0x90   : > { %1779 = vmatpush1.bf16.msra.mxu0 %v2632_v22  ;;  %v1821_v22 = vlaneseq }
  0x91   : > { %1780 = vmatprep.subr.bf16.mxu0 %v2637_v23 }
  0x92   : > { %v1822_v23 = vshrl.u32 %v1821_v22, 7 }
  0x94   : > { %1781 = vmatpush1.bf16.msra.mxu0 %v2635_v24  ;;  %v1823_v24 = vsub.s32 0, %v1822_v23  ;;  %v1869_v29 = vsub.s32 6, %v1822_v23 }
  0x95   : > { %1782 = vmatprep.subr.bf16.mxu0 %v2640_v25  ;;  %v1819_v25 = vld [vmem:[%s3292_s7] sm:$0xff] }
  0x98   : > { %1783 = vmatpush1.bf16.msra.mxu0 %v2638_v2  ;;  %v1827_v2 = vsub.s32 4, %v1822_v23 }
  0x99   : > { %1784 = vmatprep.subr.bf16.mxu0 %v2643_v26  ;;  %v1845_v26 = vsub.s32 1, %v1822_v23 }
  0x9a   : > { %v1828_v32 = vrot.slane %v1819_v25, %v1827_v2 }
  0x9c   : > { %1785 = vmatpush1.bf16.msra.mxu0 %v2641_v27  ;;  %v1865_v27 = vsub.s32 2, %v1822_v23 }
  0x9d   : > { %1786 = vmatprep.subr.bf16.mxu0 %v2646_v28  ;;  %v1849_v28 = vsub.s32 5, %v1822_v23 }
  0x9e   : > { %v1866_v35 = vrot.slane %v1819_v25, %v1865_v27 }
  0x9f   : > { %v1850_v36 = vrot.slane %v1819_v25, %v1849_v28 }
  0xa0   : > { %1787 = vmatpush1.bf16.msra.mxu0 %v2644_v30  ;;  %v1824_v30 = vrot.slane %v1819_v25, %v1823_v24 }
  0xa1   : > { %1788 = vmatprep.subr.bf16.mxu0 %v2649_v31  ;;  %v1887_v31 = vsub.s32 3, %v1822_v23 }
  0xa4   : > { %1789 = vmatpush1.bf16.msra.mxu0 %v2647_v33  ;;  %v1891_v33 = vsub.s32 7, %v1822_v23 }
  0xa5   : > { %1790 = vmatprep.subr.bf16.mxu0 %v2652_v34  ;;  %v1846_v34 = vrot.slane %v1819_v25, %v1845_v26 }
  0xa8   : > { %1791 = vmatpush1.bf16.msra.mxu0 %v2650_v37  ;;  %v1870_v37 = vrot.slane %v1819_v25, %v1869_v29 }
  0xab   : > { %1809 = vmatmul.mubr.bf16.vlgmr.msra.gmra.mrb[16].mxu0 %v1694_v38  ;;  %v1834_v38 = vrot.slane %v1824_v30, %v1823_v24 }
  0xfe   : > { %v656_v39 = vpop.f32.mrb[0].mxu0  ;;  %v777_v40 = vpop.f32.mrb[0].mxu1 }
  0xff   : > { %v778_v41 = vadd.f32 %v777_v40, %v656_v39  ;;  %v658_v42 = vpop.f32.mrb[1].mxu0  ;;  %v779_v43 = vpop.f32.mrb[1].mxu1  ;;  %v1888_v40 = vrot.slane %v1819_v25, %v1887_v31 }
 0x100   : > { %v780_v44 = vadd.f32 %v779_v43, %v658_v42  ;;  %v660_v45 = vpop.f32.mrb[2].mxu0  ;;  %v781_v46 = vpop.f32.mrb[2].mxu1  ;;  %v1892_v42 = vrot.slane %v1819_v25, %v1891_v33 }
 0x101   : > { %v661_v47 = vpop.f32.mrb[3].mxu0  ;;  %v782_v48 = vpop.f32.mrb[3].mxu1  ;;  %v1876_v45 = vrot.slane %v1866_v35, %v1865_v27 }
 0x102   : > { %v2694_v47 = vmov 1966171168  }
 0x103   : > { %v1911_v48 = vunpack.c.l.s4 %v2694_v47 }
 0x11e   : > { %v932_v49 = vpop.f32.mrb[4].mxu0  ;;  %v1073_v50 = vpop.f32.mrb[4].mxu1 }
 0x11f   : > { %v939_v51 = vadd.f32 %v932_v49, %v778_v41  ;;  %v934_v52 = vpop.f32.mrb[5].mxu0  ;;  %v1075_v53 = vpop.f32.mrb[5].mxu1  ;;  %v1838_v41 = vrot.slane %v1828_v32, %v1823_v24 }
 0x120   : > { %v940_v54 = vadd.f32 %v934_v52, %v780_v44  ;;  %v936_v55 = vpop.f32.mrb[6].mxu0  ;;  %v1077_v56 = vpop.f32.mrb[6].mxu1  ;;  %v1856_v44 = vrot.slane %v1846_v34, %v1845_v26 }
 0x121   : > { %v1080_v57 = vadd.f32 %v1073_v50, %v939_v51  ;;  %v937_v58 = vpop.f32.mrb[7].mxu0  ;;  %v1078_v59 = vpop.f32.mrb[7].mxu1  ;;  %v1860_v50 = vrot.slane %v1850_v36, %v1845_v26  ;;  %v1880_v51 = vrot.slane %v1870_v37, %v1865_v27  ;;  %v1898_v55 = vrot.slane %v1888_v40, %v1887_v31 }
 0x122   : > { %v1081_v60 = vadd.f32 %v1075_v53, %v940_v54 }
 0x13e   : > { %v1214_v61 = vpop.f32.mrb[8].mxu0  ;;  %v1371_v62 = vpop.f32.mrb[8].mxu1 }
 0x13f   : > { %v1221_v63 = vadd.f32 %v1214_v61, %v1080_v57  ;;  %v1216_v0 = vpop.f32.mrb[9].mxu0  ;;  %v1373_v1 = vpop.f32.mrb[9].mxu1  ;;  %v1902_v57 = vrot.slane %v1892_v42, %v1887_v31 }
 0x140   : > { %v1222_v3 = vadd.f32 %v1216_v0, %v1081_v60  ;;  %v1218_v4 = vpop.f32.mrb[10].mxu0  ;;  %v1375_v5 = vpop.f32.mrb[10].mxu1  ;;  %v1912_v60 = vunpack.c.0.s8 %v1911_v48 }
 0x141   : > { %v1378_v6 = vadd.f32 %v1371_v62, %v1221_v63  ;;  %v1219_v7 = vpop.f32.mrb[11].mxu0  ;;  %v1376_v8 = vpop.f32.mrb[11].mxu1 }
 0x142   : > { %v1379_v9 = vadd.f32 %v1373_v1, %v1222_v3  ;;  %v1915_v4 = vsub.s32 %v1912_v60, %v1822_v23 }
 0x15e   : > { %v1512_v10 = vpop.f32.mrb[12].mxu0  ;;  %v1653_v11 = vpop.f32.mrb[12].mxu1 }
 0x15f   : > { %v1519_v12 = vadd.f32 %v1512_v10, %v1378_v6  ;;  %v1514_v13 = vpop.f32.mrb[13].mxu0  ;;  %v1655_v14 = vpop.f32.mrb[13].mxu1 }
 0x160   : > { %v1520_v15 = vadd.f32 %v1514_v13, %v1379_v9  ;;  %v1516_v16 = vpop.f32.mrb[14].mxu0  ;;  %v1657_v17 = vpop.f32.mrb[14].mxu1 }
 0x161   : > { %v1660_v18 = vadd.f32 %v1653_v11, %v1519_v12  ;;  %v1517_v19 = vpop.f32.mrb[15].mxu0  ;;  %v1658_v20 = vpop.f32.mrb[15].mxu1 }
 0x162   : > { %v1661_v21 = vadd.f32 %v1655_v14, %v1520_v15 }
 0x17e   : > { %v1810_v39 = vpop.f32.mrb[16].mxu0 }
 0x17f   : > { %v1817_v43 = vadd.f32 %v1810_v39, %v1660_v18  ;;  %v1812_v46 = vpop.f32.mrb[17].mxu0 }
 0x180   : > { %v1818_v49 = vadd.f32 %v1812_v46, %v1661_v21  ;;  %v1814_v52 = vpop.f32.mrb[18].mxu0 }
 0x181   : > { %v1839_v53 = vadd.f32 %v1834_v38, %v1817_v43  ;;  %v1815_v54 = vpop.f32.mrb[19].mxu0 }
 0x182   : > { %v1840_v56 = vadd.f32 %v1838_v41, %v1818_v49 }
 0x183   : > { %vm1841_vm0 = vcmp.gt.f32.partialorder %v1839_v53, 0.0  ;;  %v1861_v58 = vmul.f32 %v1856_v44, %v1839_v53  ;;  %v1881_v59 = vmul.f32 %v1876_v45, %v1839_v53 }
 0x184   : > { %vm1842_vm1 = vcmp.gt.f32.partialorder %v1840_v56, 0.0  ;;  %v1862_v61 = vmul.f32 %v1860_v50, %v1840_v56  ;;  %v1882_v62 = vmul.f32 %v1880_v51, %v1840_v56 }
 0x185   : > { %v1883_v63 = vsel %vm1841_vm0, %v1861_v58, %v1881_v59 }
 0x186   : > { %v1903_v0 = vadd.f32 %v1898_v55, %v1883_v63  ;;  %v1884_v1 = vsel %vm1842_vm1, %v1862_v61, %v1882_v62 }
 0x187   : > { %v1904_v3 = vadd.f32 %v1902_v57, %v1884_v1 }
 0x189   : > { %v2390_v5 = vpack.c.bf16 %v1904_v3, %v1903_v0 }
 0x18b   : > { %v1916_v6 = vrot.slane %v2390_v5, %v1915_v4 }
 0x18d   : > { %2391 = vst.sshfl [vmem:[%s505_s25] sm:$0x5 pattern:$0x73625140] %v1916_v6 }
 0x18e PF: > { %s18_s9 = sadd.s32 1, %s2691_s9   ;;  %s3294_s27 = smov %s2683_s29 }
 0x18f   : > { %p15_p9 = scmp.ge.s32.totalorder %s18_s9, 6   ;;  %s3295_s28 = smov %s2687_s30 }
 0x190   : > { %s3296_s29 = smov %s3299_s10  ;;  %s3297_s30 = smov %s3303_s11 }
 0x191   :  { %17 = sbr.rel (!%p15_p9) target bundleno = 3 (0x3), region = 105 }

// kernel: discriminator_forward.7
= control target key start
LH: loop header
LB: loop body
LE: loop exit
PB: predicated region body
PF: predicated region fallthrough
CT: control target
= control target key end

     0   :  { %v2781_v36 = vmov 1966171168   ;;  %v290_v38 = vlaneseq  ;;  %vm2078_vm1 = vcmask 1041408   ;;  %vm2102_vm2 = vcmask 1024   ;;  %s3630_s1 = inlined_call_operand.vmem [shape: bf16[1024,512], index: 1, kind: input, shape index: {}]   ;;  %s3631_s0 = inlined_call_operand.vmem [shape: bf16[2,1024], index: 0, kind: input, shape index: {}]   ;;  %s3632_s4 = inlined_call_operand.<no memory space> [shape: f32[1,1], index: 4, kind: input, shape index: {}]   ;;  %s3633_s2 = inlined_call_operand.vmem [shape: f32[1,512], index: 2, kind: input, shape index: {}]   ;;  %s3634_s3 = inlined_call_operand.vmem [shape: f32[1,512], index: 3, kind: input, shape index: {}]   ;;  %s3635_s5 = inlined_call_operand.vmem [shape: f32[2,1], index: 5, kind: output, shape index: {}]  }
   0x1   :  { %v2392_v0 = vld [vmem:[%s3630_s1 + $0x4] ss:$16 sps:$4 sm:$0xff]   ;;  %v2394_v1 = vld [vmem:[%s3630_s1 + $0xc] ss:$16 sps:$4 sm:$0xff]   ;;  %v2396_v2 = vld [vmem:[%s3630_s1] ss:$16 sps:$4 sm:$0xff]   ;;  %v288_v37 = vunpack.c.l.s4 %v2781_v36 }
   0x2   :  { %1623 = vmatprep.subr.bf16.mxu0 %v2392_v0  ;;  %v2397_v3 = vld [vmem:[%s3630_s1 + $0x8] ss:$16 sps:$4 sm:$0xff]   ;;  %1787 = vmatprep.subr.bf16.mxu1 %v2394_v1  ;;  %v2398_v4 = vld [vmem:[%s3630_s1 + $0x24] ss:$16 sps:$4 sm:$0xff]   ;;  %v2400_v5 = vld [vmem:[%s3630_s1 + $0x2c] ss:$16 sps:$4 sm:$0xff]  }
   0x3   :  { %1624 = vmatpush1.bf16.msra.mxu0 %v2396_v2  ;;  %1788 = vmatpush1.bf16.msra.mxu1 %v2397_v3  ;;  %v2402_v6 = vld [vmem:[%s3630_s1 + $0x20] ss:$16 sps:$4 sm:$0xff]   ;;  %v2403_v7 = vld [vmem:[%s3630_s1 + $0x28] ss:$16 sps:$4 sm:$0xff]   ;;  %v2404_v8 = vld [vmem:[%s3630_s1 + $0x44] ss:$16 sps:$4 sm:$0xff]   ;;  %v289_v42 = vunpack.c.0.s8 %v288_v37 }
   0x4   :  { %1625 = vmatprep.subr.bf16.mxu0 %v2398_v4  ;;  %1789 = vmatprep.subr.bf16.mxu1 %v2400_v5  ;;  %v2406_v9 = vld [vmem:[%s3630_s1 + $0x4c] ss:$16 sps:$4 sm:$0xff]   ;;  %v2408_v10 = vld [vmem:[%s3630_s1 + $0x40] ss:$16 sps:$4 sm:$0xff]   ;;  %v2409_v11 = vld [vmem:[%s3630_s1 + $0x48] ss:$16 sps:$4 sm:$0xff]  }
   0x5   :  { %v2410_v12 = vld [vmem:[%s3630_s1 + $0x64] ss:$16 sps:$4 sm:$0xff]   ;;  %v2412_v13 = vld [vmem:[%s3630_s1 + $0x6c] ss:$16 sps:$4 sm:$0xff]   ;;  %v2414_v14 = vld [vmem:[%s3630_s1 + $0x60] ss:$16 sps:$4 sm:$0xff]  }
   0x6   :  { %v2415_v15 = vld [vmem:[%s3630_s1 + $0x68] ss:$16 sps:$4 sm:$0xff]   ;;  %v2416_v16 = vld [vmem:[%s3630_s1 + $0x84] ss:$16 sps:$4 sm:$0xff]   ;;  %v2418_v17 = vld [vmem:[%s3630_s1 + $0x8c] ss:$16 sps:$4 sm:$0xff]  }
   0x7   :  { %1626 = vmatpush1.bf16.msra.mxu0 %v2402_v6  ;;  %1790 = vmatpush1.bf16.msra.mxu1 %v2403_v7  ;;  %v2420_v18 = vld [vmem:[%s3630_s1 + $0x80] ss:$16 sps:$4 sm:$0xff]   ;;  %v2421_v19 = vld [vmem:[%s3630_s1 + $0x88] ss:$16 sps:$4 sm:$0xff]   ;;  %v2422_v20 = vld [vmem:[%s3630_s1 + $0xa4] ss:$16 sps:$4 sm:$0xff]  }
   0x8   :  { %1627 = vmatprep.subr.bf16.mxu0 %v2404_v8  ;;  %1791 = vmatprep.subr.bf16.mxu1 %v2406_v9  ;;  %v2424_v21 = vld [vmem:[%s3630_s1 + $0xac] ss:$16 sps:$4 sm:$0xff]   ;;  %v2426_v22 = vld [vmem:[%s3630_s1 + $0xa0] ss:$16 sps:$4 sm:$0xff]   ;;  %v2427_v23 = vld [vmem:[%s3630_s1 + $0xa8] ss:$16 sps:$4 sm:$0xff]  }
   0x9   :  { %v2428_v24 = vld [vmem:[%s3630_s1 + $0xc4] ss:$16 sps:$4 sm:$0xff]   ;;  %v2430_v25 = vld [vmem:[%s3630_s1 + $0xcc] ss:$16 sps:$4 sm:$0xff]   ;;  %v2432_v26 = vld [vmem:[%s3630_s1 + $0xc0] ss:$16 sps:$4 sm:$0xff]  }
   0xa   :  { %v2433_v27 = vld [vmem:[%s3630_s1 + $0xc8] ss:$16 sps:$4 sm:$0xff]   ;;  %v2434_v28 = vld [vmem:[%s3630_s1 + $0xe4] ss:$16 sps:$4 sm:$0xff]   ;;  %v2436_v29 = vld [vmem:[%s3630_s1 + $0xec] ss:$16 sps:$4 sm:$0xff]  }
   0xb   :  { %1628 = vmatpush1.bf16.msra.mxu0 %v2408_v10  ;;  %1792 = vmatpush1.bf16.msra.mxu1 %v2409_v11  ;;  %v2438_v30 = vld [vmem:[%s3630_s1 + $0xe0] ss:$16 sps:$4 sm:$0xff]   ;;  %v2439_v31 = vld [vmem:[%s3630_s1 + $0xe8] ss:$16 sps:$4 sm:$0xff]   ;;  %v2440_v32 = vld [vmem:[%s3630_s1 + $0x104] ss:$16 sps:$4 sm:$0xff]  }
   0xc   :  { %1629 = vmatprep.subr.bf16.mxu0 %v2410_v12  ;;  %1793 = vmatprep.subr.bf16.mxu1 %v2412_v13  ;;  %v2442_v33 = vld [vmem:[%s3630_s1 + $0x10c] ss:$16 sps:$4 sm:$0xff]   ;;  %v2444_v34 = vld [vmem:[%s3630_s1 + $0x100] ss:$16 sps:$4 sm:$0xff]   ;;  %v2445_v35 = vld [vmem:[%s3630_s1 + $0x108] ss:$16 sps:$4 sm:$0xff]  }
   0xd   :  { %v2446_v39 = vld [vmem:[%s3630_s1 + $0x124] ss:$16 sps:$4 sm:$0xff]   ;;  %v2448_v40 = vld [vmem:[%s3630_s1 + $0x12c] ss:$16 sps:$4 sm:$0xff]   ;;  %v2450_v41 = vld [vmem:[%s3630_s1 + $0x120] ss:$16 sps:$4 sm:$0xff]  }
   0xe   :  { %v2930_v43 = vshrl.u32 %v290_v38, 7  ;;  %v2451_v44 = vld [vmem:[%s3630_s1 + $0x128] ss:$16 sps:$4 sm:$0xff]   ;;  %v2452_v45 = vld [vmem:[%s3630_s1 + $0x144] ss:$16 sps:$4 sm:$0xff]  }
   0xf   :  { %1630 = vmatpush1.bf16.msra.mxu0 %v2414_v14  ;;  %1794 = vmatpush1.bf16.msra.mxu1 %v2415_v15  ;;  %v2454_v46 = vld [vmem:[%s3630_s1 + $0x14c] ss:$16 sps:$4 sm:$0xff]   ;;  %v2456_v47 = vld [vmem:[%s3630_s1 + $0x140] ss:$16 sps:$4 sm:$0xff]   ;;  %v2457_v48 = vld [vmem:[%s3630_s1 + $0x148] ss:$16 sps:$4 sm:$0xff]  }
  0x10   :  { %1631 = vmatprep.subr.bf16.mxu0 %v2416_v16  ;;  %1795 = vmatprep.subr.bf16.mxu1 %v2418_v17  ;;  %v2948_v49 = vsub.s32 %v289_v42, %v2930_v43  ;;  %v2458_v50 = vld [vmem:[%s3630_s1 + $0x164] ss:$16 sps:$4 sm:$0xff]   ;;  %v2460_v51 = vld [vmem:[%s3630_s1 + $0x16c] ss:$16 sps:$4 sm:$0xff]   ;;  %v2462_v53 = vld [vmem:[%s3630_s1 + $0x160] ss:$16 sps:$4 sm:$0xff]  }
  0x11   :  { %v28_v52 = vld [vmem:[%s3631_s0] sm:$0xff]  ;;  %v2463_v55 = vld [vmem:[%s3630_s1 + $0x168] ss:$16 sps:$4 sm:$0xff]   ;;  %v2466_v57 = vld [vmem:[%s3630_s1 + $0x18c] ss:$16 sps:$4 sm:$0xff]  }
  0x12   :  { %v293_v54 = vrot.slane %v28_v52, %v2948_v49  ;;  %v2464_v56 = vld [vmem:[%s3630_s1 + $0x184] ss:$16 sps:$4 sm:$0xff]   ;;  %v2468_v59 = vld [vmem:[%s3630_s1 + $0x180] ss:$16 sps:$4 sm:$0xff]   ;;  %v2469_v61 = vld [vmem:[%s3630_s1 + $0x188] ss:$16 sps:$4 sm:$0xff]   ;;  %v286_v9 = vcombine.high %v28_v52, %v28_v52 }
  0x13   :  { %1632 = vmatpush1.bf16.msra.mxu0 %v2420_v18  ;;  %1796 = vmatpush1.bf16.msra.mxu1 %v2421_v19  ;;  %v2470_v62 = vld [vmem:[%s3630_s1 + $0x1a4] ss:$16 sps:$4 sm:$0xff]   ;;  %v2472_v63 = vld [vmem:[%s3630_s1 + $0x1ac] ss:$16 sps:$4 sm:$0xff]   ;;  %v2474_v0 = vld [vmem:[%s3630_s1 + $0x1a0] ss:$16 sps:$4 sm:$0xff]  }
  0x14   :  { %1633 = vmatprep.subr.bf16.mxu0 %v2422_v20  ;;  %1797 = vmatprep.subr.bf16.mxu1 %v2424_v21  ;;  %v301_v58 = vcombine.high %v293_v54, %v293_v54  ;;  %v2475_v1 = vld [vmem:[%s3630_s1 + $0x1a8] ss:$16 sps:$4 sm:$0xff]   ;;  %v2476_v2 = vld [vmem:[%s3630_s1 + $0x1c4] ss:$16 sps:$4 sm:$0xff]   ;;  %v2478_v3 = vld [vmem:[%s3630_s1 + $0x1cc] ss:$16 sps:$4 sm:$0xff]   ;;  %v300_v13 = vrot.slane %v286_v9, %v2948_v49  ;;  %v3026_v15 = vrot.slane %v293_v54, %v2948_v49 }
  0x15   :  { %v2480_v4 = vld [vmem:[%s3630_s1 + $0x1c0] ss:$16 sps:$4 sm:$0xff]   ;;  %v2481_v5 = vld [vmem:[%s3630_s1 + $0x1c8] ss:$16 sps:$4 sm:$0xff]   ;;  %v2482_v6 = vld [vmem:[%s3630_s1 + $0x1e4] ss:$16 sps:$4 sm:$0xff]  }
  0x16   :  { %v323_v60 = vrot.slane %v301_v58, %v2948_v49  ;;  %v2484_v7 = vld [vmem:[%s3630_s1 + $0x1ec] ss:$16 sps:$4 sm:$0xff]   ;;  %v2486_v8 = vld [vmem:[%s3630_s1 + $0x1e0] ss:$16 sps:$4 sm:$0xff]   ;;  %v2487_v10 = vld [vmem:[%s3630_s1 + $0x1e8] ss:$16 sps:$4 sm:$0xff]   ;;  %v302_v16 = vcombine.high %v300_v13, %v300_v13  ;;  %v3041_v21 = vrot.slane %v300_v13, %v2948_v49 }
  0x17   :  { %1634 = vmatpush1.bf16.msra.mxu0 %v2426_v22  ;;  %1798 = vmatpush1.bf16.msra.mxu1 %v2427_v23  ;;  %v2490_v11 = vld [vmem:[%s3630_s1 + $0x204] ss:$16 sps:$4 sm:$0xff]   ;;  %v2493_v12 = vld [vmem:[%s3630_s1 + $0x20c] ss:$16 sps:$4 sm:$0xff]   ;;  %v2488_v14 = vld [vmem:[%s3630_s1 + $0x200] ss:$16 sps:$4 sm:$0xff]  }
  0x18   :  { %1635 = vmatprep.subr.bf16.mxu0 %v2428_v24  ;;  %1799 = vmatprep.subr.bf16.mxu1 %v2430_v25  ;;  %v2491_v17 = vld [vmem:[%s3630_s1 + $0x208] ss:$16 sps:$4 sm:$0xff]   ;;  %v2496_v18 = vld [vmem:[%s3630_s1 + $0x224] ss:$16 sps:$4 sm:$0xff]   ;;  %v2499_v19 = vld [vmem:[%s3630_s1 + $0x22c] ss:$16 sps:$4 sm:$0xff]   ;;  %v3038_v20 = vrot.slane %v302_v16, %v2948_v49  ;;  %v333_v22 = vcombine.high %v323_v60, %v323_v60 }
  0x19   :  { %1655 = vmatprep.mubr.bf16.mxu0 %v323_v60  ;;  %1819 = vmatprep.mubr.bf16.mxu1 %v323_v60  ;;  %v2494_v23 = vld [vmem:[%s3630_s1 + $0x220] ss:$16 sps:$4 sm:$0xff]   ;;  %v2497_v24 = vld [vmem:[%s3630_s1 + $0x228] ss:$16 sps:$4 sm:$0xff]   ;;  %v2502_v25 = vld [vmem:[%s3630_s1 + $0x244] ss:$16 sps:$4 sm:$0xff]  }
  0x1a   :  { %v2515_v36 = vld [vmem:[%s3630_s1 + $0x288] ss:$16 sps:$4 sm:$0xff]   ;;  %v2520_v37 = vld [vmem:[%s3630_s1 + $0x2a4] ss:$16 sps:$4 sm:$0xff]   ;;  %v2523_v38 = vld [vmem:[%s3630_s1 + $0x2ac] ss:$16 sps:$4 sm:$0xff]  }
  0x1b   :  { %1636 = vmatpush1.bf16.msra.mxu0 %v2432_v26  ;;  %1800 = vmatpush1.bf16.msra.mxu1 %v2433_v27  ;;  %v2505_v26 = vld [vmem:[%s3630_s1 + $0x24c] ss:$16 sps:$4 sm:$0xff]   ;;  %v2500_v27 = vld [vmem:[%s3630_s1 + $0x240] ss:$16 sps:$4 sm:$0xff]   ;;  %v2533_v49 = vld [vmem:[%s3630_s1 + $0x2e8] ss:$16 sps:$4 sm:$0xff]  }
  0x1c   :  { %1637 = vmatprep.subr.bf16.mxu0 %v2434_v28  ;;  %1801 = vmatprep.subr.bf16.mxu1 %v2436_v29  ;;  %v2503_v28 = vld [vmem:[%s3630_s1 + $0x248] ss:$16 sps:$4 sm:$0xff]   ;;  %v2508_v29 = vld [vmem:[%s3630_s1 + $0x264] ss:$16 sps:$4 sm:$0xff]   ;;  %v2529_v42 = vld [vmem:[%s3630_s1 + $0x2cc] ss:$16 sps:$4 sm:$0xff]  }
  0x1d   :  { %v2536_v52 = vld [vmem:[%s3630_s1 + $0x300] ss:$16 sps:$4 sm:$0xff]   ;;  %v2544_v54 = vld [vmem:[%s3630_s1 + $0x324] ss:$16 sps:$4 sm:$0xff]   ;;  %v2569_v9 = vld [vmem:[%s3630_s1 + $0x3a8] ss:$16 sps:$4 sm:$0xff]  }
  0x1e   :  { %v2550_v58 = vld [vmem:[%s3630_s1 + $0x344] ss:$16 sps:$4 sm:$0xff]   ;;  %v2548_v60 = vld [vmem:[%s3630_s1 + $0x340] ss:$16 sps:$4 sm:$0xff]   ;;  %v2575_v13 = vld [vmem:[%s3630_s1 + $0x3c8] ss:$16 sps:$4 sm:$0xff]  }
  0x1f   :  { %1638 = vmatpush1.bf16.msra.mxu0 %v2438_v30  ;;  %1802 = vmatpush1.bf16.msra.mxu1 %v2439_v31  ;;  %v2511_v30 = vld [vmem:[%s3630_s1 + $0x26c] ss:$16 sps:$4 sm:$0xff]   ;;  %v2506_v31 = vld [vmem:[%s3630_s1 + $0x260] ss:$16 sps:$4 sm:$0xff]  }
  0x20   :  { %1639 = vmatprep.subr.bf16.mxu0 %v2440_v32  ;;  %1803 = vmatprep.subr.bf16.mxu1 %v2442_v33  ;;  %v2509_v32 = vld [vmem:[%s3630_s1 + $0x268] ss:$16 sps:$4 sm:$0xff]   ;;  %v2514_v33 = vld [vmem:[%s3630_s1 + $0x284] ss:$16 sps:$4 sm:$0xff]   ;;  %v2583_v16 = vld [vmem:[%s3630_s1 + $0x3ec] ss:$16 sps:$4 sm:$0xff]  }
  0x23   :  { %1640 = vmatpush1.bf16.msra.mxu0 %v2444_v34  ;;  %1804 = vmatpush1.bf16.msra.mxu1 %v2445_v35  ;;  %v2517_v34 = vld [vmem:[%s3630_s1 + $0x28c] ss:$16 sps:$4 sm:$0xff]   ;;  %v2512_v35 = vld [vmem:[%s3630_s1 + $0x280] ss:$16 sps:$4 sm:$0xff]  }
  0x24   :  { %1641 = vmatprep.subr.bf16.mxu0 %v2446_v39  ;;  %1805 = vmatprep.subr.bf16.mxu1 %v2448_v40  ;;  %v2518_v39 = vld [vmem:[%s3630_s1 + $0x2a0] ss:$16 sps:$4 sm:$0xff]   ;;  %v2521_v40 = vld [vmem:[%s3630_s1 + $0x2a8] ss:$16 sps:$4 sm:$0xff]  }
  0x27   :  { %1642 = vmatpush1.bf16.msra.mxu0 %v2450_v41  ;;  %1806 = vmatpush1.bf16.msra.mxu1 %v2451_v44  ;;  %v2526_v41 = vld [vmem:[%s3630_s1 + $0x2c4] ss:$16 sps:$4 sm:$0xff]   ;;  %v2524_v44 = vld [vmem:[%s3630_s1 + $0x2c0] ss:$16 sps:$4 sm:$0xff]  }
  0x28   :  { %1643 = vmatprep.subr.bf16.mxu0 %v2452_v45  ;;  %1807 = vmatprep.subr.bf16.mxu1 %v2454_v46  ;;  %v2527_v45 = vld [vmem:[%s3630_s1 + $0x2c8] ss:$16 sps:$4 sm:$0xff]   ;;  %v2532_v46 = vld [vmem:[%s3630_s1 + $0x2e4] ss:$16 sps:$4 sm:$0xff]  }
  0x2b   :  { %1644 = vmatpush1.bf16.msra.mxu0 %v2456_v47  ;;  %1808 = vmatpush1.bf16.msra.mxu1 %v2457_v48  ;;  %v2535_v47 = vld [vmem:[%s3630_s1 + $0x2ec] ss:$16 sps:$4 sm:$0xff]   ;;  %v2530_v48 = vld [vmem:[%s3630_s1 + $0x2e0] ss:$16 sps:$4 sm:$0xff]  }
  0x2c   :  { %1645 = vmatprep.subr.bf16.mxu0 %v2458_v50  ;;  %1809 = vmatprep.subr.bf16.mxu1 %v2460_v51  ;;  %v2538_v50 = vld [vmem:[%s3630_s1 + $0x304] ss:$16 sps:$4 sm:$0xff]   ;;  %v2541_v51 = vld [vmem:[%s3630_s1 + $0x30c] ss:$16 sps:$4 sm:$0xff]  }
  0x2f   :  { %1646 = vmatpush1.bf16.msra.mxu0 %v2462_v53  ;;  %1810 = vmatpush1.bf16.msra.mxu1 %v2463_v55  ;;  %v2539_v53 = vld [vmem:[%s3630_s1 + $0x308] ss:$16 sps:$4 sm:$0xff]   ;;  %v2547_v55 = vld [vmem:[%s3630_s1 + $0x32c] ss:$16 sps:$4 sm:$0xff]  }
  0x30   :  { %1647 = vmatprep.subr.bf16.mxu0 %v2464_v56  ;;  %1811 = vmatprep.subr.bf16.mxu1 %v2466_v57  ;;  %v2542_v56 = vld [vmem:[%s3630_s1 + $0x320] ss:$16 sps:$4 sm:$0xff]   ;;  %v2545_v57 = vld [vmem:[%s3630_s1 + $0x328] ss:$16 sps:$4 sm:$0xff]  }
  0x33   :  { %1648 = vmatpush1.bf16.msra.mxu0 %v2468_v59  ;;  %1812 = vmatpush1.bf16.msra.mxu1 %v2469_v61  ;;  %v2553_v59 = vld [vmem:[%s3630_s1 + $0x34c] ss:$16 sps:$4 sm:$0xff]   ;;  %v2551_v61 = vld [vmem:[%s3630_s1 + $0x348] ss:$16 sps:$4 sm:$0xff]  }
  0x34   :  { %1649 = vmatprep.subr.bf16.mxu0 %v2470_v62  ;;  %1813 = vmatprep.subr.bf16.mxu1 %v2472_v63  ;;  %v2556_v62 = vld [vmem:[%s3630_s1 + $0x364] ss:$16 sps:$4 sm:$0xff]   ;;  %v2559_v63 = vld [vmem:[%s3630_s1 + $0x36c] ss:$16 sps:$4 sm:$0xff]  }
  0x37   :  { %1650 = vmatpush1.bf16.msra.mxu0 %v2474_v0  ;;  %1814 = vmatpush1.bf16.msra.mxu1 %v2475_v1  ;;  %v2554_v0 = vld [vmem:[%s3630_s1 + $0x360] ss:$16 sps:$4 sm:$0xff]   ;;  %v2557_v1 = vld [vmem:[%s3630_s1 + $0x368] ss:$16 sps:$4 sm:$0xff]  }
  0x38   :  { %1651 = vmatprep.subr.bf16.mxu0 %v2476_v2  ;;  %1815 = vmatprep.subr.bf16.mxu1 %v2478_v3  ;;  %v2562_v2 = vld [vmem:[%s3630_s1 + $0x384] ss:$16 sps:$4 sm:$0xff]   ;;  %v2565_v3 = vld [vmem:[%s3630_s1 + $0x38c] ss:$16 sps:$4 sm:$0xff]  }
  0x3b   :  { %1652 = vmatpush1.bf16.msra.mxu0 %v2480_v4  ;;  %1816 = vmatpush1.bf16.msra.mxu1 %v2481_v5  ;;  %v2560_v4 = vld [vmem:[%s3630_s1 + $0x380] ss:$16 sps:$4 sm:$0xff]   ;;  %v2563_v5 = vld [vmem:[%s3630_s1 + $0x388] ss:$16 sps:$4 sm:$0xff]  }
  0x3c   :  { %1653 = vmatprep.subr.bf16.mxu0 %v2482_v6  ;;  %1817 = vmatprep.subr.bf16.mxu1 %v2484_v7  ;;  %v2568_v6 = vld [vmem:[%s3630_s1 + $0x3a4] ss:$16 sps:$4 sm:$0xff]   ;;  %v2571_v7 = vld [vmem:[%s3630_s1 + $0x3ac] ss:$16 sps:$4 sm:$0xff]  }
  0x3f   :  { %1654 = vmatpush1.bf16.msra.mxu0 %v2486_v8  ;;  %1818 = vmatpush1.bf16.msra.mxu1 %v2487_v10  ;;  %v2566_v8 = vld [vmem:[%s3630_s1 + $0x3a0] ss:$16 sps:$4 sm:$0xff]   ;;  %v2574_v10 = vld [vmem:[%s3630_s1 + $0x3c4] ss:$16 sps:$4 sm:$0xff]  }
  0x40   :  { %1664 = vmatprep.subr.bf16.mxu0 %v2490_v11  ;;  %1828 = vmatprep.subr.bf16.mxu1 %v2493_v12  ;;  %v2577_v11 = vld [vmem:[%s3630_s1 + $0x3cc] ss:$16 sps:$4 sm:$0xff]   ;;  %v2572_v12 = vld [vmem:[%s3630_s1 + $0x3c0] ss:$16 sps:$4 sm:$0xff]  }
  0x42   :  { %1656 = vmatmul.mubr.bf16.vlgmr.msra.gmra.mrb[0].mxu0 %v3026_v15  ;;  %1820 = vmatmul.mubr.bf16.vlgmr.msra.gmra.mrb[0].mxu1 %v3026_v15 }
  0x43   :  { %1665 = vmatpush1.bf16.msra.mxu0 %v2488_v14  ;;  %1829 = vmatpush1.bf16.msra.mxu1 %v2491_v17  ;;  %v2580_v14 = vld [vmem:[%s3630_s1 + $0x3e4] ss:$16 sps:$4 sm:$0xff]   ;;  %v2578_v17 = vld [vmem:[%s3630_s1 + $0x3e0] ss:$16 sps:$4 sm:$0xff]  }
  0x44   :  { %1666 = vmatprep.subr.bf16.mxu0 %v2496_v18  ;;  %1830 = vmatprep.subr.bf16.mxu1 %v2499_v19  ;;  %v2581_v18 = vld [vmem:[%s3630_s1 + $0x3e8] ss:$16 sps:$4 sm:$0xff]   ;;  %v2586_v19 = vld [vmem:[%s3630_s1 + $0x404] ss:$16 sps:$4 sm:$0xff]  }
  0x45   :  { %1696 = vmatprep.mubr.bf16.mxu0 %v333_v22  ;;  %1860 = vmatprep.mubr.bf16.mxu1 %v333_v22  ;;  %v2589_v22 = vld [vmem:[%s3630_s1 + $0x40c] ss:$16 sps:$4 sm:$0xff]  }
  0x47   :  { %1667 = vmatpush1.bf16.msra.mxu0 %v2494_v23  ;;  %1831 = vmatpush1.bf16.msra.mxu1 %v2497_v24  ;;  %v2584_v23 = vld [vmem:[%s3630_s1 + $0x400] ss:$16 sps:$4 sm:$0xff]   ;;  %v331_v24 = vcombine.high %v3026_v15, %v3026_v15 }
  0x48   :  { %1668 = vmatprep.subr.bf16.mxu0 %v2502_v25  ;;  %1832 = vmatprep.subr.bf16.mxu1 %v2505_v26  ;;  %v2587_v25 = vld [vmem:[%s3630_s1 + $0x408] ss:$16 sps:$4 sm:$0xff]   ;;  %v2592_v26 = vld [vmem:[%s3630_s1 + $0x424] ss:$16 sps:$4 sm:$0xff]   ;;  %v2590_v15 = vld [vmem:[%s3630_s1 + $0x420] ss:$16 sps:$4 sm:$0xff]  }
  0x4b   :  { %1669 = vmatpush1.bf16.msra.mxu0 %v2500_v27  ;;  %1833 = vmatpush1.bf16.msra.mxu1 %v2503_v28  ;;  %v2595_v27 = vld [vmem:[%s3630_s1 + $0x42c] ss:$16 sps:$4 sm:$0xff]   ;;  %v2593_v28 = vld [vmem:[%s3630_s1 + $0x428] ss:$16 sps:$4 sm:$0xff]  }
  0x4c   :  { %1670 = vmatprep.subr.bf16.mxu0 %v2508_v29  ;;  %1834 = vmatprep.subr.bf16.mxu1 %v2511_v30  ;;  %v2598_v29 = vld [vmem:[%s3630_s1 + $0x444] ss:$16 sps:$4 sm:$0xff]   ;;  %v2601_v30 = vld [vmem:[%s3630_s1 + $0x44c] ss:$16 sps:$4 sm:$0xff]  }
  0x4f   :  { %1671 = vmatpush1.bf16.msra.mxu0 %v2506_v31  ;;  %1835 = vmatpush1.bf16.msra.mxu1 %v2509_v32  ;;  %v2596_v31 = vld [vmem:[%s3630_s1 + $0x440] ss:$16 sps:$4 sm:$0xff]   ;;  %v2599_v32 = vld [vmem:[%s3630_s1 + $0x448] ss:$16 sps:$4 sm:$0xff]  }
  0x50   :  { %1672 = vmatprep.subr.bf16.mxu0 %v2514_v33  ;;  %1836 = vmatprep.subr.bf16.mxu1 %v2517_v34  ;;  %v2604_v33 = vld [vmem:[%s3630_s1 + $0x464] ss:$16 sps:$4 sm:$0xff]   ;;  %v2607_v34 = vld [vmem:[%s3630_s1 + $0x46c] ss:$16 sps:$4 sm:$0xff]  }
  0x53   :  { %1673 = vmatpush1.bf16.msra.mxu0 %v2512_v35  ;;  %1837 = vmatpush1.bf16.msra.mxu1 %v2515_v36  ;;  %v2602_v35 = vld [vmem:[%s3630_s1 + $0x460] ss:$16 sps:$4 sm:$0xff]   ;;  %v2605_v36 = vld [vmem:[%s3630_s1 + $0x468] ss:$16 sps:$4 sm:$0xff]  }
  0x54   :  { %1674 = vmatprep.subr.bf16.mxu0 %v2520_v37  ;;  %1838 = vmatprep.subr.bf16.mxu1 %v2523_v38  ;;  %v2610_v37 = vld [vmem:[%s3630_s1 + $0x484] ss:$16 sps:$4 sm:$0xff]   ;;  %v2613_v38 = vld [vmem:[%s3630_s1 + $0x48c] ss:$16 sps:$4 sm:$0xff]  }
  0x57   :  { %1675 = vmatpush1.bf16.msra.mxu0 %v2518_v39  ;;  %1839 = vmatpush1.bf16.msra.mxu1 %v2521_v40  ;;  %v2608_v39 = vld [vmem:[%s3630_s1 + $0x480] ss:$16 sps:$4 sm:$0xff]   ;;  %v2611_v40 = vld [vmem:[%s3630_s1 + $0x488] ss:$16 sps:$4 sm:$0xff]  }
  0x58   :  { %1676 = vmatprep.subr.bf16.mxu0 %v2526_v41  ;;  %1840 = vmatprep.subr.bf16.mxu1 %v2529_v42  ;;  %v2616_v41 = vld [vmem:[%s3630_s1 + $0x4a4] ss:$16 sps:$4 sm:$0xff]   ;;  %v2619_v42 = vld [vmem:[%s3630_s1 + $0x4ac] ss:$16 sps:$4 sm:$0xff]  }
  0x5b   :  { %1677 = vmatpush1.bf16.msra.mxu0 %v2524_v44  ;;  %1841 = vmatpush1.bf16.msra.mxu1 %v2527_v45  ;;  %v2614_v44 = vld [vmem:[%s3630_s1 + $0x4a0] ss:$16 sps:$4 sm:$0xff]   ;;  %v2617_v45 = vld [vmem:[%s3630_s1 + $0x4a8] ss:$16 sps:$4 sm:$0xff]  }
  0x5c   :  { %1678 = vmatprep.subr.bf16.mxu0 %v2532_v46  ;;  %1842 = vmatprep.subr.bf16.mxu1 %v2535_v47  ;;  %v2622_v46 = vld [vmem:[%s3630_s1 + $0x4c4] ss:$16 sps:$4 sm:$0xff]   ;;  %v2625_v47 = vld [vmem:[%s3630_s1 + $0x4cc] ss:$16 sps:$4 sm:$0xff]  }
  0x5f   :  { %1679 = vmatpush1.bf16.msra.mxu0 %v2530_v48  ;;  %1843 = vmatpush1.bf16.msra.mxu1 %v2533_v49  ;;  %v2620_v48 = vld [vmem:[%s3630_s1 + $0x4c0] ss:$16 sps:$4 sm:$0xff]   ;;  %v2623_v49 = vld [vmem:[%s3630_s1 + $0x4c8] ss:$16 sps:$4 sm:$0xff]  }
  0x60   :  { %1680 = vmatprep.subr.bf16.mxu0 %v2538_v50  ;;  %1844 = vmatprep.subr.bf16.mxu1 %v2541_v51  ;;  %v2628_v50 = vld [vmem:[%s3630_s1 + $0x4e4] ss:$16 sps:$4 sm:$0xff]   ;;  %v2631_v51 = vld [vmem:[%s3630_s1 + $0x4ec] ss:$16 sps:$4 sm:$0xff]  }
  0x63   :  { %1681 = vmatpush1.bf16.msra.mxu0 %v2536_v52  ;;  %1845 = vmatpush1.bf16.msra.mxu1 %v2539_v53  ;;  %v2626_v52 = vld [vmem:[%s3630_s1 + $0x4e0] ss:$16 sps:$4 sm:$0xff]   ;;  %v2629_v53 = vld [vmem:[%s3630_s1 + $0x4e8] ss:$16 sps:$4 sm:$0xff]  }
  0x64   :  { %1682 = vmatprep.subr.bf16.mxu0 %v2544_v54  ;;  %1846 = vmatprep.subr.bf16.mxu1 %v2547_v55  ;;  %v2634_v54 = vld [vmem:[%s3630_s1 + $0x504] ss:$16 sps:$4 sm:$0xff]   ;;  %v2637_v55 = vld [vmem:[%s3630_s1 + $0x50c] ss:$16 sps:$4 sm:$0xff]  }
  0x67   :  { %1683 = vmatpush1.bf16.msra.mxu0 %v2542_v56  ;;  %1847 = vmatpush1.bf16.msra.mxu1 %v2545_v57  ;;  %v2632_v56 = vld [vmem:[%s3630_s1 + $0x500] ss:$16 sps:$4 sm:$0xff]   ;;  %v2635_v57 = vld [vmem:[%s3630_s1 + $0x508] ss:$16 sps:$4 sm:$0xff]  }
  0x68   :  { %1684 = vmatprep.subr.bf16.mxu0 %v2550_v58  ;;  %1848 = vmatprep.subr.bf16.mxu1 %v2553_v59  ;;  %v2640_v58 = vld [vmem:[%s3630_s1 + $0x524] ss:$16 sps:$4 sm:$0xff]   ;;  %v2643_v59 = vld [vmem:[%s3630_s1 + $0x52c] ss:$16 sps:$4 sm:$0xff]  }
  0x6b   :  { %1685 = vmatpush1.bf16.msra.mxu0 %v2548_v60  ;;  %1849 = vmatpush1.bf16.msra.mxu1 %v2551_v61  ;;  %v2638_v60 = vld [vmem:[%s3630_s1 + $0x520] ss:$16 sps:$4 sm:$0xff]   ;;  %v2641_v61 = vld [vmem:[%s3630_s1 + $0x528] ss:$16 sps:$4 sm:$0xff]  }
  0x6c   :  { %1686 = vmatprep.subr.bf16.mxu0 %v2556_v62  ;;  %1850 = vmatprep.subr.bf16.mxu1 %v2559_v63  ;;  %v2646_v62 = vld [vmem:[%s3630_s1 + $0x544] ss:$16 sps:$4 sm:$0xff]   ;;  %v2649_v63 = vld [vmem:[%s3630_s1 + $0x54c] ss:$16 sps:$4 sm:$0xff]  }
  0x6f   :  { %1687 = vmatpush1.bf16.msra.mxu0 %v2554_v0  ;;  %1851 = vmatpush1.bf16.msra.mxu1 %v2557_v1  ;;  %v2644_v0 = vld [vmem:[%s3630_s1 + $0x540] ss:$16 sps:$4 sm:$0xff]   ;;  %v2647_v1 = vld [vmem:[%s3630_s1 + $0x548] ss:$16 sps:$4 sm:$0xff]  }
  0x70   :  { %1688 = vmatprep.subr.bf16.mxu0 %v2562_v2  ;;  %1852 = vmatprep.subr.bf16.mxu1 %v2565_v3  ;;  %v2652_v2 = vld [vmem:[%s3630_s1 + $0x564] ss:$16 sps:$4 sm:$0xff]   ;;  %v2655_v3 = vld [vmem:[%s3630_s1 + $0x56c] ss:$16 sps:$4 sm:$0xff]  }
  0x73   :  { %1689 = vmatpush1.bf16.msra.mxu0 %v2560_v4  ;;  %1853 = vmatpush1.bf16.msra.mxu1 %v2563_v5  ;;  %v2650_v4 = vld [vmem:[%s3630_s1 + $0x560] ss:$16 sps:$4 sm:$0xff]   ;;  %v2653_v5 = vld [vmem:[%s3630_s1 + $0x568] ss:$16 sps:$4 sm:$0xff]  }
  0x74   :  { %1690 = vmatprep.subr.bf16.mxu0 %v2568_v6  ;;  %1854 = vmatprep.subr.bf16.mxu1 %v2571_v7  ;;  %v2658_v6 = vld [vmem:[%s3630_s1 + $0x584] ss:$16 sps:$4 sm:$0xff]   ;;  %v2661_v7 = vld [vmem:[%s3630_s1 + $0x58c] ss:$16 sps:$4 sm:$0xff]  }
  0x77   :  { %1691 = vmatpush1.bf16.msra.mxu0 %v2566_v8  ;;  %1855 = vmatpush1.bf16.msra.mxu1 %v2569_v9  ;;  %v2656_v8 = vld [vmem:[%s3630_s1 + $0x580] ss:$16 sps:$4 sm:$0xff]   ;;  %v2659_v9 = vld [vmem:[%s3630_s1 + $0x588] ss:$16 sps:$4 sm:$0xff]  }
  0x78   :  { %1692 = vmatprep.subr.bf16.mxu0 %v2574_v10  ;;  %1856 = vmatprep.subr.bf16.mxu1 %v2577_v11  ;;  %v2664_v10 = vld [vmem:[%s3630_s1 + $0x5a4] ss:$16 sps:$4 sm:$0xff]   ;;  %v2667_v11 = vld [vmem:[%s3630_s1 + $0x5ac] ss:$16 sps:$4 sm:$0xff]  }
  0x7b   :  { %1693 = vmatpush1.bf16.msra.mxu0 %v2572_v12  ;;  %1857 = vmatpush1.bf16.msra.mxu1 %v2575_v13  ;;  %v2662_v12 = vld [vmem:[%s3630_s1 + $0x5a0] ss:$16 sps:$4 sm:$0xff]   ;;  %v2665_v13 = vld [vmem:[%s3630_s1 + $0x5a8] ss:$16 sps:$4 sm:$0xff]  }
  0x7c   :  { %1694 = vmatprep.subr.bf16.mxu0 %v2580_v14  ;;  %1858 = vmatprep.subr.bf16.mxu1 %v2583_v16  ;;  %v2670_v14 = vld [vmem:[%s3630_s1 + $0x5c4] ss:$16 sps:$4 sm:$0xff]   ;;  %v2673_v16 = vld [vmem:[%s3630_s1 + $0x5cc] ss:$16 sps:$4 sm:$0xff]  }
  0x7f   :  { %1695 = vmatpush1.bf16.msra.mxu0 %v2578_v17  ;;  %1859 = vmatpush1.bf16.msra.mxu1 %v2581_v18  ;;  %v2668_v17 = vld [vmem:[%s3630_s1 + $0x5c0] ss:$16 sps:$4 sm:$0xff]   ;;  %v2671_v18 = vld [vmem:[%s3630_s1 + $0x5c8] ss:$16 sps:$4 sm:$0xff]  }
  0x80   :  { %1705 = vmatprep.subr.bf16.mxu0 %v2586_v19  ;;  %1869 = vmatprep.subr.bf16.mxu1 %v2589_v22  ;;  %v2676_v19 = vld [vmem:[%s3630_s1 + $0x5e4] ss:$16 sps:$4 sm:$0xff]   ;;  %v2679_v22 = vld [vmem:[%s3630_s1 + $0x5ec] ss:$16 sps:$4 sm:$0xff]  }
  0x82   :  { %1697 = vmatmul.mubr.bf16.vlgmr.msra.gmra.mrb[0].mxu0 %v331_v24  ;;  %1861 = vmatmul.mubr.bf16.vlgmr.msra.gmra.mrb[0].mxu1 %v331_v24  ;;  %v2677_v24 = vld [vmem:[%s3630_s1 + $0x5e8] ss:$16 sps:$4 sm:$0xff]  }
  0x83   :  { %1706 = vmatpush1.bf16.msra.mxu0 %v2584_v23  ;;  %1870 = vmatpush1.bf16.msra.mxu1 %v2587_v25  ;;  %v2674_v23 = vld [vmem:[%s3630_s1 + $0x5e0] ss:$16 sps:$4 sm:$0xff]   ;;  %v2683_v25 = vld [vmem:[%s3630_s1 + $0x604] ss:$16 sps:$4 sm:$0xff]  }
  0x84   :  { %1707 = vmatprep.subr.bf16.mxu0 %v2592_v26  ;;  %1871 = vmatprep.subr.bf16.mxu1 %v2595_v27  ;;  %v2686_v26 = vld [vmem:[%s3630_s1 + $0x60c] ss:$16 sps:$4 sm:$0xff]   ;;  %v2681_v27 = vld [vmem:[%s3630_s1 + $0x600] ss:$16 sps:$4 sm:$0xff]  }
  0x85   :  { %1737 = vmatprep.mubr.bf16.mxu0 %v3038_v20  ;;  %1901 = vmatprep.mubr.bf16.mxu1 %v3038_v20 }
  0x87   :  { %1708 = vmatpush1.bf16.msra.mxu0 %v2590_v15  ;;  %1872 = vmatpush1.bf16.msra.mxu1 %v2593_v28  ;;  %v2684_v15 = vld [vmem:[%s3630_s1 + $0x608] ss:$16 sps:$4 sm:$0xff]   ;;  %v2689_v28 = vld [vmem:[%s3630_s1 + $0x624] ss:$16 sps:$4 sm:$0xff]  }
  0x88   :  { %1709 = vmatprep.subr.bf16.mxu0 %v2598_v29  ;;  %1873 = vmatprep.subr.bf16.mxu1 %v2601_v30  ;;  %v2692_v29 = vld [vmem:[%s3630_s1 + $0x62c] ss:$16 sps:$4 sm:$0xff]   ;;  %v334_v30 = vcombine.high %v3038_v20, %v3038_v20  ;;  %v2695_v20 = vld [vmem:[%s3630_s1 + $0x644] ss:$16 sps:$4 sm:$0xff]  }
  0x8b   :  { %1710 = vmatpush1.bf16.msra.mxu0 %v2596_v31  ;;  %1874 = vmatpush1.bf16.msra.mxu1 %v2599_v32  ;;  %v2687_v31 = vld [vmem:[%s3630_s1 + $0x620] ss:$16 sps:$4 sm:$0xff]   ;;  %v2690_v32 = vld [vmem:[%s3630_s1 + $0x628] ss:$16 sps:$4 sm:$0xff]  }
  0x8c   :  { %1711 = vmatprep.subr.bf16.mxu0 %v2604_v33  ;;  %1875 = vmatprep.subr.bf16.mxu1 %v2607_v34  ;;  %v2698_v33 = vld [vmem:[%s3630_s1 + $0x64c] ss:$16 sps:$4 sm:$0xff]   ;;  %v2693_v34 = vld [vmem:[%s3630_s1 + $0x640] ss:$16 sps:$4 sm:$0xff]  }
  0x8f   :  { %1712 = vmatpush1.bf16.msra.mxu0 %v2602_v35  ;;  %1876 = vmatpush1.bf16.msra.mxu1 %v2605_v36  ;;  %v2696_v35 = vld [vmem:[%s3630_s1 + $0x648] ss:$16 sps:$4 sm:$0xff]   ;;  %v2701_v36 = vld [vmem:[%s3630_s1 + $0x664] ss:$16 sps:$4 sm:$0xff]  }
  0x90   :  { %1713 = vmatprep.subr.bf16.mxu0 %v2610_v37  ;;  %1877 = vmatprep.subr.bf16.mxu1 %v2613_v38  ;;  %v2704_v37 = vld [vmem:[%s3630_s1 + $0x66c] ss:$16 sps:$4 sm:$0xff]   ;;  %v2699_v38 = vld [vmem:[%s3630_s1 + $0x660] ss:$16 sps:$4 sm:$0xff]  }
  0x93   :  { %1714 = vmatpush1.bf16.msra.mxu0 %v2608_v39  ;;  %1878 = vmatpush1.bf16.msra.mxu1 %v2611_v40  ;;  %v2702_v39 = vld [vmem:[%s3630_s1 + $0x668] ss:$16 sps:$4 sm:$0xff]   ;;  %v2707_v40 = vld [vmem:[%s3630_s1 + $0x684] ss:$16 sps:$4 sm:$0xff]  }
  0x94   :  { %1715 = vmatprep.subr.bf16.mxu0 %v2616_v41  ;;  %1879 = vmatprep.subr.bf16.mxu1 %v2619_v42  ;;  %v2710_v41 = vld [vmem:[%s3630_s1 + $0x68c] ss:$16 sps:$4 sm:$0xff]   ;;  %v2705_v42 = vld [vmem:[%s3630_s1 + $0x680] ss:$16 sps:$4 sm:$0xff]  }
  0x97   :  { %1716 = vmatpush1.bf16.msra.mxu0 %v2614_v44  ;;  %1880 = vmatpush1.bf16.msra.mxu1 %v2617_v45  ;;  %v2708_v44 = vld [vmem:[%s3630_s1 + $0x688] ss:$16 sps:$4 sm:$0xff]   ;;  %v2713_v45 = vld [vmem:[%s3630_s1 + $0x6a4] ss:$16 sps:$4 sm:$0xff]  }
  0x98   :  { %1717 = vmatprep.subr.bf16.mxu0 %v2622_v46  ;;  %1881 = vmatprep.subr.bf16.mxu1 %v2625_v47  ;;  %v2716_v46 = vld [vmem:[%s3630_s1 + $0x6ac] ss:$16 sps:$4 sm:$0xff]   ;;  %v2711_v47 = vld [vmem:[%s3630_s1 + $0x6a0] ss:$16 sps:$4 sm:$0xff]  }
  0x9b   :  { %1718 = vmatpush1.bf16.msra.mxu0 %v2620_v48  ;;  %1882 = vmatpush1.bf16.msra.mxu1 %v2623_v49  ;;  %v2714_v48 = vld [vmem:[%s3630_s1 + $0x6a8] ss:$16 sps:$4 sm:$0xff]   ;;  %v2719_v49 = vld [vmem:[%s3630_s1 + $0x6c4] ss:$16 sps:$4 sm:$0xff]  }
  0x9c   :  { %1719 = vmatprep.subr.bf16.mxu0 %v2628_v50  ;;  %1883 = vmatprep.subr.bf16.mxu1 %v2631_v51  ;;  %v2722_v50 = vld [vmem:[%s3630_s1 + $0x6cc] ss:$16 sps:$4 sm:$0xff]   ;;  %v2717_v51 = vld [vmem:[%s3630_s1 + $0x6c0] ss:$16 sps:$4 sm:$0xff]  }
  0x9f   :  { %1720 = vmatpush1.bf16.msra.mxu0 %v2626_v52  ;;  %1884 = vmatpush1.bf16.msra.mxu1 %v2629_v53  ;;  %v2720_v52 = vld [vmem:[%s3630_s1 + $0x6c8] ss:$16 sps:$4 sm:$0xff]   ;;  %v2725_v53 = vld [vmem:[%s3630_s1 + $0x6e4] ss:$16 sps:$4 sm:$0xff]  }
  0xa0   :  { %1721 = vmatprep.subr.bf16.mxu0 %v2634_v54  ;;  %1885 = vmatprep.subr.bf16.mxu1 %v2637_v55  ;;  %v2728_v54 = vld [vmem:[%s3630_s1 + $0x6ec] ss:$16 sps:$4 sm:$0xff]   ;;  %v2723_v55 = vld [vmem:[%s3630_s1 + $0x6e0] ss:$16 sps:$4 sm:$0xff]  }
  0xa3   :  { %1722 = vmatpush1.bf16.msra.mxu0 %v2632_v56  ;;  %1886 = vmatpush1.bf16.msra.mxu1 %v2635_v57  ;;  %v2726_v56 = vld [vmem:[%s3630_s1 + $0x6e8] ss:$16 sps:$4 sm:$0xff]   ;;  %v2731_v57 = vld [vmem:[%s3630_s1 + $0x704] ss:$16 sps:$4 sm:$0xff]  }
  0xa4   :  { %1723 = vmatprep.subr.bf16.mxu0 %v2640_v58  ;;  %1887 = vmatprep.subr.bf16.mxu1 %v2643_v59  ;;  %v2734_v58 = vld [vmem:[%s3630_s1 + $0x70c] ss:$16 sps:$4 sm:$0xff]   ;;  %v2729_v59 = vld [vmem:[%s3630_s1 + $0x700] ss:$16 sps:$4 sm:$0xff]  }
  0xa7   :  { %1724 = vmatpush1.bf16.msra.mxu0 %v2638_v60  ;;  %1888 = vmatpush1.bf16.msra.mxu1 %v2641_v61  ;;  %v2732_v60 = vld [vmem:[%s3630_s1 + $0x708] ss:$16 sps:$4 sm:$0xff]   ;;  %v2737_v61 = vld [vmem:[%s3630_s1 + $0x724] ss:$16 sps:$4 sm:$0xff]  }
  0xa8   :  { %1725 = vmatprep.subr.bf16.mxu0 %v2646_v62  ;;  %1889 = vmatprep.subr.bf16.mxu1 %v2649_v63  ;;  %v2740_v62 = vld [vmem:[%s3630_s1 + $0x72c] ss:$16 sps:$4 sm:$0xff]   ;;  %v2735_v63 = vld [vmem:[%s3630_s1 + $0x720] ss:$16 sps:$4 sm:$0xff]  }
  0xab   :  { %1726 = vmatpush1.bf16.msra.mxu0 %v2644_v0  ;;  %1890 = vmatpush1.bf16.msra.mxu1 %v2647_v1  ;;  %v2738_v0 = vld [vmem:[%s3630_s1 + $0x728] ss:$16 sps:$4 sm:$0xff]   ;;  %v2743_v1 = vld [vmem:[%s3630_s1 + $0x744] ss:$16 sps:$4 sm:$0xff]  }
  0xac   :  { %1727 = vmatprep.subr.bf16.mxu0 %v2652_v2  ;;  %1891 = vmatprep.subr.bf16.mxu1 %v2655_v3  ;;  %v2746_v2 = vld [vmem:[%s3630_s1 + $0x74c] ss:$16 sps:$4 sm:$0xff]   ;;  %v2741_v3 = vld [vmem:[%s3630_s1 + $0x740] ss:$16 sps:$4 sm:$0xff]  }
  0xaf   :  { %1728 = vmatpush1.bf16.msra.mxu0 %v2650_v4  ;;  %1892 = vmatpush1.bf16.msra.mxu1 %v2653_v5  ;;  %v2744_v4 = vld [vmem:[%s3630_s1 + $0x748] ss:$16 sps:$4 sm:$0xff]   ;;  %v2749_v5 = vld [vmem:[%s3630_s1 + $0x764] ss:$16 sps:$4 sm:$0xff]  }
  0xb0   :  { %1729 = vmatprep.subr.bf16.mxu0 %v2658_v6  ;;  %1893 = vmatprep.subr.bf16.mxu1 %v2661_v7  ;;  %v2752_v6 = vld [vmem:[%s3630_s1 + $0x76c] ss:$16 sps:$4 sm:$0xff]   ;;  %v2747_v7 = vld [vmem:[%s3630_s1 + $0x760] ss:$16 sps:$4 sm:$0xff]  }
  0xb3   :  { %1730 = vmatpush1.bf16.msra.mxu0 %v2656_v8  ;;  %1894 = vmatpush1.bf16.msra.mxu1 %v2659_v9  ;;  %v2750_v8 = vld [vmem:[%s3630_s1 + $0x768] ss:$16 sps:$4 sm:$0xff]   ;;  %v2755_v9 = vld [vmem:[%s3630_s1 + $0x784] ss:$16 sps:$4 sm:$0xff]  }
  0xb4   :  { %1731 = vmatprep.subr.bf16.mxu0 %v2664_v10  ;;  %1895 = vmatprep.subr.bf16.mxu1 %v2667_v11  ;;  %v2758_v10 = vld [vmem:[%s3630_s1 + $0x78c] ss:$16 sps:$4 sm:$0xff]   ;;  %v2753_v11 = vld [vmem:[%s3630_s1 + $0x780] ss:$16 sps:$4 sm:$0xff]  }
  0xb7   :  { %1732 = vmatpush1.bf16.msra.mxu0 %v2662_v12  ;;  %1896 = vmatpush1.bf16.msra.mxu1 %v2665_v13  ;;  %v2756_v12 = vld [vmem:[%s3630_s1 + $0x788] ss:$16 sps:$4 sm:$0xff]   ;;  %v2761_v13 = vld [vmem:[%s3630_s1 + $0x7a4] ss:$16 sps:$4 sm:$0xff]  }
  0xb8   :  { %1733 = vmatprep.subr.bf16.mxu0 %v2670_v14  ;;  %1897 = vmatprep.subr.bf16.mxu1 %v2673_v16  ;;  %v2764_v14 = vld [vmem:[%s3630_s1 + $0x7ac] ss:$16 sps:$4 sm:$0xff]   ;;  %v2759_v16 = vld [vmem:[%s3630_s1 + $0x7a0] ss:$16 sps:$4 sm:$0xff]  }
  0xbb   :  { %1734 = vmatpush1.bf16.msra.mxu0 %v2668_v17  ;;  %1898 = vmatpush1.bf16.msra.mxu1 %v2671_v18  ;;  %v2762_v17 = vld [vmem:[%s3630_s1 + $0x7a8] ss:$16 sps:$4 sm:$0xff]   ;;  %v2767_v18 = vld [vmem:[%s3630_s1 + $0x7c4] ss:$16 sps:$4 sm:$0xff]  }
  0xbc   :  { %1735 = vmatprep.subr.bf16.mxu0 %v2676_v19  ;;  %1899 = vmatprep.subr.bf16.mxu1 %v2679_v22  ;;  %v2770_v19 = vld [vmem:[%s3630_s1 + $0x7cc] ss:$16 sps:$4 sm:$0xff]   ;;  %v2765_v22 = vld [vmem:[%s3630_s1 + $0x7c0] ss:$16 sps:$4 sm:$0xff]  }
  0xbf   :  { %1736 = vmatpush1.bf16.msra.mxu0 %v2674_v23  ;;  %1900 = vmatpush1.bf16.msra.mxu1 %v2677_v24  ;;  %v2768_v23 = vld [vmem:[%s3630_s1 + $0x7c8] ss:$16 sps:$4 sm:$0xff]   ;;  %v2773_v24 = vld [vmem:[%s3630_s1 + $0x7e4] ss:$16 sps:$4 sm:$0xff]  }
  0xc0   :  { %1746 = vmatprep.subr.bf16.mxu0 %v2683_v25  ;;  %1910 = vmatprep.subr.bf16.mxu1 %v2686_v26  ;;  %v2776_v25 = vld [vmem:[%s3630_s1 + $0x7ec] ss:$16 sps:$4 sm:$0xff]   ;;  %v2771_v26 = vld [vmem:[%s3630_s1 + $0x7e0] ss:$16 sps:$4 sm:$0xff]  }
  0xc2   :  { %1738 = vmatmul.mubr.bf16.vlgmr.msra.gmra.mrb[0].mxu0 %v3041_v21  ;;  %1902 = vmatmul.mubr.bf16.vlgmr.msra.gmra.mrb[0].mxu1 %v3041_v21 }
  0xc3   :  { %1747 = vmatpush1.bf16.msra.mxu0 %v2681_v27  ;;  %1911 = vmatpush1.bf16.msra.mxu1 %v2684_v15  ;;  %v2774_v27 = vld [vmem:[%s3630_s1 + $0x7e8] ss:$16 sps:$4 sm:$0xff]   ;;  %v332_v15 = vcombine.high %v3041_v21, %v3041_v21  ;;  %v1979_v21 = vld [vmem:[%s3633_s2] sm:$0xf] }
  0xc4   :  { %1748 = vmatprep.subr.bf16.mxu0 %v2689_v28  ;;  %1912 = vmatprep.subr.bf16.mxu1 %v2692_v29  ;;  %v10_v28 = vstv %s3632_s4  ;;  %v2782_v29 = vmov 1983009808  }
  0xc5   :  { %1778 = vmatprep.mubr.bf16.mxu0 %v334_v30  ;;  %1942 = vmatprep.mubr.bf16.mxu1 %v334_v30  ;;  %11 = vst [vmem:[#allocation3] sm:$0x1] %v10_v28  ;;  %v1958_v30 = vunpack.c.l.s4 %v2782_v29 }
  0xc7   :  { %1749 = vmatpush1.bf16.msra.mxu0 %v2687_v31  ;;  %1913 = vmatpush1.bf16.msra.mxu1 %v2690_v32  ;;  %v1983_v31 = vsub.s32 0, %v2930_v43  ;;  %v1987_v32 = vsub.s32 1, %v2930_v43 }
  0xc8   :  { %1750 = vmatprep.subr.bf16.mxu0 %v2695_v20  ;;  %1914 = vmatprep.subr.bf16.mxu1 %v2698_v33  ;;  %v1991_v20 = vsub.s32 2, %v2930_v43  ;;  %v1995_v33 = vsub.s32 3, %v2930_v43 }
  0xcb   :  { %1751 = vmatpush1.bf16.msra.mxu0 %v2693_v34  ;;  %1915 = vmatpush1.bf16.msra.mxu1 %v2696_v35  ;;  %v1959_v34 = vunpack.c.0.s8 %v1958_v30  ;;  %v1984_v35 = vrot.slane %v1979_v21, %v1983_v31 }
  0xcc   :  { %1752 = vmatprep.subr.bf16.mxu0 %v2701_v36  ;;  %1916 = vmatprep.subr.bf16.mxu1 %v2704_v37  ;;  %v1988_v36 = vrot.slane %v1979_v21, %v1987_v32  ;;  %v1992_v37 = vrot.slane %v1979_v21, %v1991_v20 }
  0xcf   :  { %1753 = vmatpush1.bf16.msra.mxu0 %v2699_v38  ;;  %1917 = vmatpush1.bf16.msra.mxu1 %v2702_v39  ;;  %v1996_v38 = vrot.slane %v1979_v21, %v1995_v33  ;;  %v2019_v39 = vld [vmem:[%s3634_s3] sm:$0xf] }
  0xd0   :  { %1754 = vmatprep.subr.bf16.mxu0 %v2707_v40  ;;  %1918 = vmatprep.subr.bf16.mxu1 %v2710_v41  ;;  %v1962_v40 = vsub.s32 %v1959_v34, %v2930_v43  ;;  %v1997_v41 = vcombine.low %v1984_v35, %v1988_v36 }
  0xd3   :  { %1755 = vmatpush1.bf16.msra.mxu0 %v2705_v42  ;;  %1919 = vmatpush1.bf16.msra.mxu1 %v2708_v44  ;;  %v1998_v42 = vcombine.low %v1992_v37, %v1996_v38  ;;  %v2024_v44 = vrot.slane %v2019_v39, %v1983_v31 }
  0xd4   :  { %1756 = vmatprep.subr.bf16.mxu0 %v2713_v45  ;;  %1920 = vmatprep.subr.bf16.mxu1 %v2716_v46  ;;  %v2028_v45 = vrot.slane %v2019_v39, %v1987_v32  ;;  %v2032_v46 = vrot.slane %v2019_v39, %v1991_v20 }
  0xd7   :  { %1757 = vmatpush1.bf16.msra.mxu0 %v2711_v47  ;;  %1921 = vmatpush1.bf16.msra.mxu1 %v2714_v48  ;;  %v2036_v47 = vrot.slane %v2019_v39, %v1995_v33 }
  0xd8   :  { %1758 = vmatprep.subr.bf16.mxu0 %v2719_v49  ;;  %1922 = vmatprep.subr.bf16.mxu1 %v2722_v50  ;;  %v2005_v50 = vrot.slane %v1997_v41, %v1962_v40 }
  0xdb   :  { %1759 = vmatpush1.bf16.msra.mxu0 %v2717_v51  ;;  %1923 = vmatpush1.bf16.msra.mxu1 %v2720_v52  ;;  %v2012_v51 = vrot.slane %v1998_v42, %v1962_v40 }
  0xdc   :  { %1760 = vmatprep.subr.bf16.mxu0 %v2725_v53  ;;  %1924 = vmatprep.subr.bf16.mxu1 %v2728_v54  ;;  %v2037_v54 = vcombine.low %v2024_v44, %v2028_v45 }
  0xdf   :  { %1761 = vmatpush1.bf16.msra.mxu0 %v2723_v55  ;;  %1925 = vmatpush1.bf16.msra.mxu1 %v2726_v56  ;;  %v2038_v55 = vcombine.low %v2032_v46, %v2036_v47 }
  0xe0   :  { %1762 = vmatprep.subr.bf16.mxu0 %v2731_v57  ;;  %1926 = vmatprep.subr.bf16.mxu1 %v2734_v58 }
  0xe3   :  { %1763 = vmatpush1.bf16.msra.mxu0 %v2729_v59  ;;  %1927 = vmatpush1.bf16.msra.mxu1 %v2732_v60 }
  0xe4   :  { %1764 = vmatprep.subr.bf16.mxu0 %v2737_v61  ;;  %1928 = vmatprep.subr.bf16.mxu1 %v2740_v62 }
  0xe7   :  { %1765 = vmatpush1.bf16.msra.mxu0 %v2735_v63  ;;  %1929 = vmatpush1.bf16.msra.mxu1 %v2738_v0  ;;  %v2013_v63 = vcombine.low %v2005_v50, %v2012_v51  ;;  %v2045_v0 = vrot.slane %v2037_v54, %v1962_v40 }
  0xe8   :  { %1766 = vmatprep.subr.bf16.mxu0 %v2743_v1  ;;  %1930 = vmatprep.subr.bf16.mxu1 %v2746_v2  ;;  %v2052_v1 = vrot.slane %v2038_v55, %v1962_v40 }
  0xeb   :  { %1767 = vmatpush1.bf16.msra.mxu0 %v2741_v3  ;;  %1931 = vmatpush1.bf16.msra.mxu1 %v2744_v4  ;;  %v2053_v4 = vcombine.low %v2045_v0, %v2052_v1 }
  0xec   :  { %1768 = vmatprep.subr.bf16.mxu0 %v2749_v5  ;;  %1932 = vmatprep.subr.bf16.mxu1 %v2752_v6 }
  0xef   :  { %1769 = vmatpush1.bf16.msra.mxu0 %v2747_v7  ;;  %1933 = vmatpush1.bf16.msra.mxu1 %v2750_v8 }
  0xf0   :  { %1770 = vmatprep.subr.bf16.mxu0 %v2755_v9  ;;  %1934 = vmatprep.subr.bf16.mxu1 %v2758_v10 }
  0xf3   :  { %1771 = vmatpush1.bf16.msra.mxu0 %v2753_v11  ;;  %1935 = vmatpush1.bf16.msra.mxu1 %v2756_v12 }
  0xf4   :  { %1772 = vmatprep.subr.bf16.mxu0 %v2761_v13  ;;  %1936 = vmatprep.subr.bf16.mxu1 %v2764_v14 }
  0xf7   :  { %1773 = vmatpush1.bf16.msra.mxu0 %v2759_v16  ;;  %1937 = vmatpush1.bf16.msra.mxu1 %v2762_v17 }
  0xf8   :  { %1774 = vmatprep.subr.bf16.mxu0 %v2767_v18  ;;  %1938 = vmatprep.subr.bf16.mxu1 %v2770_v19 }
  0xfb   :  { %1775 = vmatpush1.bf16.msra.mxu0 %v2765_v22  ;;  %1939 = vmatpush1.bf16.msra.mxu1 %v2768_v23  ;;  %v2364_v23 = vld [vmem:[#allocation3] ss:$0 sm:$0xff] }
  0xfc   :  { %1776 = vmatprep.subr.bf16.mxu0 %v2773_v24  ;;  %1940 = vmatprep.subr.bf16.mxu1 %v2776_v25 }
  0xff   :  { %1777 = vmatpush1.bf16.msra.mxu0 %v2771_v26  ;;  %1941 = vmatpush1.bf16.msra.mxu1 %v2774_v27 }
 0x102   :  { %1779 = vmatmul.mubr.bf16.vlgmr.msra.gmra.mrb[0].mxu0 %v332_v15  ;;  %1943 = vmatmul.mubr.bf16.vlgmr.msra.gmra.mrb[0].mxu1 %v332_v15 }
 0x1d5   :  { %v1780_v48 = vpop.f32.mrb[0].mxu0  ;;  %v1944_v49 = vpop.f32.mrb[0].mxu1 }
 0x1d6   :  { %v1782_v52 = vpop.f32.mrb[1].mxu0  ;;  %v1946_v53 = vpop.f32.mrb[1].mxu1 }
 0x1d7   :  { %v1955_v56 = vcombine.low %v1780_v48, %v1782_v52  ;;  %v1956_v57 = vcombine.low %v1944_v49, %v1946_v53  ;;  %v1784_v58 = vpop.f32.mrb[2].mxu0  ;;  %v1948_v59 = vpop.f32.mrb[2].mxu1 }
 0x1d8   :  { %v1785_v60 = vpop.f32.mrb[3].mxu0  ;;  %v1949_v43 = vpop.f32.mrb[3].mxu1 }
 0x1d9   :  { %v1963_v61 = vrot.slane %v1955_v56, %v1962_v40  ;;  %v1970_v62 = vrot.slane %v1956_v57, %v1962_v40 }
 0x1db   :  { %v1971_v2 = vcombine.low %v1963_v61, %v1970_v62 }
 0x1dd   :  { %v2015_v3 = vadd.f32 %v2013_v63, %v1971_v2 }
 0x1df   :  { %vm2016_vm0 = vcmp.gt.f32.partialorder %v2015_v3, 0.0  ;;  %v2017_v5 = vmul.f32 0.2, %v2015_v3 }
 0x1e1   :  { %v2018_v6 = vsel %vm2016_vm0, %v2015_v3, %v2017_v5 }
 0x1e2   :  { %v2055_v7 = vmul.f32 %v2053_v4, %v2018_v6 }
 0x1e4   :  { %v2057_v8 = vcombine.high %v2055_v7, %v2055_v7  ;;  %v2064_v9 = vrot.slane %v2055_v7, %v1962_v40 }
 0x1e6   :  { %v2071_v10 = vrot.slane %v2057_v8, %v1962_v40  ;;  %v2072_v11 = vcombine.high %v2064_v9, %v2064_v9  ;;  %v2079_v13 = vsel %vm2078_vm1, %v2064_v9, 0.0 }
 0x1e8   :  { %v2073_v12 = vcombine.high %v2071_v10, %v2071_v10  ;;  %v2080_v14 = vsel %vm2078_vm1, %v2072_v11, 0.0  ;;  %v2082_v17 = vsel %vm2078_vm1, %v2071_v10, 0.0 }
 0x1e9   :  { %v2081_v16 = vadd.f32 %v2080_v14, %v2079_v13 }
 0x1ea   :  { %v2084_v19 = vsel %vm2078_vm1, %v2073_v12, 0.0 }
 0x1eb   :  { %v2083_v18 = vadd.f32 %v2082_v17, %v2081_v16 }
 0x1ed   :  { %v2085_v22 = vadd.f32 %v2084_v19, %v2083_v18 }
 0x1ef   :  { %2086 = vadd.xlane.f32.xlu0 %v2085_v22 }
 0x27c   :  { %v2087_v24 = vpop.xlane.xlu0 %2086 }
 0x27d   :  { %v2095_v25 = vadd.f32 %v2364_v23, %v2087_v24 }
 0x27f   :  { %v2365_v26 = vmul.f32 -1.442695, %v2095_v25 }
 0x281   :  { %2777 = vpow2.f32 %v2365_v26 }
 0x28b   :  { %v2778_v27 = vpop.eup %2777 }
 0x28c   :  { %v2099_v15 = vadd.f32 1.0, %v2778_v27 }
 0x28e   :  { %2779 = vrcp.f32 %v2099_v15 }
 0x298   :  { %v2780_v28 = vpop.eup %2779 }
 0x299   :  { %2103 = vst.msk [vmem:[%s3635_s5] sm:$0x3] %vm2102_vm2, %v2780_v28 }

</bundles_post_ra>
